<compile_context>
chip_gen: v5e
topology: v5e:2x2
jax: 0.10.0
libtpu: 0.0.40
codegen_flags: <defaults>
</compile_context>

<pallas_src>
import jax
import jax.numpy as jnp
from jax.experimental import pallas as pl
from jax.experimental.pallas import tpu as pltpu

INPUT_SIZE = 33 * 3            # 99
D_MODEL = 96
N_HEADS = 8
HEAD_DIM = D_MODEL // N_HEADS  # 12
D_FF = 512
N_LAYERS = 4
FC_HIDDEN = 256
N_CLASSES = 10
LN_EPS = 1e-5

D_PAD = 128                    # padded feature width (lane-dense)
HD_PAD = 16                    # per-head dim padded 12 -> 16
HHD = N_HEADS * HD_PAD         # 128  (one 128-lane section per Q/K/V)
QKV_PAD = 3 * HHD              # 384
OUT_PAD = 128                  # padded class width (lane-dense output store)


# ------------------------------- fused kernel ------------------------------ #

def _make_kernel(B, S):
    BS = B * S
    G = B * N_HEADS            # head-batched group count

    def kernel(x_ref,                              # (BS, 128) f32 padded input
               pw_ref, pb_ref,                     # (128,128) bf16, (1,128) f32
               wqkv_ref, bqkv_ref,                 # (128,384) bf16, (1,384) f32   (per layer)
               wo_ref, bo_ref,                     # (H,16,128) bf16, (1,128) f32  (per layer)
               ln1g_ref, ln1b_ref,                 # (1,128) f32 each              (per layer)
               w1_ref, b1_ref,                     # (128,512) bf16, (1,512) f32   (per layer)
               w2_ref, b2_ref,                     # (512,128) bf16, (1,128) f32   (per layer)
               ln2g_ref, ln2b_ref,                 # (1,128) f32 each              (per layer)
               fc1w_ref, fc1b_ref,                 # (128,256) bf16, (1,256) f32
               fc2w_ref, fc2b_ref,                 # (256,128) bf16, (1,128) f32
               out_ref,                            # (B, 128) f32
               h_ref):                             # VMEM scratch (BS, 128) f32, carried
        f32 = jnp.float32
        l = pl.program_id(0)

        lane = jax.lax.broadcasted_iota(jnp.int32, (1, D_PAD), 1)
        ln_mask = (lane < D_MODEL).astype(f32)     # 1.0 on real features, 0.0 on padding
        inv_d = f32(1.0 / D_MODEL)

        def mm(a, w):
            # activations f32 -> cast to the (bf16) weight dtype; MXU accumulates in f32
            return jnp.dot(a.astype(w.dtype), w, preferred_element_type=f32)

        def layer_norm(v, g, b):
            # biased variance over the 96 real features (padded lanes are zero)
            mu = jnp.sum(v, axis=-1, keepdims=True) * inv_d
            c = (v - mu) * ln_mask
            var = jnp.sum(c * c, axis=-1, keepdims=True) * inv_d
            return c * jax.lax.rsqrt(var + LN_EPS) * g + b

        # ---- input projection: only on the first grid step ----
        @pl.when(l == 0)
        def _():
            h_ref[...] = mm(x_ref[...], pw_ref[...]) + pb_ref[...]

        h = h_ref[...]                                             # (BS, 128) f32

        # ---- fused QKV projection: ONE (BS,128)@(128,384) matmul ----
        # scale (1/sqrt(head_dim)) and the Q/K/V biases are folded in host-side.
        qkv = mm(h, wqkv_ref[...]) + bqkv_ref[...]                 # (BS, 384) f32

        def split_heads(sec):                                      # (BS, 128) -> (B*H, S, 16)
            parts = [sec[:, i * HD_PAD:(i + 1) * HD_PAD] for i in range(N_HEADS)]
            stacked = jnp.concatenate(parts, axis=0)               # (H*BS, 16), head-major rows
            return stacked.reshape(G, S, HD_PAD)                   # row-major identity reshape

        q = split_heads(qkv[:, 0:HHD])
        k = split_heads(qkv[:, HHD:2 * HHD])
        v = split_heads(qkv[:, 2 * HHD:3 * HHD])

        # ---- head-batched attention: one softmax chain per layer ----
        s = jnp.einsum('gqd,gkd->gqk', q, k, preferred_element_type=f32)   # (G, S, S)
        s = s - jnp.max(s, axis=-1, keepdims=True)
        p = jnp.exp(s)
        p = p * pl.reciprocal(jnp.sum(p, axis=-1, keepdims=True), approx=True)
        ob = jnp.einsum('gqk,gkd->gqd', p, v, preferred_element_type=f32)  # (G, S, 16)

        # ---- output projection: head-batched matmul + reduce over heads ----
        wo = wo_ref[...]                                           # (H, 16, 128) bf16
        ob_h = ob.reshape(N_HEADS, BS, HD_PAD)                     # identity reshape
        proj = jnp.einsum('hmd,hdn->hmn', ob_h.astype(wo.dtype), wo,
                          preferred_element_type=f32)              # (H, BS, 128)
        attn = jnp.sum(proj, axis=0) + bo_ref[...]                 # (BS, 128)

        # ---- post-norm TransformerEncoderLayer (dropout = identity in eval) ----
        y = layer_norm(h + attn, ln1g_ref[...], ln1b_ref[...])
        f1 = jnp.maximum(mm(y, w1_ref[...]) + b1_ref[...], 0.0)    # (BS, 512)
        f2 = mm(f1, w2_ref[...]) + b2_ref[...]                     # (BS, 128)
        h_new = layer_norm(y + f2, ln2g_ref[...], ln2b_ref[...])
        h_ref[...] = h_new

        # ---- mean over sequence + classifier: only on the last grid step ----
        @pl.when(l == N_LAYERS - 1)
        def _():
            pooled = jnp.mean(h_new.reshape(B, S, D_PAD), axis=1)            # (B, 128)
            g1 = jnp.maximum(mm(pooled, fc1w_ref[...]) + fc1b_ref[...], 0.0)  # (B, 256)
            logits = mm(g1, fc2w_ref[...]) + fc2b_ref[...]                    # (B, 128)
            out_ref[...] = logits.astype(out_ref.dtype)

    return kernel


# --------------------------------- wrapper --------------------------------- #

def forward(packed, x):
    B, S, f_in = x.shape
    BS = B * S
    x2 = x.reshape(BS, f_in)
    x2 = jnp.pad(x2, ((0, 0), (0, D_PAD - f_in)))      # zero-pad 99 -> 128 lanes

    def const2(shape):          # same block every grid step -> DMA'd once
        return pl.BlockSpec(shape, lambda l: (0, 0))

    def layer3(shape):          # per-layer slab, leading layer dim squeezed
        return pl.BlockSpec((None,) + shape, lambda l: (l, 0, 0))

    def layer4(shape):
        return pl.BlockSpec((None,) + shape, lambda l: (l, 0, 0, 0))

    in_specs = [
        const2((BS, D_PAD)),                   # x
        const2((D_PAD, D_PAD)),                # proj_w
        const2((1, D_PAD)),                    # proj_b
        layer3((D_PAD, QKV_PAD)),              # wqkv
        layer3((1, QKV_PAD)),                  # bqkv
        layer4((N_HEADS, HD_PAD, D_PAD)),      # wo
        layer3((1, D_PAD)),                    # bo
        layer3((1, D_PAD)),                    # ln1_g
        layer3((1, D_PAD)),                    # ln1_b
        layer3((D_PAD, D_FF)),                 # w1
        layer3((1, D_FF)),                     # b1
        layer3((D_FF, D_PAD)),                 # w2
        layer3((1, D_PAD)),                    # b2
        layer3((1, D_PAD)),                    # ln2_g
        layer3((1, D_PAD)),                    # ln2_b
        const2((D_PAD, FC_HIDDEN)),            # fc1_w
        const2((1, FC_HIDDEN)),                # fc1_b
        const2((FC_HIDDEN, OUT_PAD)),          # fc2_w
        const2((1, OUT_PAD)),                  # fc2_b
    ]

    out = pl.pallas_call(
        _make_kernel(B, S),
        out_shape=jax.ShapeDtypeStruct((B, OUT_PAD), jnp.float32),
        grid_spec=pltpu.PrefetchScalarGridSpec(
            num_scalar_prefetch=0,
            grid=(N_LAYERS,),
            in_specs=in_specs,
            out_specs=pl.BlockSpec((B, OUT_PAD), lambda l: (0, 0)),
            scratch_shapes=[pltpu.VMEM((BS, D_PAD), jnp.float32)],
        ),
        compiler_params=pltpu.CompilerParams(
            dimension_semantics=("arbitrary",),
            vmem_limit_bytes=32 * 1024 * 1024,
        ),
    )(x2,
      packed["proj_w"], packed["proj_b"],
      packed["wqkv"], packed["bqkv"], packed["wo"], packed["bo"],
      packed["ln1_g"], packed["ln1_b"],
      packed["w1"], packed["b1"], packed["w2"], packed["b2"],
      packed["ln2_g"], packed["ln2_b"],
      packed["fc1_w"], packed["fc1_b"], packed["fc2_w"], packed["fc2_b"])
    return out[:, :N_CLASSES]


# ------------------------ parameters: init + packing ----------------------- #

def init_params(key):
    """Logical (PyTorch-equivalent) parameters, weights stored (in, out)."""
    ks = iter(jax.random.split(key, 64))

    def u(shape, fan_in):
        b = fan_in ** -0.5
        return jax.random.uniform(next(ks), shape, jnp.float32, -b, b)

    p = {"proj_w": u((INPUT_SIZE, D_MODEL), INPUT_SIZE),
         "proj_b": u((D_MODEL,), INPUT_SIZE)}
    layers = []
    for _ in range(N_LAYERS):
        layers.append({
            "in_proj_w": u((D_MODEL, 3 * D_MODEL), D_MODEL),   # columns = [q | k | v]
            "in_proj_b": u((3 * D_MODEL,), D_MODEL),
            "out_proj_w": u((D_MODEL, D_MODEL), D_MODEL),
            "out_proj_b": u((D_MODEL,), D_MODEL),
            "ln1_g": jnp.ones((D_MODEL,), jnp.float32),
            "ln1_b": jnp.zeros((D_MODEL,), jnp.float32),
            "ffn_w1": u((D_MODEL, D_FF), D_MODEL),
            "ffn_b1": u((D_FF,), D_MODEL),
            "ffn_w2": u((D_FF, D_MODEL), D_FF),
            "ffn_b2": u((D_MODEL,), D_FF),
            "ln2_g": jnp.ones((D_MODEL,), jnp.float32),
            "ln2_b": jnp.zeros((D_MODEL,), jnp.float32),
        })
    p["layers"] = layers
    p["fc1_w"] = u((D_MODEL, FC_HIDDEN), D_MODEL)
    p["fc1_b"] = u((FC_HIDDEN,), D_MODEL)
    p["fc2_w"] = u((FC_HIDDEN, N_CLASSES), FC_HIDDEN)
    p["fc2_b"] = u((N_CLASSES,), FC_HIDDEN)
    return p


def pack_params(p):
    """Pad / reshape everything host-side into the lane-dense kernel layout.

    Matmul weights -> bf16; biases / LayerNorm params stay f32.  The attention scale
    1/sqrt(head_dim) and all Q/K/V biases are folded into the fused QKV weight/bias.
    """
    bf16 = jnp.bfloat16
    f32 = jnp.float32
    scale = HEAD_DIM ** -0.5

    def pad2(w, rows, cols, dtype):
        return jnp.pad(w, ((0, rows - w.shape[0]), (0, cols - w.shape[1]))).astype(dtype)

    def padrow(v, cols):
        return jnp.pad(v, (0, cols - v.shape[0]))[None, :].astype(f32)

    def head_pad_w(w):   # (96, 96) -> (128, H*HD_PAD=128); per-head columns padded 12 -> 16
        w = w.reshape(D_MODEL, N_HEADS, HEAD_DIM)
        w = jnp.pad(w, ((0, D_PAD - D_MODEL), (0, 0), (0, HD_PAD - HEAD_DIM)))
        return w.reshape(D_PAD, HHD)

    def head_pad_b(b):   # (96,) -> (128,)
        b = b.reshape(N_HEADS, HEAD_DIM)
        b = jnp.pad(b, ((0, 0), (0, HD_PAD - HEAD_DIM)))
        return b.reshape(HHD)

    packed = {
        "proj_w": pad2(p["proj_w"], D_PAD, D_PAD, bf16),
        "proj_b": padrow(p["proj_b"], D_PAD),
        "fc1_w": pad2(p["fc1_w"], D_PAD, FC_HIDDEN, bf16),
        "fc1_b": padrow(p["fc1_b"], FC_HIDDEN),
        "fc2_w": pad2(p["fc2_w"], FC_HIDDEN, OUT_PAD, bf16),
        "fc2_b": padrow(p["fc2_b"], OUT_PAD),
    }

    wqkv, bqkv, wo, bo = [], [], [], []
    ln1g, ln1b, w1, b1, w2, b2, ln2g, ln2b = [], [], [], [], [], [], [], []
    for lp in p["layers"]:
        wq = lp["in_proj_w"][:, :D_MODEL] * scale            # fold softmax scale into Q
        wk = lp["in_proj_w"][:, D_MODEL:2 * D_MODEL]
        wv = lp["in_proj_w"][:, 2 * D_MODEL:]
        bq = lp["in_proj_b"][:D_MODEL] * scale
        bk = lp["in_proj_b"][D_MODEL:2 * D_MODEL]
        bv = lp["in_proj_b"][2 * D_MODEL:]

        wqkv.append(jnp.concatenate(
            [head_pad_w(wq), head_pad_w(wk), head_pad_w(wv)], axis=1).astype(bf16))   # (128,384)
        bqkv.append(jnp.concatenate(
            [head_pad_b(bq), head_pad_b(bk), head_pad_b(bv)])[None, :].astype(f32))   # (1,384)

        w_o = lp["out_proj_w"].reshape(N_HEADS, HEAD_DIM, D_MODEL)
        w_o = jnp.pad(w_o, ((0, 0), (0, HD_PAD - HEAD_DIM), (0, D_PAD - D_MODEL)))
        wo.append(w_o.astype(bf16))                                                    # (8,16,128)
        bo.append(padrow(lp["out_proj_b"], D_PAD))

        ln1g.append(padrow(lp["ln1_g"], D_PAD))
        ln1b.append(padrow(lp["ln1_b"], D_PAD))
        w1.append(pad2(lp["ffn_w1"], D_PAD, D_FF, bf16))
        b1.append(padrow(lp["ffn_b1"], D_FF))
        w2.append(pad2(lp["ffn_w2"], D_FF, D_PAD, bf16))
        b2.append(padrow(lp["ffn_b2"], D_PAD))
        ln2g.append(padrow(lp["ln2_g"], D_PAD))
        ln2b.append(padrow(lp["ln2_b"], D_PAD))

    packed["wqkv"] = jnp.stack(wqkv)    # (L, 128, 384) bf16
    packed["bqkv"] = jnp.stack(bqkv)    # (L, 1, 384)   f32
    packed["wo"] = jnp.stack(wo)        # (L, 8, 16, 128) bf16
    packed["bo"] = jnp.stack(bo)        # (L, 1, 128)   f32
    packed["ln1_g"] = jnp.stack(ln1g)
    packed["ln1_b"] = jnp.stack(ln1b)
    packed["w1"] = jnp.stack(w1)        # (L, 128, 512) bf16
    packed["b1"] = jnp.stack(b1)        # (L, 1, 512)   f32
    packed["w2"] = jnp.stack(w2)        # (L, 512, 128) bf16
    packed["b2"] = jnp.stack(b2)        # (L, 1, 128)   f32
    packed["ln2_g"] = jnp.stack(ln2g)
    packed["ln2_b"] = jnp.stack(ln2b)
    return packed


# ----------------------------------- main ----------------------------------- #

if __name__ == "__main__":
    key = jax.random.PRNGKey(0)
    k_x, k_p = jax.random.split(key)

    B, S = 2, 8   # small batch / sequence; feature dim fixed by the module (33*3 = 99)
    x = jax.random.normal(k_x, (B, S, INPUT_SIZE), dtype=jnp.float32)
    params = pack_params(init_params(k_p))

    out = jax.jit(forward)(params, x)
    out = jax.block_until_ready(out)
    assert out.shape == (B, N_CLASSES), out.shape
    assert bool(jnp.all(jnp.isfinite(out)))
    print("KERNEL_OK")
</pallas_src>

<mosaic_0001>
module attributes {stable_mosaic.version = 11 : i64} {
  func.func @kernel(%arg0: i32, %arg1: memref<16x128xf32, #tpu.memory_space<vmem>>, %arg2: memref<128x128xbf16, #tpu.memory_space<vmem>>, %arg3: memref<1x128xf32, #tpu.memory_space<vmem>>, %arg4: memref<1x128x384xbf16, #tpu.memory_space<vmem>>, %arg5: memref<1x1x384xf32, #tpu.memory_space<vmem>>, %arg6: memref<1x8x16x128xbf16, #tpu.memory_space<vmem>>, %arg7: memref<1x1x128xf32, #tpu.memory_space<vmem>>, %arg8: memref<1x1x128xf32, #tpu.memory_space<vmem>>, %arg9: memref<1x1x128xf32, #tpu.memory_space<vmem>>, %arg10: memref<1x128x512xbf16, #tpu.memory_space<vmem>>, %arg11: memref<1x1x512xf32, #tpu.memory_space<vmem>>, %arg12: memref<1x512x128xbf16, #tpu.memory_space<vmem>>, %arg13: memref<1x1x128xf32, #tpu.memory_space<vmem>>, %arg14: memref<1x1x128xf32, #tpu.memory_space<vmem>>, %arg15: memref<1x1x128xf32, #tpu.memory_space<vmem>>, %arg16: memref<128x256xbf16, #tpu.memory_space<vmem>>, %arg17: memref<1x256xf32, #tpu.memory_space<vmem>>, %arg18: memref<256x128xbf16, #tpu.memory_space<vmem>>, %arg19: memref<1x128xf32, #tpu.memory_space<vmem>>, %arg20: memref<2x128xf32, #tpu.memory_space<vmem>>, %arg21: memref<16x128xf32, #tpu.memory_space<vmem>>) attributes {dimension_semantics = [#tpu.dimension_semantics<arbitrary>], iteration_bounds = array<i64: 4>, scalar_prefetch = 0 : i64, scratch_operands = 1 : i64, tpu.core_type = #tpu.core_type<tc>, window_params = [{pipeline_mode = #tpu.pipeline_mode<synchronous>, transform_indices = @transform_0, window_bounds = array<i64: 16, 128>}, {pipeline_mode = #tpu.pipeline_mode<synchronous>, transform_indices = @transform_1, window_bounds = array<i64: 128, 128>}, {pipeline_mode = #tpu.pipeline_mode<synchronous>, transform_indices = @transform_2, window_bounds = array<i64: 1, 128>}, {transform_indices = @transform_3, window_bounds = array<i64: 1, 128, 384>}, {transform_indices = @transform_4, window_bounds = array<i64: 1, 1, 384>}, {transform_indices = @transform_5, window_bounds = array<i64: 1, 8, 16, 128>}, {transform_indices = @transform_6, window_bounds = array<i64: 1, 1, 128>}, {transform_indices = @transform_7, window_bounds = array<i64: 1, 1, 128>}, {transform_indices = @transform_8, window_bounds = array<i64: 1, 1, 128>}, {transform_indices = @transform_9, window_bounds = array<i64: 1, 128, 512>}, {transform_indices = @transform_10, window_bounds = array<i64: 1, 1, 512>}, {transform_indices = @transform_11, window_bounds = array<i64: 1, 512, 128>}, {transform_indices = @transform_12, window_bounds = array<i64: 1, 1, 128>}, {transform_indices = @transform_13, window_bounds = array<i64: 1, 1, 128>}, {transform_indices = @transform_14, window_bounds = array<i64: 1, 1, 128>}, {pipeline_mode = #tpu.pipeline_mode<synchronous>, transform_indices = @transform_15, window_bounds = array<i64: 128, 256>}, {pipeline_mode = #tpu.pipeline_mode<synchronous>, transform_indices = @transform_16, window_bounds = array<i64: 1, 256>}, {pipeline_mode = #tpu.pipeline_mode<synchronous>, transform_indices = @transform_17, window_bounds = array<i64: 256, 128>}, {pipeline_mode = #tpu.pipeline_mode<synchronous>, transform_indices = @transform_18, window_bounds = array<i64: 1, 128>}, {pipeline_mode = #tpu.pipeline_mode<synchronous>, transform_indices = @transform_19, window_bounds = array<i64: 2, 128>}]} {
    %0 = tpu.iota {dimensions = array<i32: 1>} : vector<1x128xi32>
    %c96_i32 = arith.constant 96 : i32
    %1 = vector.broadcast %c96_i32 : i32 to vector<1x128xi32>
    %2 = arith.cmpi slt, %0, %1 : vector<1x128xi32>
    %3 = arith.extui %2 : vector<1x128xi1> to vector<1x128xi32>
    %4 = arith.sitofp %3 : vector<1x128xi32> to vector<1x128xf32>
    %c0_i32 = arith.constant 0 : i32
    %5 = arith.cmpi eq, %arg0, %c0_i32 : i32
    %6 = arith.extui %5 : i1 to i32
    %c0_i32_0 = arith.constant 0 : i32
    %7 = arith.cmpi ne, %6, %c0_i32_0 : i32
    scf.if %7 {
      %c0_61 = arith.constant 0 : index
      %c0_62 = arith.constant 0 : index
      %148 = vector.load %arg1[%c0_61, %c0_62] : memref<16x128xf32, #tpu.memory_space<vmem>>, vector<16x128xf32>
      %c0_63 = arith.constant 0 : index
      %c0_64 = arith.constant 0 : index
      %149 = vector.load %arg2[%c0_63, %c0_64] : memref<128x128xbf16, #tpu.memory_space<vmem>>, vector<128x128xbf16>
      %150 = arith.truncf %148 : vector<16x128xf32> to vector<16x128xbf16>
      %cst_65 = arith.constant dense<0.000000e+00> : vector<16x128xf32>
      %151 = tpu.matmul %150, %149, %cst_65 {dimension_numbers = #tpu.dot_dimension_numbers<[1], [0], [0], [1], [0, 0, 1, 1], [], []>} : vector<16x128xbf16>, vector<128x128xbf16>, vector<16x128xf32> -> vector<16x128xf32>
      %c0_66 = arith.constant 0 : index
      %c0_67 = arith.constant 0 : index
      %152 = vector.load %arg3[%c0_66, %c0_67] : memref<1x128xf32, #tpu.memory_space<vmem>>, vector<1x128xf32>
      %153 = vector.broadcast %152 : vector<1x128xf32> to vector<16x128xf32>
      %154 = arith.addf %151, %153 : vector<16x128xf32>
      %c0_68 = arith.constant 0 : index
      %c0_69 = arith.constant 0 : index
      %155 = vector.load %arg21[%c0_68, %c0_69] : memref<16x128xf32, #tpu.memory_space<vmem>>, vector<16x128xf32>
      tpu.vector_store %arg21[%c0_68, %c0_69], %154 {strides = array<i32>} : memref<16x128xf32, #tpu.memory_space<vmem>>, vector<16x128xf32>,
    } else {
    }
    %c0 = arith.constant 0 : index
    %c0_1 = arith.constant 0 : index
    %8 = vector.load %arg21[%c0, %c0_1] : memref<16x128xf32, #tpu.memory_space<vmem>>, vector<16x128xf32>
    %c0_2 = arith.constant 0 : index
    %c0_3 = arith.constant 0 : index
    %c0_4 = arith.constant 0 : index
    %9 = vector.load %arg4[%c0_2, %c0_3, %c0_4] : memref<1x128x384xbf16, #tpu.memory_space<vmem>>, vector<1x128x384xbf16>
    %10 = vector.shape_cast %9 : vector<1x128x384xbf16> to vector<128x384xbf16>
    %11 = arith.truncf %8 : vector<16x128xf32> to vector<16x128xbf16>
    %cst = arith.constant dense<0.000000e+00> : vector<16x384xf32>
    %12 = tpu.matmul %11, %10, %cst {dimension_numbers = #tpu.dot_dimension_numbers<[1], [0], [0], [1], [0, 0, 1, 1], [], []>} : vector<16x128xbf16>, vector<128x384xbf16>, vector<16x384xf32> -> vector<16x384xf32>
    %c0_5 = arith.constant 0 : index
    %c0_6 = arith.constant 0 : index
    %c0_7 = arith.constant 0 : index
    %13 = vector.load %arg5[%c0_5, %c0_6, %c0_7] : memref<1x1x384xf32, #tpu.memory_space<vmem>>, vector<1x1x384xf32>
    %14 = vector.shape_cast %13 : vector<1x1x384xf32> to vector<1x384xf32>
    %15 = vector.broadcast %14 : vector<1x384xf32> to vector<16x384xf32>
    %16 = arith.addf %12, %15 : vector<16x384xf32>
    %17 = vector.extract_strided_slice %16 {offsets = [0, 0], sizes = [16, 128], strides = [1, 1]} : vector<16x384xf32> to vector<16x128xf32>
    %18 = vector.extract_strided_slice %17 {offsets = [0, 0], sizes = [16, 16], strides = [1, 1]} : vector<16x128xf32> to vector<16x16xf32>
    %19 = vector.extract_strided_slice %17 {offsets = [0, 16], sizes = [16, 16], strides = [1, 1]} : vector<16x128xf32> to vector<16x16xf32>
    %20 = vector.extract_strided_slice %17 {offsets = [0, 32], sizes = [16, 16], strides = [1, 1]} : vector<16x128xf32> to vector<16x16xf32>
    %21 = vector.extract_strided_slice %17 {offsets = [0, 48], sizes = [16, 16], strides = [1, 1]} : vector<16x128xf32> to vector<16x16xf32>
    %22 = vector.extract_strided_slice %17 {offsets = [0, 64], sizes = [16, 16], strides = [1, 1]} : vector<16x128xf32> to vector<16x16xf32>
    %23 = vector.extract_strided_slice %17 {offsets = [0, 80], sizes = [16, 16], strides = [1, 1]} : vector<16x128xf32> to vector<16x16xf32>
    %24 = vector.extract_strided_slice %17 {offsets = [0, 96], sizes = [16, 16], strides = [1, 1]} : vector<16x128xf32> to vector<16x16xf32>
    %25 = vector.extract_strided_slice %17 {offsets = [0, 112], sizes = [16, 16], strides = [1, 1]} : vector<16x128xf32> to vector<16x16xf32>
    %26 = tpu.concatenate %18, %19, %20, %21, %22, %23, %24, %25 in 0 : vector<16x16xf32>, vector<16x16xf32>, vector<16x16xf32>, vector<16x16xf32>, vector<16x16xf32>, vector<16x16xf32>, vector<16x16xf32>, vector<16x16xf32> -> vector<128x16xf32>
    %27 = vector.shape_cast %26 : vector<128x16xf32> to vector<16x8x16xf32>
    %28 = vector.extract_strided_slice %16 {offsets = [0, 128], sizes = [16, 128], strides = [1, 1]} : vector<16x384xf32> to vector<16x128xf32>
    %29 = vector.extract_strided_slice %28 {offsets = [0, 0], sizes = [16, 16], strides = [1, 1]} : vector<16x128xf32> to vector<16x16xf32>
    %30 = vector.extract_strided_slice %28 {offsets = [0, 16], sizes = [16, 16], strides = [1, 1]} : vector<16x128xf32> to vector<16x16xf32>
    %31 = vector.extract_strided_slice %28 {offsets = [0, 32], sizes = [16, 16], strides = [1, 1]} : vector<16x128xf32> to vector<16x16xf32>
    %32 = vector.extract_strided_slice %28 {offsets = [0, 48], sizes = [16, 16], strides = [1, 1]} : vector<16x128xf32> to vector<16x16xf32>
    %33 = vector.extract_strided_slice %28 {offsets = [0, 64], sizes = [16, 16], strides = [1, 1]} : vector<16x128xf32> to vector<16x16xf32>
    %34 = vector.extract_strided_slice %28 {offsets = [0, 80], sizes = [16, 16], strides = [1, 1]} : vector<16x128xf32> to vector<16x16xf32>
    %35 = vector.extract_strided_slice %28 {offsets = [0, 96], sizes = [16, 16], strides = [1, 1]} : vector<16x128xf32> to vector<16x16xf32>
    %36 = vector.extract_strided_slice %28 {offsets = [0, 112], sizes = [16, 16], strides = [1, 1]} : vector<16x128xf32> to vector<16x16xf32>
    %37 = tpu.concatenate %29, %30, %31, %32, %33, %34, %35, %36 in 0 : vector<16x16xf32>, vector<16x16xf32>, vector<16x16xf32>, vector<16x16xf32>, vector<16x16xf32>, vector<16x16xf32>, vector<16x16xf32>, vector<16x16xf32> -> vector<128x16xf32>
    %38 = vector.shape_cast %37 : vector<128x16xf32> to vector<16x8x16xf32>
    %39 = vector.extract_strided_slice %16 {offsets = [0, 256], sizes = [16, 128], strides = [1, 1]} : vector<16x384xf32> to vector<16x128xf32>
    %40 = vector.extract_strided_slice %39 {offsets = [0, 0], sizes = [16, 16], strides = [1, 1]} : vector<16x128xf32> to vector<16x16xf32>
    %41 = vector.extract_strided_slice %39 {offsets = [0, 16], sizes = [16, 16], strides = [1, 1]} : vector<16x128xf32> to vector<16x16xf32>
    %42 = vector.extract_strided_slice %39 {offsets = [0, 32], sizes = [16, 16], strides = [1, 1]} : vector<16x128xf32> to vector<16x16xf32>
    %43 = vector.extract_strided_slice %39 {offsets = [0, 48], sizes = [16, 16], strides = [1, 1]} : vector<16x128xf32> to vector<16x16xf32>
    %44 = vector.extract_strided_slice %39 {offsets = [0, 64], sizes = [16, 16], strides = [1, 1]} : vector<16x128xf32> to vector<16x16xf32>
    %45 = vector.extract_strided_slice %39 {offsets = [0, 80], sizes = [16, 16], strides = [1, 1]} : vector<16x128xf32> to vector<16x16xf32>
    %46 = vector.extract_strided_slice %39 {offsets = [0, 96], sizes = [16, 16], strides = [1, 1]} : vector<16x128xf32> to vector<16x16xf32>
    %47 = vector.extract_strided_slice %39 {offsets = [0, 112], sizes = [16, 16], strides = [1, 1]} : vector<16x128xf32> to vector<16x16xf32>
    %48 = tpu.concatenate %40, %41, %42, %43, %44, %45, %46, %47 in 0 : vector<16x16xf32>, vector<16x16xf32>, vector<16x16xf32>, vector<16x16xf32>, vector<16x16xf32>, vector<16x16xf32>, vector<16x16xf32>, vector<16x16xf32> -> vector<128x16xf32>
    %49 = vector.shape_cast %48 : vector<128x16xf32> to vector<16x8x16xf32>
    "tpu.trace_start"() <{level = 10 : i32, message = "gqd,gkd->gqk"}> : () -> ()
    %cst_8 = arith.constant dense<0.000000e+00> : vector<16x8x8xf32>
    %50 = tpu.matmul %27, %38, %cst_8 {dimension_numbers = #tpu.dot_dimension_numbers<[2], [2], [1], [1], [0, 0, 0, 1, 1, 1], [0], [0]>} : vector<16x8x16xf32>, vector<16x8x16xf32>, vector<16x8x8xf32> -> vector<16x8x8xf32>
    "tpu.trace_stop"() : () -> ()
    %cst_9 = arith.constant dense<0xFF800000> : vector<16x8xf32>
    %51 = vector.multi_reduction <maximumf>, %50, %cst_9 [2] : vector<16x8x8xf32> to vector<16x8xf32>
    %52 = vector.shape_cast %51 : vector<16x8xf32> to vector<16x8x1xf32>
    %53 = vector.broadcast %52 : vector<16x8x1xf32> to vector<16x8x8xf32>
    %54 = arith.subf %50, %53 : vector<16x8x8xf32>
    %55 = math.exp %54 : vector<16x8x8xf32>
    %cst_10 = arith.constant dense<0.000000e+00> : vector<16x8xf32>
    %56 = vector.multi_reduction <add>, %55, %cst_10 [2] : vector<16x8x8xf32> to vector<16x8xf32>
    %57 = vector.shape_cast %56 : vector<16x8xf32> to vector<16x8x1xf32>
    %58 = tpu.reciprocal %57 {approx = true} : vector<16x8x1xf32> -> vector<16x8x1xf32>
    %59 = vector.broadcast %58 : vector<16x8x1xf32> to vector<16x8x8xf32>
    %60 = arith.mulf %55, %59 : vector<16x8x8xf32>
    "tpu.trace_start"() <{level = 10 : i32, message = "gqk,gkd->gqd"}> : () -> ()
    %cst_11 = arith.constant dense<0.000000e+00> : vector<16x8x16xf32>
    %61 = tpu.matmul %60, %49, %cst_11 {dimension_numbers = #tpu.dot_dimension_numbers<[2], [1], [1], [2], [0, 0, 0, 1, 1, 2], [0], [0]>} : vector<16x8x8xf32>, vector<16x8x16xf32>, vector<16x8x16xf32> -> vector<16x8x16xf32>
    "tpu.trace_stop"() : () -> ()
    %c0_12 = arith.constant 0 : index
    %c0_13 = arith.constant 0 : index
    %c0_14 = arith.constant 0 : index
    %c0_15 = arith.constant 0 : index
    %62 = vector.load %arg6[%c0_12, %c0_13, %c0_14, %c0_15] : memref<1x8x16x128xbf16, #tpu.memory_space<vmem>>, vector<1x8x16x128xbf16>
    %63 = vector.shape_cast %62 : vector<1x8x16x128xbf16> to vector<8x16x128xbf16>
    %64 = vector.shape_cast %61 : vector<16x8x16xf32> to vector<8x16x16xf32>
    %65 = arith.truncf %64 : vector<8x16x16xf32> to vector<8x16x16xbf16>
    "tpu.trace_start"() <{level = 10 : i32, message = "hmd,hdn->hmn"}> : () -> ()
    %cst_16 = arith.constant dense<0.000000e+00> : vector<8x16x128xf32>
    %66 = tpu.matmul %65, %63, %cst_16 {dimension_numbers = #tpu.dot_dimension_numbers<[2], [1], [1], [2], [0, 0, 0, 1, 1, 2], [0], [0]>} : vector<8x16x16xbf16>, vector<8x16x128xbf16>, vector<8x16x128xf32> -> vector<8x16x128xf32>
    "tpu.trace_stop"() : () -> ()
    %cst_17 = arith.constant dense<0.000000e+00> : vector<16x128xf32>
    %67 = vector.multi_reduction <add>, %66, %cst_17 [0] : vector<8x16x128xf32> to vector<16x128xf32>
    %c0_18 = arith.constant 0 : index
    %c0_19 = arith.constant 0 : index
    %c0_20 = arith.constant 0 : index
    %68 = vector.load %arg7[%c0_18, %c0_19, %c0_20] : memref<1x1x128xf32, #tpu.memory_space<vmem>>, vector<1x1x128xf32>
    %69 = vector.shape_cast %68 : vector<1x1x128xf32> to vector<1x128xf32>
    %70 = vector.broadcast %69 : vector<1x128xf32> to vector<16x128xf32>
    %71 = arith.addf %67, %70 : vector<16x128xf32>
    %72 = arith.addf %8, %71 : vector<16x128xf32>
    %c0_21 = arith.constant 0 : index
    %c0_22 = arith.constant 0 : index
    %c0_23 = arith.constant 0 : index
    %73 = vector.load %arg8[%c0_21, %c0_22, %c0_23] : memref<1x1x128xf32, #tpu.memory_space<vmem>>, vector<1x1x128xf32>
    %74 = vector.shape_cast %73 : vector<1x1x128xf32> to vector<1x128xf32>
    %c0_24 = arith.constant 0 : index
    %c0_25 = arith.constant 0 : index
    %c0_26 = arith.constant 0 : index
    %75 = vector.load %arg9[%c0_24, %c0_25, %c0_26] : memref<1x1x128xf32, #tpu.memory_space<vmem>>, vector<1x1x128xf32>
    %76 = vector.shape_cast %75 : vector<1x1x128xf32> to vector<1x128xf32>
    %cst_27 = arith.constant dense<0.000000e+00> : vector<16xf32>
    %77 = vector.multi_reduction <add>, %72, %cst_27 [1] : vector<16x128xf32> to vector<16xf32>
    %78 = vector.shape_cast %77 : vector<16xf32> to vector<16x1xf32>
    %cst_28 = arith.constant 0.010416667 : f32
    %79 = vector.broadcast %cst_28 : f32 to vector<16x1xf32>
    %80 = arith.mulf %78, %79 : vector<16x1xf32>
    %81 = vector.broadcast %80 : vector<16x1xf32> to vector<16x128xf32>
    %82 = arith.subf %72, %81 : vector<16x128xf32>
    %83 = vector.broadcast %4 : vector<1x128xf32> to vector<16x128xf32>
    %84 = arith.mulf %82, %83 : vector<16x128xf32>
    %85 = arith.mulf %84, %84 : vector<16x128xf32>
    %cst_29 = arith.constant dense<0.000000e+00> : vector<16xf32>
    %86 = vector.multi_reduction <add>, %85, %cst_29 [1] : vector<16x128xf32> to vector<16xf32>
    %87 = vector.shape_cast %86 : vector<16xf32> to vector<16x1xf32>
    %cst_30 = arith.constant 0.010416667 : f32
    %88 = vector.broadcast %cst_30 : f32 to vector<16x1xf32>
    %89 = arith.mulf %87, %88 : vector<16x1xf32>
    %cst_31 = arith.constant 9.99999974E-6 : f32
    %90 = vector.broadcast %cst_31 : f32 to vector<16x1xf32>
    %91 = arith.addf %89, %90 : vector<16x1xf32>
    %92 = math.rsqrt %91 : vector<16x1xf32>
    %93 = vector.broadcast %92 : vector<16x1xf32> to vector<16x128xf32>
    %94 = arith.mulf %84, %93 : vector<16x128xf32>
    %95 = vector.broadcast %74 : vector<1x128xf32> to vector<16x128xf32>
    %96 = arith.mulf %94, %95 : vector<16x128xf32>
    %97 = vector.broadcast %76 : vector<1x128xf32> to vector<16x128xf32>
    %98 = arith.addf %96, %97 : vector<16x128xf32>
    %c0_32 = arith.constant 0 : index
    %c0_33 = arith.constant 0 : index
    %c0_34 = arith.constant 0 : index
    %99 = vector.load %arg10[%c0_32, %c0_33, %c0_34] : memref<1x128x512xbf16, #tpu.memory_space<vmem>>, vector<1x128x512xbf16>
    %100 = vector.shape_cast %99 : vector<1x128x512xbf16> to vector<128x512xbf16>
    %101 = arith.truncf %98 : vector<16x128xf32> to vector<16x128xbf16>
    %cst_35 = arith.constant dense<0.000000e+00> : vector<16x512xf32>
    %102 = tpu.matmul %101, %100, %cst_35 {dimension_numbers = #tpu.dot_dimension_numbers<[1], [0], [0], [1], [0, 0, 1, 1], [], []>} : vector<16x128xbf16>, vector<128x512xbf16>, vector<16x512xf32> -> vector<16x512xf32>
    %c0_36 = arith.constant 0 : index
    %c0_37 = arith.constant 0 : index
    %c0_38 = arith.constant 0 : index
    %103 = vector.load %arg11[%c0_36, %c0_37, %c0_38] : memref<1x1x512xf32, #tpu.memory_space<vmem>>, vector<1x1x512xf32>
    %104 = vector.shape_cast %103 : vector<1x1x512xf32> to vector<1x512xf32>
    %105 = vector.broadcast %104 : vector<1x512xf32> to vector<16x512xf32>
    %106 = arith.addf %102, %105 : vector<16x512xf32>
    %cst_39 = arith.constant 0.000000e+00 : f32
    %107 = vector.broadcast %cst_39 : f32 to vector<16x512xf32>
    %108 = arith.maximumf %106, %107 : vector<16x512xf32>
    %c0_40 = arith.constant 0 : index
    %c0_41 = arith.constant 0 : index
    %c0_42 = arith.constant 0 : index
    %109 = vector.load %arg12[%c0_40, %c0_41, %c0_42] : memref<1x512x128xbf16, #tpu.memory_space<vmem>>, vector<1x512x128xbf16>
    %110 = vector.shape_cast %109 : vector<1x512x128xbf16> to vector<512x128xbf16>
    %111 = arith.truncf %108 : vector<16x512xf32> to vector<16x512xbf16>
    %cst_43 = arith.constant dense<0.000000e+00> : vector<16x128xf32>
    %112 = tpu.matmul %111, %110, %cst_43 {dimension_numbers = #tpu.dot_dimension_numbers<[1], [0], [0], [1], [0, 0, 1, 1], [], []>} : vector<16x512xbf16>, vector<512x128xbf16>, vector<16x128xf32> -> vector<16x128xf32>
    %c0_44 = arith.constant 0 : index
    %c0_45 = arith.constant 0 : index
    %c0_46 = arith.constant 0 : index
    %113 = vector.load %arg13[%c0_44, %c0_45, %c0_46] : memref<1x1x128xf32, #tpu.memory_space<vmem>>, vector<1x1x128xf32>
    %114 = vector.shape_cast %113 : vector<1x1x128xf32> to vector<1x128xf32>
    %115 = vector.broadcast %114 : vector<1x128xf32> to vector<16x128xf32>
    %116 = arith.addf %112, %115 : vector<16x128xf32>
    %117 = arith.addf %98, %116 : vector<16x128xf32>
    %c0_47 = arith.constant 0 : index
    %c0_48 = arith.constant 0 : index
    %c0_49 = arith.constant 0 : index
    %118 = vector.load %arg14[%c0_47, %c0_48, %c0_49] : memref<1x1x128xf32, #tpu.memory_space<vmem>>, vector<1x1x128xf32>
    %119 = vector.shape_cast %118 : vector<1x1x128xf32> to vector<1x128xf32>
    %c0_50 = arith.constant 0 : index
    %c0_51 = arith.constant 0 : index
    %c0_52 = arith.constant 0 : index
    %120 = vector.load %arg15[%c0_50, %c0_51, %c0_52] : memref<1x1x128xf32, #tpu.memory_space<vmem>>, vector<1x1x128xf32>
    %121 = vector.shape_cast %120 : vector<1x1x128xf32> to vector<1x128xf32>
    %cst_53 = arith.constant dense<0.000000e+00> : vector<16xf32>
    %122 = vector.multi_reduction <add>, %117, %cst_53 [1] : vector<16x128xf32> to vector<16xf32>
    %123 = vector.shape_cast %122 : vector<16xf32> to vector<16x1xf32>
    %cst_54 = arith.constant 0.010416667 : f32
    %124 = vector.broadcast %cst_54 : f32 to vector<16x1xf32>
    %125 = arith.mulf %123, %124 : vector<16x1xf32>
    %126 = vector.broadcast %125 : vector<16x1xf32> to vector<16x128xf32>
    %127 = arith.subf %117, %126 : vector<16x128xf32>
    %128 = vector.broadcast %4 : vector<1x128xf32> to vector<16x128xf32>
    %129 = arith.mulf %127, %128 : vector<16x128xf32>
    %130 = arith.mulf %129, %129 : vector<16x128xf32>
    %cst_55 = arith.constant dense<0.000000e+00> : vector<16xf32>
    %131 = vector.multi_reduction <add>, %130, %cst_55 [1] : vector<16x128xf32> to vector<16xf32>
    %132 = vector.shape_cast %131 : vector<16xf32> to vector<16x1xf32>
    %cst_56 = arith.constant 0.010416667 : f32
    %133 = vector.broadcast %cst_56 : f32 to vector<16x1xf32>
    %134 = arith.mulf %132, %133 : vector<16x1xf32>
    %cst_57 = arith.constant 9.99999974E-6 : f32
    %135 = vector.broadcast %cst_57 : f32 to vector<16x1xf32>
    %136 = arith.addf %134, %135 : vector<16x1xf32>
    %137 = math.rsqrt %136 : vector<16x1xf32>
    %138 = vector.broadcast %137 : vector<16x1xf32> to vector<16x128xf32>
    %139 = arith.mulf %129, %138 : vector<16x128xf32>
    %140 = vector.broadcast %119 : vector<1x128xf32> to vector<16x128xf32>
    %141 = arith.mulf %139, %140 : vector<16x128xf32>
    %142 = vector.broadcast %121 : vector<1x128xf32> to vector<16x128xf32>
    %143 = arith.addf %141, %142 : vector<16x128xf32>
    %c0_58 = arith.constant 0 : index
    %c0_59 = arith.constant 0 : index
    %144 = vector.load %arg21[%c0_58, %c0_59] : memref<16x128xf32, #tpu.memory_space<vmem>>, vector<16x128xf32>
    tpu.vector_store %arg21[%c0_58, %c0_59], %143 {strides = array<i32>} : memref<16x128xf32, #tpu.memory_space<vmem>>, vector<16x128xf32>,
    %c3_i32 = arith.constant 3 : i32
    %145 = arith.cmpi eq, %arg0, %c3_i32 : i32
    %146 = arith.extui %145 : i1 to i32
    %c0_i32_60 = arith.constant 0 : i32
    %147 = arith.cmpi ne, %146, %c0_i32_60 : i32
    scf.if %147 {
      %148 = vector.shape_cast %143 : vector<16x128xf32> to vector<2x8x128xf32>
      %cst_61 = arith.constant dense<0.000000e+00> : vector<2x128xf32>
      %149 = vector.multi_reduction <add>, %148, %cst_61 [1] : vector<2x8x128xf32> to vector<2x128xf32>
      %cst_62 = arith.constant 8.000000e+00 : f32
      %150 = vector.broadcast %cst_62 : f32 to vector<2x128xf32>
      %151 = arith.divf %149, %150 : vector<2x128xf32>
      %c0_63 = arith.constant 0 : index
      %c0_64 = arith.constant 0 : index
      %152 = vector.load %arg16[%c0_63, %c0_64] : memref<128x256xbf16, #tpu.memory_space<vmem>>, vector<128x256xbf16>
      %153 = arith.truncf %151 : vector<2x128xf32> to vector<2x128xbf16>
      %cst_65 = arith.constant dense<0.000000e+00> : vector<2x256xf32>
      %154 = tpu.matmul %153, %152, %cst_65 {dimension_numbers = #tpu.dot_dimension_numbers<[1], [0], [0], [1], [0, 0, 1, 1], [], []>} : vector<2x128xbf16>, vector<128x256xbf16>, vector<2x256xf32> -> vector<2x256xf32>
      %c0_66 = arith.constant 0 : index
      %c0_67 = arith.constant 0 : index
      %155 = vector.load %arg17[%c0_66, %c0_67] : memref<1x256xf32, #tpu.memory_space<vmem>>, vector<1x256xf32>
      %156 = vector.broadcast %155 : vector<1x256xf32> to vector<2x256xf32>
      %157 = arith.addf %154, %156 : vector<2x256xf32>
      %cst_68 = arith.constant 0.000000e+00 : f32
      %158 = vector.broadcast %cst_68 : f32 to vector<2x256xf32>
      %159 = arith.maximumf %157, %158 : vector<2x256xf32>
      %c0_69 = arith.constant 0 : index
      %c0_70 = arith.constant 0 : index
      %160 = vector.load %arg18[%c0_69, %c0_70] : memref<256x128xbf16, #tpu.memory_space<vmem>>, vector<256x128xbf16>
      %161 = arith.truncf %159 : vector<2x256xf32> to vector<2x256xbf16>
      %cst_71 = arith.constant dense<0.000000e+00> : vector<2x128xf32>
      %162 = tpu.matmul %161, %160, %cst_71 {dimension_numbers = #tpu.dot_dimension_numbers<[1], [0], [0], [1], [0, 0, 1, 1], [], []>} : vector<2x256xbf16>, vector<256x128xbf16>, vector<2x128xf32> -> vector<2x128xf32>
      %c0_72 = arith.constant 0 : index
      %c0_73 = arith.constant 0 : index
      %163 = vector.load %arg19[%c0_72, %c0_73] : memref<1x128xf32, #tpu.memory_space<vmem>>, vector<1x128xf32>
      %164 = vector.broadcast %163 : vector<1x128xf32> to vector<2x128xf32>
      %165 = arith.addf %162, %164 : vector<2x128xf32>
      %c0_74 = arith.constant 0 : index
      %c0_75 = arith.constant 0 : index
      %166 = vector.load %arg20[%c0_74, %c0_75] : memref<2x128xf32, #tpu.memory_space<vmem>>, vector<2x128xf32>
      tpu.vector_store %arg20[%c0_74, %c0_75], %165 {strides = array<i32>} : memref<2x128xf32, #tpu.memory_space<vmem>>, vector<2x128xf32>,
    } else {
    }
    return
  }
  func.func @transform_0(%arg0: i32) -> (i32, i32) {
    %c0_i32 = arith.constant 0 : i32
    %c0_i32_0 = arith.constant 0 : i32
    %c0_i32_1 = arith.constant 0 : i32
    return %c0_i32, %c0_i32_0 : i32, i32
  }
  func.func @transform_1(%arg0: i32) -> (i32, i32) {
    %c0_i32 = arith.constant 0 : i32
    %c0_i32_0 = arith.constant 0 : i32
    %c0_i32_1 = arith.constant 0 : i32
    return %c0_i32, %c0_i32_0 : i32, i32
  }
  func.func @transform_2(%arg0: i32) -> (i32, i32) {
    %c0_i32 = arith.constant 0 : i32
    %c0_i32_0 = arith.constant 0 : i32
    %c0_i32_1 = arith.constant 0 : i32
    return %c0_i32, %c0_i32_0 : i32, i32
  }
  func.func @transform_3(%arg0: i32) -> (i32, i32, i32) {
    %c0_i32 = arith.constant 0 : i32
    %c0_i32_0 = arith.constant 0 : i32
    %c0_i32_1 = arith.constant 0 : i32
    return %arg0, %c0_i32, %c0_i32_0 : i32, i32, i32
  }
  func.func @transform_4(%arg0: i32) -> (i32, i32, i32) {
    %c0_i32 = arith.constant 0 : i32
    %c0_i32_0 = arith.constant 0 : i32
    %c0_i32_1 = arith.constant 0 : i32
    return %arg0, %c0_i32, %c0_i32_0 : i32, i32, i32
  }
  func.func @transform_5(%arg0: i32) -> (i32, i32, i32, i32) {
    %c0_i32 = arith.constant 0 : i32
    %c0_i32_0 = arith.constant 0 : i32
    %c0_i32_1 = arith.constant 0 : i32
    %c0_i32_2 = arith.constant 0 : i32
    return %arg0, %c0_i32, %c0_i32_0, %c0_i32_1 : i32, i32, i32, i32
  }
  func.func @transform_6(%arg0: i32) -> (i32, i32, i32) {
    %c0_i32 = arith.constant 0 : i32
    %c0_i32_0 = arith.constant 0 : i32
    %c0_i32_1 = arith.constant 0 : i32
    return %arg0, %c0_i32, %c0_i32_0 : i32, i32, i32
  }
  func.func @transform_7(%arg0: i32) -> (i32, i32, i32) {
    %c0_i32 = arith.constant 0 : i32
    %c0_i32_0 = arith.constant 0 : i32
    %c0_i32_1 = arith.constant 0 : i32
    return %arg0, %c0_i32, %c0_i32_0 : i32, i32, i32
  }
  func.func @transform_8(%arg0: i32) -> (i32, i32, i32) {
    %c0_i32 = arith.constant 0 : i32
    %c0_i32_0 = arith.constant 0 : i32
    %c0_i32_1 = arith.constant 0 : i32
    return %arg0, %c0_i32, %c0_i32_0 : i32, i32, i32
  }
  func.func @transform_9(%arg0: i32) -> (i32, i32, i32) {
    %c0_i32 = arith.constant 0 : i32
    %c0_i32_0 = arith.constant 0 : i32
    %c0_i32_1 = arith.constant 0 : i32
    return %arg0, %c0_i32, %c0_i32_0 : i32, i32, i32
  }
  func.func @transform_10(%arg0: i32) -> (i32, i32, i32) {
    %c0_i32 = arith.constant 0 : i32
    %c0_i32_0 = arith.constant 0 : i32
    %c0_i32_1 = arith.constant 0 : i32
    return %arg0, %c0_i32, %c0_i32_0 : i32, i32, i32
  }
  func.func @transform_11(%arg0: i32) -> (i32, i32, i32) {
    %c0_i32 = arith.constant 0 : i32
    %c0_i32_0 = arith.constant 0 : i32
    %c0_i32_1 = arith.constant 0 : i32
    return %arg0, %c0_i32, %c0_i32_0 : i32, i32, i32
  }
  func.func @transform_12(%arg0: i32) -> (i32, i32, i32) {
    %c0_i32 = arith.constant 0 : i32
    %c0_i32_0 = arith.constant 0 : i32
    %c0_i32_1 = arith.constant 0 : i32
    return %arg0, %c0_i32, %c0_i32_0 : i32, i32, i32
  }
  func.func @transform_13(%arg0: i32) -> (i32, i32, i32) {
    %c0_i32 = arith.constant 0 : i32
    %c0_i32_0 = arith.constant 0 : i32
    %c0_i32_1 = arith.constant 0 : i32
    return %arg0, %c0_i32, %c0_i32_0 : i32, i32, i32
  }
  func.func @transform_14(%arg0: i32) -> (i32, i32, i32) {
    %c0_i32 = arith.constant 0 : i32
    %c0_i32_0 = arith.constant 0 : i32
    %c0_i32_1 = arith.constant 0 : i32
    return %arg0, %c0_i32, %c0_i32_0 : i32, i32, i32
  }
  func.func @transform_15(%arg0: i32) -> (i32, i32) {
    %c0_i32 = arith.constant 0 : i32
    %c0_i32_0 = arith.constant 0 : i32
    %c0_i32_1 = arith.constant 0 : i32
    return %c0_i32, %c0_i32_0 : i32, i32
  }
  func.func @transform_16(%arg0: i32) -> (i32, i32) {
    %c0_i32 = arith.constant 0 : i32
    %c0_i32_0 = arith.constant 0 : i32
    %c0_i32_1 = arith.constant 0 : i32
    return %c0_i32, %c0_i32_0 : i32, i32
  }
  func.func @transform_17(%arg0: i32) -> (i32, i32) {
    %c0_i32 = arith.constant 0 : i32
    %c0_i32_0 = arith.constant 0 : i32
    %c0_i32_1 = arith.constant 0 : i32
    return %c0_i32, %c0_i32_0 : i32, i32
  }
  func.func @transform_18(%arg0: i32) -> (i32, i32) {
    %c0_i32 = arith.constant 0 : i32
    %c0_i32_0 = arith.constant 0 : i32
    %c0_i32_1 = arith.constant 0 : i32
    return %c0_i32, %c0_i32_0 : i32, i32
  }
  func.func @transform_19(%arg0: i32) -> (i32, i32) {
    %c0_i32 = arith.constant 0 : i32
    %c0_i32_0 = arith.constant 0 : i32
    %c0_i32_1 = arith.constant 0 : i32
    return %c0_i32, %c0_i32_0 : i32, i32
  }
}

</mosaic_0001>

<bundles_post_ra>
// kernel: forward.1
= control target key start
LH: loop header
LB: loop body
LE: loop exit
PB: predicated region body
PF: predicated region fallthrough
CT: control target
= control target key end

     0   :  { %s6446_s0 = inlined_call_operand.vmem [shape: f32[16,128], index: 0, kind: input, shape index: {}]   ;;  %s6447_s1 = inlined_call_operand.hbm [shape: bf16[128,128], index: 1, kind: input, shape index: {}]   ;;  %s6448_s2 = inlined_call_operand.vmem [shape: f32[1,128], index: 2, kind: input, shape index: {}]   ;;  %s6449_s3 = inlined_call_operand.hbm [shape: bf16[4,128,384], index: 3, kind: input, shape index: {}]   ;;  %s6450_s4 = inlined_call_operand.vmem [shape: f32[4,1,384], index: 4, kind: input, shape index: {}]   ;;  %s6451_s5 = inlined_call_operand.hbm [shape: bf16[4,8,16,128], index: 5, kind: input, shape index: {}]   ;;  %s6452_s6 = inlined_call_operand.vmem [shape: f32[4,1,128], index: 6, kind: input, shape index: {}]   ;;  %s6453_s7 = inlined_call_operand.hbm [shape: f32[4,1,128], index: 7, kind: input, shape index: {}]   ;;  %s6454_s8 = inlined_call_operand.hbm [shape: f32[4,1,128], index: 8, kind: input, shape index: {}]   ;;  %s6455_s9 = inlined_call_operand.hbm [shape: bf16[4,128,512], index: 9, kind: input, shape index: {}]   ;;  %s6456_s10 = inlined_call_operand.vmem [shape: f32[4,1,512], index: 10, kind: input, shape index: {}]   ;;  %s6457_s11 = inlined_call_operand.hbm [shape: bf16[4,512,128], index: 11, kind: input, shape index: {}]   ;;  %s6458_s12 = inlined_call_operand.hbm [shape: f32[4,1,128], index: 12, kind: input, shape index: {}]   ;;  %s6459_s13 = inlined_call_operand.hbm [shape: f32[4,1,128], index: 13, kind: input, shape index: {}]   ;;  %s6460_s14 = inlined_call_operand.hbm [shape: f32[4,1,128], index: 14, kind: input, shape index: {}]   ;;  %s6461_s15 = inlined_call_operand.hbm [shape: bf16[128,256], index: 15, kind: input, shape index: {}]   ;;  %s6462_s16 = inlined_call_operand.vmem [shape: f32[1,256], index: 16, kind: input, shape index: {}]   ;;  %s6463_s17 = inlined_call_operand.hbm [shape: bf16[256,128], index: 17, kind: input, shape index: {}]   ;;  %s6464_s18 = inlined_call_operand.hbm [shape: f32[1,128], index: 18, kind: input, shape index: {}]   ;;  %s6465_s19 = inlined_call_operand.hbm [shape: f32[2,128], index: 19, kind: output, shape index: {}]  }
   0x1   :  { %6487 = sst [smem:[#allocation41_spill]] %s6446_s0 }
   0x2   :  { %6488 = sst [smem:[#allocation42_spill]] %s6447_s1 }
   0x3   :  { %6489 = sst [smem:[#allocation43_spill]] %s6448_s2 }
   0x4   :  { %6490 = sst [smem:[#allocation44_spill]] %s6449_s3 }
   0x5   :  { %6491 = sst [smem:[#allocation45_spill]] %s6450_s4 }
   0x6   :  { %6492 = sst [smem:[#allocation46_spill]] %s6452_s6 }
   0x7   :  { %6493 = sst [smem:[#allocation47_spill]] %s6453_s7 }
   0x8   :  { %6494 = sst [smem:[#allocation48_spill]] %s6455_s9 }
   0x9   :  { %6495 = sst [smem:[#allocation49_spill]] %s6456_s10 }
   0xa   :  { %6496 = sst [smem:[#allocation50_spill]] %s6460_s14 }
   0xb   :  { %6497 = sst [smem:[#allocation51_spill]] %s6461_s15 }
   0xc   :  { %6498 = sst [smem:[#allocation52_spill]] %s6462_s16 }
   0xd   :  { %6499 = sst [smem:[#allocation53_spill]] %s6463_s17 }
   0xe   :  { %6500 = sst [smem:[#allocation54_spill]] %s6465_s19 }
   0xf   :  { %24 = vsyncpa [#allocation4], 0 }
  0x10   :  { %25 = vsyncpa [#allocation7], 0 }
  0x11   :  { %27 = vsyncpa [#allocation7 + $0x1], 0 }
  0x12   :  { %28 = vsyncpa [#allocation10], 0 }
  0x13   :  { %30 = vsyncpa [#allocation10 + $0x1], 0 }
  0x14   :  { %31 = vsyncpa [#allocation13], 0 }
  0x15   :  { %33 = vsyncpa [#allocation13 + $0x1], 0 }
  0x16   :  { %34 = vsyncpa [#allocation16], 0 }
  0x17   :  { %36 = vsyncpa [#allocation16 + $0x1], 0 }
  0x18   :  { %37 = vsyncpa [#allocation19], 0 }
  0x19   :  { %39 = vsyncpa [#allocation19 + $0x1], 0 }
  0x1a   :  { %40 = vsyncpa [#allocation22], 0 }
  0x1b   :  { %41 = vsyncpa [#allocation5], 0  ;;  %s5590_s0 = smov 0   ;;  %s5592_s30 = smov 0  }
  0x1c   :  { %s5594_s20 = smov 0   ;;  %s5596_s21 = smov 0  }
  0x1d LB: > { %6501 = sst [smem:[#allocation34_spill]] %s5458_s30  ;;  %s5609_s1 = sadd.s32 4294967295, %s5466_s21   ;;  %s5466_s21 = sphi %s5596_s21, %s6543_s21   ;;  %s5462_s20 = sphi %s5594_s20, %s6546_s20   ;;  %s5458_s30 = sphi %s5592_s30, %s6545_s30   ;;  %s5454_s0 = sphi %s5590_s0, %s6544_s0  }
  0x1e   : > { %6502 = sst [smem:[#allocation35_spill]] %s5462_s20  ;;  %s5612_s22 = sadd.s32 1, %s5466_s21  }
  0x1f   : > { %6503 = sst [smem:[#allocation36_spill]] %s5609_s1  ;;  %s114_s2 = ssub.s32 %s5466_s21, %s5612_s22 }
  0x20   : > { %6504 = sst [smem:[#allocation37_spill]] %s5612_s22  ;;  %s117_s23 = sadd.s32 1, %s5462_s20 }
  0x21   : > { %p115_p0 = scmp.eq.s32.totalorder %s114_s2, 0  ;;  %p124_p1 = scmp.ne.s32.totalorder %s5462_s20, %s5458_s30 }
  0x22   : > { %p125_p2 = scmp.eq.s32.totalorder %s5466_s21, 0  ;;  %p130_p3 = scmp.ne.s32.totalorder %s5458_s30, %s5454_s0 }
  0x23   : > { %s5622_s24 = scalar_select %p115_p0, %s5462_s20, %s117_s23  }
  0x24   : > { %p5624_p4 = por %p125_p2, %p124_p1  ;;  %p131_p5 = scmp.eq.s32.totalorder %s5609_s1, 0 }
  0x25   : > { %6505 = sst [smem:[#allocation38_spill]] %s5622_s24  ;;  %p3944_p6 = scmp.ge.s32.totalorder %s5466_s21, 1 }
  0x26   : > { %p532_p7 = scmp.lt.s32.totalorder %s5466_s21, 5  ;;  %p5633_p8 = por %p131_p5, %p130_p3 }
  0x27   : > { %p3945_p9 = scmp.ne.s32.totalorder %s5609_s1, 0  ;;  %s6511_s15 = sld [smem:[#allocation51_spill]] }
  0x28   : > { %s6507_s3 = scalar_select %p5633_p8, 1, 0 }
  0x29   : > { %p5638_p10 = pnand %p3944_p6, %p532_p7  ;;  %s5468_s0 = smov [#allocation20]  }
  0x2a   : > { %6508 = sst [smem:[#allocation39_spill]] %s6507_s3  ;;  %s565_s2 = sshll.u32 %s5468_s0, 4  ;;  %s566_s2 = int_to_ptr.vmem [resolvable:$true] %s565_s2 }
  0x2b   : > { %s6509_s26 = scalar_select %p5638_p10, 1, 0 }
  0x2c   : > { %p4757_p11 = pneg %p5638_p10  ;;  %p4802_p13 = scmp.lt.s32.totalorder %s5466_s21, 4 }
  0x2d   : > { %6510 = sst [smem:[#allocation40_spill]] %s6509_s26  ;;  %s563_s29 = sshll.u32 %s6511_s15, 4  ;;  %s564_s29 = int_to_ptr.hbm [resolvable:$true] %s563_s29 }
  0x2e   : > { %p5649_p12 = pnand %p4757_p11, %p131_p5  ;;  %s5469_s27 = smov 128  }
  0x2f   : > { %s5470_s28 = smov 8   ;;  %p5658_p0 = pnand %p4802_p13, %p5624_p4 }
  0x30   : > { %4763 = dma.hbm_to_vmem [thread:$0]  (!%p5649_p12), %s564_s29, 2048, %s566_s2, [#allocation19], %s5469_s27, %s5469_s27, %s5470_s28  }
  0x31   : > { %s6514_s17 = sld [smem:[#allocation53_spill]]  ;;  %s5471_s19 = smov [#allocation21]  }
  0x32   : > { %s582_s16 = sshll.u32 %s5471_s19, 4  ;;  %s5666_s10 = sand.u32 1, %s5466_s21   ;;  %s583_s16 = int_to_ptr.vmem [resolvable:$true] %s582_s16 }
  0x33   : > { %s6476_s4 = smov 64   ;;  %s6478_s6 = smov 4  }
  0x34   : > { %s5674_s25 = sand.u32 1, %s5462_s20   ;;  %s4716_s24 = smul.u32 192, %s5466_s21 }
  0x35   : > { %s4715_s29 = smul.u32 192, %s5674_s25  ;;  %s6515_s19 = sld [smem:[#allocation44_spill]] }
  0x36   : > { %s6483_s30 = scalar_lea.sflag [#allocation7], %s5666_s10  ;;  %p5684_p2 = pneg %p5658_p0 }
  0x37   : > { %s580_s22 = sshll.u32 %s6514_s17, 4  ;;  %s612_s17 = scalar_lea.vmem [#allocation6], %s4715_s29  ;;  %s581_s22 = int_to_ptr.hbm [resolvable:$true] %s580_s22 }
  0x38   : > { %4766 = dma.hbm_to_vmem [thread:$0]  (!%p5649_p12), %s581_s22, 2048, %s583_s16, [#allocation22], %s6476_s4, %s6476_s4, %s6478_s6  }
  0x39   : > { %s620_s3 = sshll.u32 %s612_s17, 4  ;;  %s621_s3 = int_to_ptr.vmem [resolvable:$true] %s620_s3 }
  0x3b   : > { %s617_s28 = scalar_lea.hbm %s6515_s19, %s4716_s24  ;;  %s5049_s29 = scalar_lea.hbm %s6515_s19, 768 }
  0x3c   : > { %s618_s0 = sshll.u32 %s617_s28, 4  ;;  %s619_s0 = int_to_ptr.hbm [resolvable:$true] %s618_s0 }
  0x3d   : > { %s5042_s1 = sshra.s32 %s619_s0, 4  ;;  %s5043_s1 = int_to_ptr.hbm [resolvable:$true] %s5042_s1 }
  0x3e   : > { %s5044_s26 = scalar_lea.hbm %s5043_s1, 192  ;;  %p5050_p6 = scmp.lt.s32.totalorder %s5043_s1, %s6515_s19 }
  0x3f   : > { %p5045_p1 = scmp.ne.s32.totalorder %s5043_s1, %s5044_s26  ;;  %p5051_p7 = scmp.lt.s32.totalorder %s5049_s29, %s5044_s26 }
  0x41   : > { %p5047_p3 = pnand %p5684_p2, %p5045_p1  ;;  %p5052_p11 = por %p5051_p7, %p5050_p6 }
  0x43   : > { %p5048_p4 = pneg %p5047_p3 }
  0x45   : > { %p5053_p13 = pnand %p5052_p11, %p5048_p4 }
  0x47   : > { %5056 = shalt.err (!%p5053_p13)
}
  0x48   : > { %s5474_s27 = smov 192   ;;  %s5475_s28 = smov 12  }
  0x49   : > { %4773 = dma.hbm_to_vmem [thread:$0]  (!%p5658_p0), %s619_s0, 3072, %s621_s3, %s6483_s30, %s5474_s27, %s5474_s27, %s5475_s28  }
  0x4a   : > { %s6517_s7 = sld [smem:[#allocation47_spill]]  ;;  %s668_s26 = scalar_lea.vmem [#allocation9], %s5674_s25 }
  0x4b   : > { %s675_s29 = sshll.u32 %s668_s26, 4  ;;  %s6482_s2 = scalar_lea.sflag [#allocation10], %s5666_s10  ;;  %s676_s29 = int_to_ptr.vmem [resolvable:$true] %s675_s29 }
  0x50   : > { %s671_s17 = scalar_lea.hbm %s6517_s7, %s5466_s21  ;;  %s5079_s3 = scalar_lea.hbm %s6517_s7, 4 }
  0x51   : > { %s673_s1 = sshll.u32 %s671_s17, 4  ;;  %s674_s1 = int_to_ptr.hbm [resolvable:$true] %s673_s1 }
  0x52   : > { %s5072_s4 = sshra.s32 %s674_s1, 4  ;;  %s5073_s4 = int_to_ptr.hbm [resolvable:$true] %s5072_s4 }
  0x53   : > { %s5074_s6 = scalar_lea.hbm %s5073_s4, 1  ;;  %p5080_p6 = scmp.lt.s32.totalorder %s5073_s4, %s6517_s7 }
  0x54   : > { %p5075_p1 = scmp.ne.s32.totalorder %s5073_s4, %s5074_s6  ;;  %p5081_p7 = scmp.lt.s32.totalorder %s5079_s3, %s5074_s6 }
  0x56   : > { %p5077_p3 = pnand %p5075_p1, %p5684_p2  ;;  %p5082_p11 = por %p5081_p7, %p5080_p6 }
  0x58   : > { %p5078_p4 = pneg %p5077_p3 }
  0x5a   : > { %p5083_p13 = pnand %p5082_p11, %p5078_p4 }
  0x5c   : > { %5086 = shalt.err (!%p5083_p13)
}
  0x5d   : > { %4779 = dma.hbm_to_vmem [thread:$0]  (!%p5658_p0), %s674_s1, 16, %s676_s29, %s6482_s2  }
  0x5e   : > { %s3954_s28 = sshll.u32 %s5674_s25, 8  ;;  %s4577_s20 = sshll.u32 %s5466_s21, 8 }
  0x5f   : > { %s6518_s9 = sld [smem:[#allocation48_spill]]  ;;  %s703_s4 = scalar_lea.vmem [#allocation12], %s3954_s28 }
  0x60   : > { %s711_s6 = sshll.u32 %s703_s4, 4  ;;  %s6486_s26 = scalar_lea.sflag [#allocation13], %s5666_s10  ;;  %s712_s6 = int_to_ptr.vmem [resolvable:$true] %s711_s6 }
  0x65   : > { %s708_s24 = scalar_lea.hbm %s6518_s9, %s4577_s20  ;;  %s5109_s27 = scalar_lea.hbm %s6518_s9, 1024 }
  0x66   : > { %s709_s17 = sshll.u32 %s708_s24, 4  ;;  %s710_s17 = int_to_ptr.hbm [resolvable:$true] %s709_s17 }
  0x67   : > { %s5102_s3 = sshra.s32 %s710_s17, 4  ;;  %s5103_s3 = int_to_ptr.hbm [resolvable:$true] %s5102_s3 }
  0x68   : > { %s5104_s0 = scalar_lea.hbm %s5103_s3, 256  ;;  %p5110_p6 = scmp.lt.s32.totalorder %s5103_s3, %s6518_s9 }
  0x69   : > { %p5105_p1 = scmp.ne.s32.totalorder %s5103_s3, %s5104_s0  ;;  %p5111_p7 = scmp.lt.s32.totalorder %s5109_s27, %s5104_s0 }
  0x6b   : > { %p5107_p3 = pnand %p5105_p1, %p5684_p2  ;;  %p5112_p11 = por %p5111_p7, %p5110_p6 }
  0x6d   : > { %p5108_p4 = pneg %p5107_p3 }
  0x6f   : > { %p5113_p13 = pnand %p5112_p11, %p5108_p4 }
  0x71   : > { %5116 = shalt.err (!%p5113_p13)
}
  0x72   : > { %s5476_s22 = smov 256   ;;  %s5477_s24 = smov 16  }
  0x73   : > { %4785 = dma.hbm_to_vmem [thread:$0]  (!%p5658_p0), %s710_s17, 4096, %s712_s6, %s6486_s26, %s5476_s22, %s5476_s22, %s5477_s24  }
  0x74   : > { %s737_s29 = scalar_lea.hbm %s6457_s11, %s4577_s20  ;;  %s732_s2 = scalar_lea.vmem [#allocation14], %s3954_s28 }
  0x75   : > { %s740_s3 = sshll.u32 %s732_s2, 4  ;;  %s738_s0 = sshll.u32 %s737_s29, 4  ;;  %s5739_s3 = int_to_ptr.vmem [resolvable:$true] %s740_s3  ;;  %s5741_s0 = int_to_ptr.hbm [resolvable:$true] %s738_s0 }
  0x76   : > { %s756_s30 = scalar_lea.hbm %s6458_s12, %s5466_s21  ;;  %s753_s9 = scalar_lea.vmem [#allocation15], %s5674_s25 }
  0x77   : > { %s758_s7 = sshll.u32 %s756_s30, 4  ;;  %s760_s14 = sshll.u32 %s753_s9, 4  ;;  %s759_s7 = int_to_ptr.hbm [resolvable:$true] %s758_s7  ;;  %s761_s14 = int_to_ptr.vmem [resolvable:$true] %s760_s14 }
  0x78   : > { %s6485_s6 = scalar_lea.sflag [#allocation16], %s5666_s10  ;;  %s5132_s17 = sshra.s32 %s759_s7, 4  ;;  %s5133_s17 = int_to_ptr.hbm [resolvable:$true] %s5132_s17 }
  0x79   : > { %s5134_s28 = scalar_lea.hbm %s5133_s17, 1  ;;  %s5139_s24 = scalar_lea.hbm %s6458_s12, 4 }
  0x7a   : > { %p5135_p1 = scmp.ne.s32.totalorder %s5133_s17, %s5134_s28  ;;  %p5140_p6 = scmp.lt.s32.totalorder %s5133_s17, %s6458_s12 }
  0x7b   : > { %p5141_p7 = scmp.lt.s32.totalorder %s5139_s24, %s5134_s28 }
  0x7c   : > { %p5137_p3 = pnand %p5135_p1, %p5684_p2 }
  0x7d   : > { %p5142_p11 = por %p5141_p7, %p5140_p6 }
  0x7e   : > { %p5138_p4 = pneg %p5137_p3 }
  0x80   : > { %p5143_p13 = pnand %p5142_p11, %p5138_p4 }
  0x82   : > { %5146 = shalt.err (!%p5143_p13)
}
  0x83   : > { %4791 = dma.hbm_to_vmem [thread:$0]  (!%p5658_p0), %s759_s7, 16, %s761_s14, %s6485_s6  }
  0x84   : > { %s6519_s29 = sld [smem:[#allocation42_spill]]  ;;  %s5478_s27 = smov [#allocation3]  }
  0x85   : > { %s548_s19 = sshll.u32 %s5478_s27, 4  ;;  %s595_s20 = sshll.u32 %s6464_s18, 4  ;;  %s549_s19 = int_to_ptr.vmem [resolvable:$true] %s548_s19  ;;  %s596_s20 = int_to_ptr.hbm [resolvable:$true] %s595_s20 }
  0x86   : > { %s6520_s22 = smov 4   ;;  %s6521_s24 = smov 64  }
  0x87   : > { %s5479_s7 = smov [#allocation23]   ;;  %s3951_s4 = sshll.u32 %s5674_s25, 6 }
  0x88   : > { %s597_s14 = sshll.u32 %s5479_s7, 4  ;;  %s4576_s1 = sshll.u32 %s5466_s21, 6  ;;  %s598_s14 = int_to_ptr.vmem [resolvable:$true] %s597_s14 }
  0x89   : > { %4769 = dma.hbm_to_vmem [thread:$0]  (!%p5649_p12), %s596_s20, 16, %s598_s14, [#allocation22]  }
  0x8a   : > { %s546_s2 = sshll.u32 %s6519_s29, 4  ;;  %s641_s9 = scalar_lea.vmem [#allocation8], %s3951_s4  ;;  %s547_s2 = int_to_ptr.hbm [resolvable:$true] %s546_s2 }
  0x8b   : > { %4760 = dma.hbm_to_vmem [thread:$0]  (!%p5649_p12), %s547_s2, 1024, %s549_s19, [#allocation4], %s6521_s24, %s6521_s24, %s6520_s22  }
  0x8c   : > { %s649_s30 = sshll.u32 %s641_s9, 4  ;;  %s646_s17 = scalar_lea.hbm %s6451_s5, %s4576_s1  ;;  %s650_s30 = int_to_ptr.vmem [resolvable:$true] %s649_s30 }
  0x8d   : > { %s647_s28 = sshll.u32 %s646_s17, 4  ;;  %s688_s19 = scalar_lea.hbm %s6454_s8, %s5466_s21  ;;  %s648_s28 = int_to_ptr.hbm [resolvable:$true] %s647_s28 }
  0x8e   : > { %s5222_s7 = sshra.s32 %s648_s28, 4  ;;  %s5229_s14 = scalar_lea.hbm %s6451_s5, 256  ;;  %s5223_s7 = int_to_ptr.hbm [resolvable:$true] %s5222_s7 }
  0x8f   : > { %s5224_s26 = scalar_lea.hbm %s5223_s7, 64  ;;  %p5230_p4 = scmp.lt.s32.totalorder %s5223_s7, %s6451_s5 }
  0x90   : > { %p5225_p1 = scmp.ne.s32.totalorder %s5223_s7, %s5224_s26  ;;  %p5231_p6 = scmp.lt.s32.totalorder %s5229_s14, %s5224_s26 }
  0x92   : > { %p5227_p12 = pnand %p5225_p1, %p5684_p2  ;;  %p5232_p7 = por %p5231_p6, %p5230_p4 }
  0x94   : > { %p5228_p3 = pneg %p5227_p12 }
  0x96   : > { %p5233_p11 = pnand %p5232_p7, %p5228_p3 }
  0x98   : > { %5236 = shalt.err (!%p5233_p11)
}
  0x99   : > { %s6522_s6 = scalar_lea.sflag [#allocation7], %s5666_s10  ;;  %s690_s9 = sshll.u32 %s688_s19, 4  ;;  %s691_s9 = int_to_ptr.hbm [resolvable:$true] %s690_s9 }
  0x9a   : > { %4776 = dma.hbm_to_vmem [thread:$0]  (!%p5658_p0), %s648_s28, 1024, %s650_s30, %s6522_s6, %s6521_s24, %s6521_s24, %s6520_s22  }
  0x9b   : > { %s685_s29 = scalar_lea.vmem [#allocation11], %s5674_s25  ;;  %s5252_s17 = sshra.s32 %s691_s9, 4  ;;  %s5253_s17 = int_to_ptr.hbm [resolvable:$true] %s5252_s17 }
  0x9c   : > { %s692_s27 = sshll.u32 %s685_s29, 4  ;;  %s5254_s26 = scalar_lea.hbm %s5253_s17, 1  ;;  %s693_s27 = int_to_ptr.vmem [resolvable:$true] %s692_s27 }
  0x9d   : > { %p5255_p13 = scmp.ne.s32.totalorder %s5253_s17, %s5254_s26  ;;  %s5259_s23 = scalar_lea.hbm %s6454_s8, 4 }
  0x9e   : > { %p5260_p3 = scmp.lt.s32.totalorder %s5253_s17, %s6454_s8  ;;  %p5261_p4 = scmp.lt.s32.totalorder %s5259_s23, %s5254_s26 }
  0x9f   : > { %p5257_p1 = pnand %p5255_p13, %p5684_p2 }
  0xa0   : > { %p5262_p6 = por %p5261_p4, %p5260_p3 }
  0xa1   : > { %p5258_p12 = pneg %p5257_p1 }
  0xa3   : > { %p5263_p7 = pnand %p5262_p6, %p5258_p12 }
  0xa5   : > { %5266 = shalt.err (!%p5263_p7)
}
  0xa6   : > { %s6523_s30 = scalar_lea.sflag [#allocation10], %s5666_s10  ;;  %s5282_s28 = sshra.s32 %s5741_s0, 4  ;;  %s5283_s28 = int_to_ptr.hbm [resolvable:$true] %s5282_s28 }
  0xa7   : > { %4782 = dma.hbm_to_vmem [thread:$0]  (!%p5658_p0), %s691_s9, 16, %s693_s27, %s6523_s30  }
  0xa8   : > { %s5284_s19 = scalar_lea.hbm %s5283_s28, 256  ;;  %s5289_s6 = scalar_lea.hbm %s6457_s11, 1024 }
  0xa9   : > { %p5285_p11 = scmp.ne.s32.totalorder %s5283_s28, %s5284_s19  ;;  %p5290_p12 = scmp.lt.s32.totalorder %s5283_s28, %s6457_s11 }
  0xaa   : > { %p5291_p3 = scmp.lt.s32.totalorder %s5289_s6, %s5284_s19 }
  0xab   : > { %p5287_p13 = pnand %p5285_p11, %p5684_p2 }
  0xac   : > { %p5292_p4 = por %p5291_p3, %p5290_p12 }
  0xad   : > { %p5288_p1 = pneg %p5287_p13 }
  0xaf   : > { %p5293_p6 = pnand %p5292_p4, %p5288_p1 }
  0xb1   : > { %5296 = shalt.err (!%p5293_p6)
}
  0xb2   : > { %s6524_s9 = scalar_lea.sflag [#allocation13], %s5666_s10  ;;  %s773_s2 = scalar_lea.hbm %s6459_s13, %s5466_s21 }
  0xb3   : > { %4788 = dma.hbm_to_vmem [thread:$0]  (!%p5658_p0), %s5741_s0, 4096, %s5739_s3, %s6524_s9, %s6521_s24, %s6521_s24, %s6520_s22  }
  0xb4   : > { %s775_s7 = sshll.u32 %s773_s2, 4  ;;  %s770_s23 = scalar_lea.vmem [#allocation17], %s5674_s25  ;;  %s776_s7 = int_to_ptr.hbm [resolvable:$true] %s775_s7 }
  0xb5   : > { %s777_s20 = sshll.u32 %s770_s23, 4  ;;  %s5312_s14 = sshra.s32 %s776_s7, 4  ;;  %s778_s20 = int_to_ptr.vmem [resolvable:$true] %s777_s20  ;;  %s5313_s14 = int_to_ptr.hbm [resolvable:$true] %s5312_s14 }
  0xb6   : > { %s5314_s30 = scalar_lea.hbm %s5313_s14, 1  ;;  %s5319_s3 = scalar_lea.hbm %s6459_s13, 4 }
  0xb7   : > { %p5315_p7 = scmp.ne.s32.totalorder %s5313_s14, %s5314_s30  ;;  %p5320_p1 = scmp.lt.s32.totalorder %s5313_s14, %s6459_s13 }
  0xb8   : > { %p5321_p12 = scmp.lt.s32.totalorder %s5319_s3, %s5314_s30 }
  0xb9   : > { %p5317_p11 = pnand %p5315_p7, %p5684_p2 }
  0xba   : > { %p5322_p3 = por %p5321_p12, %p5320_p1 }
  0xbb   : > { %p5318_p13 = pneg %p5317_p11 }
  0xbd   : > { %p5323_p4 = pnand %p5322_p3, %p5318_p13 }
  0xbf   : > { %5326 = shalt.err (!%p5323_p4)
}
  0xc0   : > { %s6525_s24 = scalar_lea.sflag [#allocation16], %s5666_s10  ;;  %s6526_s6 = sld [smem:[#allocation50_spill]] }
  0xc1   : > { %4794 = dma.hbm_to_vmem [thread:$0]  (!%p5658_p0), %s776_s7, 16, %s778_s20, %s6525_s24  }
  0xc2   : > { %s787_s17 = scalar_lea.vmem [#allocation18], %s5674_s25  ;;  %s785_s26 = scalar_lea.sflag [#allocation19], %s5666_s10 }
  0xc3   : > { %s794_s9 = sshll.u32 %s787_s17, 4  ;;  %s795_s9 = int_to_ptr.vmem [resolvable:$true] %s794_s9 }
  0xc6   : > { %s790_s29 = scalar_lea.hbm %s6526_s6, %s5466_s21  ;;  %s5349_s7 = scalar_lea.hbm %s6526_s6, 4 }
  0xc7   : > { %s792_s27 = sshll.u32 %s790_s29, 4  ;;  %s793_s27 = int_to_ptr.hbm [resolvable:$true] %s792_s27 }
  0xc8   : > { %s5342_s2 = sshra.s32 %s793_s27, 4  ;;  %s5343_s2 = int_to_ptr.hbm [resolvable:$true] %s5342_s2 }
  0xc9   : > { %s5344_s23 = scalar_lea.hbm %s5343_s2, 1  ;;  %p5350_p13 = scmp.lt.s32.totalorder %s5343_s2, %s6526_s6 }
  0xca   : > { %p5345_p6 = scmp.ne.s32.totalorder %s5343_s2, %s5344_s23  ;;  %p5351_p1 = scmp.lt.s32.totalorder %s5349_s7, %s5344_s23 }
  0xcc   : > { %p5347_p7 = pnand %p5345_p6, %p5684_p2  ;;  %p5352_p12 = por %p5351_p1, %p5350_p13 }
  0xce   : > { %p5348_p11 = pneg %p5347_p7 }
  0xd0   : > { %p5353_p3 = pnand %p5352_p12, %p5348_p11 }
  0xd2   : > { %5356 = shalt.err (!%p5353_p3)
}
  0xd3   : > { %4797 = dma.hbm_to_vmem [thread:$0]  (!%p5658_p0), %s793_s27, 16, %s795_s9, %s785_s26  }
  0xd4   : > { %803 = sbr.rel (%p5638_p10) target bundleno = 2716 (0xa9c), region = 96  ;;  %s6528_s21 = sld [smem:[#allocation36_spill]] (!%p5638_p10) }
  0xd9   : > { %5417 = dma.done.wait (%p131_p5), [#allocation4], 1024  }
  0xda   : > { %5419 = vsyncadd (%p131_p5), [#allocation4], 4294966272  ;;  %s6529_s25 = sld [smem:[#allocation34_spill]]  ;;  %s810_s19 = sand.u32 1, %s6528_s21  }
  0xdb   : > { %s811_s22 = scalar_lea.sflag [#allocation7], %s810_s19 }
  0xe0   : > { %s5870_s3 = sand.u32 1, %s6529_s25  }
  0xe1   : > { %s4717_s0 = smul.u32 192, %s5870_s3 }
  0xe3   : > { %s5873_s15 = scalar_lea.vmem [#allocation6], %s4717_s0 }
  0xe4   : > { %5421 = dma.done.wait (%p5633_p8), %s811_s22, 4096  }
  0xe5   : > { %5423 = vsyncadd (%p5633_p8), %s811_s22, 4294963200  ;;  %s3962_s24 = sshll.u32 %s5870_s3, 6  ;;  %s831_s1 = scalar_lea.sflag [#allocation10], %s810_s19 }
  0xe6   : > { %s5880_s4 = scalar_lea.vmem [#allocation8], %s3962_s24  ;;  %s833_s29 = scalar_lea.vmem [#allocation9], %s5870_s3 }
  0xe7   : > { %5425 = dma.done.wait (%p5633_p8), %s831_s1, 32  }
  0xe8   : > { %5427 = vsyncadd (%p5633_p8), %s831_s1, 4294967264  ;;  %s3963_s17 = sshll.u32 %s5870_s3, 8  ;;  %s842_s9 = scalar_lea.vmem [#allocation11], %s5870_s3 }
  0xe9   : > { %s849_s27 = scalar_lea.sflag [#allocation13], %s810_s19  ;;  %s5889_s26 = scalar_lea.vmem [#allocation12], %s3963_s17 }
  0xea   : > { %5429 = dma.done.wait (%p5633_p8), %s849_s27, 8192  }
  0xeb   : > { %5431 = vsyncadd (%p5633_p8), %s849_s27, 4294959104  ;;  %s5895_s2 = scalar_lea.vmem [#allocation14], %s3963_s17  ;;  %s869_s23 = scalar_lea.sflag [#allocation16], %s810_s19 }
  0xec   : > { %s871_s14 = scalar_lea.vmem [#allocation15], %s5870_s3 }
  0xed   : > { %5433 = dma.done.wait (%p5633_p8), %s869_s23, 32  }
  0xee   : > { %5435 = vsyncadd (%p5633_p8), %s869_s23, 4294967264  ;;  %s887_s7 = scalar_lea.sflag [#allocation19], %s810_s19 }
  0xef   : > { %5437 = dma.done.wait (%p5633_p8), %s887_s7, 16  }
  0xf0   : > { %5439 = vsyncadd (%p5633_p8), %s887_s7, 4294967280 }
  0xf1   : > { %5441 = dma.done.wait (%p131_p5), [#allocation19], 2048  }
  0xf2   : > { %5443 = vsyncadd (%p131_p5), [#allocation19], 4294965248 }
  0xf3   : > { %5445 = dma.done.wait (%p131_p5), [#allocation22], 2064  }
  0xf4   : > { %5447 = vsyncadd (%p131_p5), [#allocation22], 4294965232  ;;  %p1001_p10 = scmp.lt.s32.totalorder %s6528_s21, 3  ;;  %v1013_v0 = vlaneseq  ;;  %s6531_s19 = sld [smem:[#allocation46_spill]]  ;;  %v5480_v2 = vmov 0.0  }
  0xf5   : > { %s6532_s17 = sld [smem:[#allocation45_spill]] }
  0xf6   : > { %s5918_s28 = scalar_select %p1001_p10, %s6528_s21, 3  ;;  %v1014_v1 = vand.u32 127, %v1013_v0 }
  0xf7   : > { %s6533_s20 = sld [smem:[#allocation49_spill]] }
  0xf8   : > { %s4718_s10 = smul.u32 3, %s5918_s28  ;;  %vm1015_vm0 = vcmp.lt.s32.totalorder %v1014_v1, 96  ;;  %s3968_s22 = sshll.u32 %s5918_s28, 2 }
  0xf9   : > { %v5926_v3 = vsel %vm1015_vm0, 1.0, %v5480_v2  ;;  %1021 = sbr.rel (%p3945_p9) target bundleno = 423 (0x1a7), region = 152  ;;  %s6534_s25 = sld [smem:[#allocation41_spill]] (!%p3945_p9) }
  0xfa   : > { %s1007_s0 = scalar_lea.vmem %s6531_s19, %s5918_s28  ;;  %s6535_s24 = sld [smem:[#allocation43_spill]] (!%p3945_p9) }
  0xfb   : > { %s5931_s27 = scalar_lea.vmem %s6532_s17, %s4718_s10 }
  0xfd   : > { %s5936_s30 = scalar_lea.vmem %s6533_s20, %s3968_s22 }
  0xfe   : > { %v4586_v4 = vld [vmem:[#allocation3 + $0x38] sm:$0xff]  ;;  %v4585_v5 = vld [vmem:[#allocation3 + $0x30] sm:$0xff]  ;;  %v4584_v6 = vld [vmem:[#allocation3 + $0x28] sm:$0xff] }
  0xff   : > { %1093 = vmatpush.bf16.msra.mxu0 %v4586_v4  ;;  %v4583_v7 = vld [vmem:[#allocation3 + $0x20] sm:$0xff]  ;;  %v4582_v8 = vld [vmem:[#allocation3 + $0x18] sm:$0xff]  ;;  %v4581_v9 = vld [vmem:[#allocation3 + $0x10] sm:$0xff] }
 0x100   : > { %v4580_v10 = vld [vmem:[#allocation3 + $0x8] sm:$0xff]  ;;  %v4579_v11 = vld [vmem:[#allocation3] sm:$0xff]  ;;  %v1022_v12 = vld [vmem:[%s6534_s25] sm:$0xff] }
 0x101   : > { %v1023_v13 = vld [vmem:[%s6534_s25 + $0x8] sm:$0xff]  ;;  %v4863_v15 = vld [vmem:[%s6535_s24] ss:$0 sm:$0xff] }
 0x102   : > { %v1040_v14 = vpack.c.bf16 %v1023_v13, %v1022_v12 }
 0x103   : > { %1094 = vmatpush.bf16.msra.mxu0 %v4585_v5 }
 0x107   : > { %1095 = vmatpush.bf16.msra.mxu0 %v4584_v6 }
 0x10b   : > { %1096 = vmatpush.bf16.msra.mxu0 %v4583_v7 }
 0x10f   : > { %1097 = vmatpush.bf16.msra.mxu0 %v4582_v8 }
 0x113   : > { %1098 = vmatpush.bf16.msra.mxu0 %v4581_v9 }
 0x117   : > { %1099 = vmatpush.bf16.msra.mxu0 %v4580_v10 }
 0x11b   : > { %1100 = vmatpush.bf16.msra.mxu0 %v4579_v11 }
 0x11e   : > { %1101 = vmatmul.bf16.vlgmr.msra.gmra.mxu0 %v1040_v14 }
 0x19b   : > { %v1102_v16 = vpop.f32.mrf.mxu0 }
 0x19c   : > { %v1103_v17 = vadd.f32 %v4863_v15, %v1102_v16 }
 0x19e   : > { %1107 = vst [vmem:[#allocation2] sm:$0xff] %v1103_v17 }
 0x1a3   : > { %v1104_v18 = vpop.f32.mrf.mxu0 }
 0x1a4   : > { %v1105_v19 = vadd.f32 %v4863_v15, %v1104_v18 }
 0x1a6   : > { %1108 = vst [vmem:[#allocation2 + $0x8] sm:$0xff] %v1105_v19 }
 0x1a7 PF: > { %v4089_v20 = vld [vmem:[%s5873_s15 + $0xa8] sm:$0xf]  ;;  %v4609_v21 = vld [vmem:[%s5873_s15 + $0xb0] sm:$0xf0]  ;;  %v4608_v22 = vld [vmem:[%s5873_s15 + $0xac] sm:$0xf] }
 0x1a8   : > { %v4090_v23 = vor.u32 %v4609_v21, %v4089_v20  ;;  %v4091_v24 = vld [vmem:[%s5873_s15 + $0xb4] sm:$0xf0]  ;;  %v4077_v25 = vld [vmem:[%s5873_s15 + $0x90] sm:$0xf]  ;;  %v4606_v26 = vld [vmem:[%s5873_s15 + $0x98] sm:$0xf0] }
 0x1a9   : > { %v4094_v27 = vor.u32 %v4608_v22, %v4091_v24  ;;  %v4605_v28 = vld [vmem:[%s5873_s15 + $0x94] sm:$0xf]  ;;  %v4079_v29 = vld [vmem:[%s5873_s15 + $0x9c] sm:$0xf0]  ;;  %v4078_v30 = vor.u32 %v4606_v26, %v4077_v25  ;;  %v4065_v32 = vld [vmem:[%s5873_s15 + $0x78] sm:$0xf] }
 0x1aa   : > { %1280 = vmatpush.bf16.msra.mxu0 %v4090_v23  ;;  %v4082_v31 = vor.u32 %v4605_v28, %v4079_v29  ;;  %v4603_v33 = vld [vmem:[%s5873_s15 + $0x80] sm:$0xf0]  ;;  %v4602_v34 = vld [vmem:[%s5873_s15 + $0x7c] sm:$0xf]  ;;  %v4067_v35 = vld [vmem:[%s5873_s15 + $0x84] sm:$0xf0] }
 0x1ab   : > { %1294 = vmatpush.bf16.msra.mxu1 %v4094_v27  ;;  %v4066_v36 = vor.u32 %v4603_v33, %v4065_v32  ;;  %v4070_v37 = vor.u32 %v4602_v34, %v4067_v35  ;;  %v4053_v38 = vld [vmem:[%s5873_s15 + $0x60] sm:$0xf]  ;;  %v4600_v39 = vld [vmem:[%s5873_s15 + $0x68] sm:$0xf0]  ;;  %v4599_v40 = vld [vmem:[%s5873_s15 + $0x64] sm:$0xf] }
 0x1ac   : > { %v4055_v41 = vld [vmem:[%s5873_s15 + $0x6c] sm:$0xf0]  ;;  %v4041_v42 = vld [vmem:[%s5873_s15 + $0x48] sm:$0xf]  ;;  %v4054_v43 = vor.u32 %v4600_v39, %v4053_v38  ;;  %v4597_v44 = vld [vmem:[%s5873_s15 + $0x50] sm:$0xf0] }
 0x1ad   : > { %v4596_v45 = vld [vmem:[%s5873_s15 + $0x4c] sm:$0xf]  ;;  %v4058_v46 = vor.u32 %v4599_v40, %v4055_v41  ;;  %v4043_v47 = vld [vmem:[%s5873_s15 + $0x54] sm:$0xf0]  ;;  %v4042_v48 = vor.u32 %v4597_v44, %v4041_v42  ;;  %v4029_v50 = vld [vmem:[%s5873_s15 + $0x30] sm:$0xf] }
 0x1ae   : > { %1281 = vmatpush.bf16.msra.mxu0 %v4078_v30  ;;  %v4046_v49 = vor.u32 %v4596_v45, %v4043_v47  ;;  %v4594_v51 = vld [vmem:[%s5873_s15 + $0x38] sm:$0xf0]  ;;  %v4593_v52 = vld [vmem:[%s5873_s15 + $0x34] sm:$0xf]  ;;  %v4031_v53 = vld [vmem:[%s5873_s15 + $0x3c] sm:$0xf0] }
 0x1af   : > { %1295 = vmatpush.bf16.msra.mxu1 %v4082_v31  ;;  %v4030_v54 = vor.u32 %v4594_v51, %v4029_v50  ;;  %v4034_v55 = vor.u32 %v4593_v52, %v4031_v53  ;;  %v4017_v56 = vld [vmem:[%s5873_s15 + $0x18] sm:$0xf]  ;;  %v4591_v57 = vld [vmem:[%s5873_s15 + $0x20] sm:$0xf0]  ;;  %v4590_v58 = vld [vmem:[%s5873_s15 + $0x1c] sm:$0xf] }
 0x1b0   : > { %v4019_v59 = vld [vmem:[%s5873_s15 + $0x24] sm:$0xf0]  ;;  %v4018_v60 = vor.u32 %v4591_v57, %v4017_v56  ;;  %v4005_v62 = vld [vmem:[%s5873_s15] sm:$0xf]  ;;  %v4588_v63 = vld [vmem:[%s5873_s15 + $0x8] sm:$0xf0] }
 0x1b1   : > { %v4022_v61 = vor.u32 %v4590_v58, %v4019_v59  ;;  %v4587_v0 = vld [vmem:[%s5873_s15 + $0x4] sm:$0xf]  ;;  %v4007_v1 = vld [vmem:[%s5873_s15 + $0xc] sm:$0xf0]  ;;  %v4006_v2 = vor.u32 %v4588_v63, %v4005_v62  ;;  %v1110_v5 = vld [vmem:[#allocation2 + $0x8] sm:$0xff]  ;;  %vm1426_vm1 = vcmask 130048  }
 0x1b2   : > { %1282 = vmatpush.bf16.msra.mxu0 %v4066_v36  ;;  %v1109_v4 = vld [vmem:[#allocation2] sm:$0xff]  ;;  %v4010_v6 = vor.u32 %v4587_v0, %v4007_v1  ;;  %s5481_s1 = smov 64   ;;  %s5482_s17 = smov 96   ;;  %v4610_v20 = vld [vmem:[%s5873_s15 + $0xb8] sm:$0xf0]  ;;  %vm1811_vm2 = vcmask 64512  }
 0x1b3   : > { %1296 = vmatpush.bf16.msra.mxu1 %v4070_v37  ;;  %v5981_v7 = vpack.c.bf16 %v1110_v5, %v1109_v4  ;;  %v5986_v8 = vld [vmem:[%s5931_s27] sm:$0x7]  ;;  %s5483_s27 = smov 112   ;;  %s5484_s23 = smov 32   ;;  %v4085_v21 = vld [vmem:[%s5873_s15 + $0x98] sm:$0xf] }
 0x1b4   : > { %v1146_v9 = vperm.slane %v5986_v8, 0  ;;  %v1147_v10 = vperm.slane %v5986_v8, 1  ;;  %s5485_s7 = smov 80   ;;  %s5486_s20 = smov 48   ;;  %v4097_v19 = vld [vmem:[%s5873_s15 + $0xb0] sm:$0xf] }
 0x1b5   : > { %v4098_v22 = vor.u32 %v4610_v20, %v4097_v19  ;;  %v4607_v23 = vld [vmem:[%s5873_s15 + $0xa0] sm:$0xf0]  ;;  %v4073_v25 = vld [vmem:[%s5873_s15 + $0x80] sm:$0xf]  ;;  %v4604_v26 = vld [vmem:[%s5873_s15 + $0x88] sm:$0xf0] }
 0x1b6   : > { %1283 = vmatpush.bf16.msra.mxu0 %v4054_v43  ;;  %v4086_v24 = vor.u32 %v4607_v23, %v4085_v21  ;;  %v4061_v27 = vld [vmem:[%s5873_s15 + $0x68] sm:$0xf]  ;;  %v4074_v28 = vor.u32 %v4604_v26, %v4073_v25  ;;  %v4601_v29 = vld [vmem:[%s5873_s15 + $0x70] sm:$0xf0]  ;;  %v4049_v31 = vld [vmem:[%s5873_s15 + $0x50] sm:$0xf] }
 0x1b7   : > { %1297 = vmatpush.bf16.msra.mxu1 %v4058_v46  ;;  %1308 = vmatpush.bf16.msra.mxu2 %v4098_v22  ;;  %v4062_v30 = vor.u32 %v4601_v29, %v4061_v27  ;;  %v4598_v32 = vld [vmem:[%s5873_s15 + $0x58] sm:$0xf0]  ;;  %v4037_v34 = vld [vmem:[%s5873_s15 + $0x38] sm:$0xf]  ;;  %v4595_v35 = vld [vmem:[%s5873_s15 + $0x40] sm:$0xf0] }
 0x1b8   : > { %v4050_v33 = vor.u32 %v4598_v32, %v4049_v31  ;;  %v4038_v36 = vor.u32 %v4595_v35, %v4037_v34  ;;  %v4025_v37 = vld [vmem:[%s5873_s15 + $0x20] sm:$0xf]  ;;  %v4592_v38 = vld [vmem:[%s5873_s15 + $0x28] sm:$0xf0]  ;;  %v4013_v39 = vld [vmem:[%s5873_s15 + $0x8] sm:$0xf] }
 0x1b9   : > { %v4026_v40 = vor.u32 %v4592_v38, %v4025_v37  ;;  %v4589_v41 = vld [vmem:[%s5873_s15 + $0x10] sm:$0xf0]  ;;  %s5487_s10 = smov 16  }
 0x1ba   : > { %1284 = vmatpush.bf16.msra.mxu0 %v4042_v48  ;;  %v4014_v42 = vor.u32 %v4589_v41, %v4013_v39 }
 0x1bb   : > { %1298 = vmatpush.bf16.msra.mxu1 %v4046_v49  ;;  %1309 = vmatpush.bf16.msra.mxu2 %v4086_v24 }
 0x1be   : > { %1285 = vmatpush.bf16.msra.mxu0 %v4030_v54 }
 0x1bf   : > { %1299 = vmatpush.bf16.msra.mxu1 %v4034_v55  ;;  %1310 = vmatpush.bf16.msra.mxu2 %v4074_v28 }
 0x1c2   : > { %1286 = vmatpush.bf16.msra.mxu0 %v4018_v60 }
 0x1c3   : > { %1300 = vmatpush.bf16.msra.mxu1 %v4022_v61  ;;  %1311 = vmatpush.bf16.msra.mxu2 %v4062_v30 }
 0x1c6   : > { %1287 = vmatpush.bf16.msra.mxu0 %v4006_v2 }
 0x1c7   : > { %1301 = vmatpush.bf16.msra.mxu1 %v4010_v6  ;;  %1312 = vmatpush.bf16.msra.mxu2 %v4050_v33 }
 0x1c9   : > { %1288 = vmatmul.bf16.vlgmr.msra.gmra.mxu0 %v5981_v7 }
 0x1ca   : > { %1302 = vmatmul.bf16.vlgmr.msra.gmra.mxu1 %v5981_v7 }
 0x1cb   : > { %1313 = vmatpush.bf16.msra.mxu2 %v4038_v36 }
 0x1cf   : > { %1314 = vmatpush.bf16.msra.mxu2 %v4026_v40 }
 0x1d3   : > { %1315 = vmatpush.bf16.msra.mxu2 %v4014_v42 }
 0x1d6   : > { %1316 = vmatmul.bf16.vlgmr.msra.gmra.mxu2 %v5981_v7 }
 0x246   : > { %v1289_v11 = vpop.f32.mrf.mxu0 }
 0x247   : > { %v5990_v12 = vadd.f32 %v1289_v11, %v1146_v9  ;;  %v1303_v13 = vpop.f32.mrf.mxu1 }
 0x248   : > { %v5992_v14 = vadd.f32 %v1303_v13, %v1147_v10  ;;  %v1148_v13 = vperm.slane %v5986_v8, 2 }
 0x249   : > { %1336 = vrot.lane.b32.xlu1 %v5990_v12, %s5481_s1 }
 0x24a   : > { %1358 = vrot.lane.b32.xlu2 %v5992_v14, %s5482_s17  ;;  %1354 = vrot.lane.b32.xlu0 %v5992_v14, %s5483_s27 }
 0x24b   : > { %4099 = vmatpush.xpose.msk.msra.mxu3 %vm1426_vm1, %v5992_v14 }
 0x24e   : > { %4100 = vmatmul.msk.f32.vlgmr.msra.gmra.mxu3 %vm1426_vm1, %v5990_v12  ;;  %v1291_v17 = vpop.f32.mrf.mxu0 }
 0x24f   : > { %v1305_v15 = vpop.f32.mrf.mxu1  ;;  %v1292_v18 = vadd.f32 %v1291_v17, %v1146_v9 }
 0x250   : > { %v1306_v16 = vadd.f32 %v1305_v15, %v1147_v10 }
 0x251   : > { %1374 = vrot.lane.b32.xlu1 %v5992_v14, %s5484_s23 }
 0x252   : > { %4101 = vmatpush.xpose.msk.msrb.mxu3 %vm1426_vm1, %v1306_v16  ;;  %1328 = vrot.lane.b32.xlu2 %v5990_v12, %s5482_s17 }
 0x253   : > { %1324 = vrot.lane.b32.xlu0 %v5990_v12, %s5483_s27 }
 0x256   : > { %4102 = vmatmul.msk.f32.vlgmr.msrb.gmra.mxu3 %vm1426_vm1, %v1292_v18 }
 0x259   : > { %1356 = vrot.lane.b32.xlu1 %v1306_v16, %s5483_s27 }
 0x25a   : > { %1366 = vrot.lane.b32.xlu2 %v5992_v14, %s5481_s1 }
 0x25b   : > { %1362 = vrot.lane.b32.xlu0 %v5992_v14, %s5485_s7 }
 0x261   : > { %1326 = vrot.lane.b32.xlu1 %v1292_v18, %s5483_s27 }
 0x262   : > { %1332 = vrot.lane.b32.xlu2 %v5990_v12, %s5485_s7 }
 0x263   : > { %1344 = vrot.lane.b32.xlu0 %v5990_v12, %s5484_s23 }
 0x269   : > { %1340 = vrot.lane.b32.xlu1 %v5990_v12, %s5486_s20 }
 0x26a   : > { %1370 = vrot.lane.b32.xlu2 %v5992_v14, %s5486_s20 }
 0x26b   : > { %1360 = vrot.lane.b32.xlu0 %v1306_v16, %s5482_s17 }
 0x271   : > { %1330 = vrot.lane.b32.xlu1 %v1292_v18, %s5482_s17 }
 0x272   : > { %1338 = vrot.lane.b32.xlu2 %v1292_v18, %s5481_s1 }
 0x273   : > { %1368 = vrot.lane.b32.xlu0 %v1306_v16, %s5481_s1 }
 0x279   : > { %1364 = vrot.lane.b32.xlu1 %v1306_v16, %s5485_s7 }
 0x27a   : > { %1376 = vrot.lane.b32.xlu2 %v1306_v16, %s5484_s23 }
 0x27b   : > { %1334 = vrot.lane.b32.xlu0 %v1292_v18, %s5485_s7 }
 0x281   : > { %1346 = vrot.lane.b32.xlu1 %v1292_v18, %s5484_s23 }
 0x282   : > { %1342 = vrot.lane.b32.xlu2 %v1292_v18, %s5486_s20 }
 0x283   : > { %1372 = vrot.lane.b32.xlu0 %v1306_v16, %s5486_s20 }
 0x289   : > { %1380 = vrot.lane.b32.xlu1 %v1306_v16, %s5487_s10 }
 0x28a   : > { %1348 = vrot.lane.b32.xlu2 %v5990_v12, %s5487_s10 }
 0x28b   : > { %1378 = vrot.lane.b32.xlu0 %v5992_v14, %s5487_s10  ;;  %v1317_v14 = vpop.f32.mrf.mxu2 }
 0x28c   : > { %v1318_v15 = vadd.f32 %v1317_v14, %v1148_v13 }
 0x293   : > { %1350 = vrot.lane.b32.xlu0 %v1292_v18, %s5487_s10  ;;  %v1319_v16 = vpop.f32.mrf.mxu2 }
 0x294   : > { %v1320_v17 = vadd.f32 %v1319_v16, %v1148_v13 }
 0x296   : > { %v6100_v20 = vpack.i.bf16 %v1320_v17, %v1318_v15 }
 0x2a4   : > { %v1359_v43 = vpop.permute.xlu2 %1358 }
 0x2ac   : > { %v1329_v44 = vpop.permute.xlu2 %1328 }
 0x2b4   : > { %v1367_v45 = vpop.permute.xlu2 %1366 }
 0x2b5   : > { %4115 = vmatpush.xpose.msk.msrb.mxu2 %vm1426_vm1, %v1367_v45 }
 0x2bb   : > { %v1337_v46 = vpop.permute.xlu1 %1336 }
 0x2bc   : > { %v1355_v47 = vpop.permute.xlu0 %1354  ;;  %4116 = vmatmul.msk.f32.vlgmr.msrb.gmra.mxu2 %vm1426_vm1, %v1337_v46  ;;  %v1333_v49 = vpop.permute.xlu2 %1332 }
 0x2bd   : > { %4103 = vmatpush.xpose.msk.msra.mxu3 %vm1426_vm1, %v1355_v47 }
 0x2c3   : > { %v1375_v48 = vpop.permute.xlu1 %1374 }
 0x2c4   : > { %4123 = vmatpush.xpose.msk.msra.mxu2 %vm1426_vm1, %v1375_v48  ;;  %v1371_v53 = vpop.permute.xlu2 %1370 }
 0x2c5   : > { %v1325_v50 = vpop.permute.xlu0 %1324 }
 0x2c6   : > { %4104 = vmatmul.msk.f32.vlgmr.msra.gmra.mxu3 %vm1426_vm1, %v1325_v50 }
 0x2c8   : > { %2006 = vmatpush.msrb.mxu2 %v1318_v15 }
 0x2cb   : > { %v1357_v51 = vpop.permute.xlu1 %1356 }
 0x2cc   : > { %4105 = vmatpush.xpose.msk.msrb.mxu3 %vm1426_vm1, %v1357_v51  ;;  %v1339_v61 = vpop.permute.xlu2 %1338 }
 0x2cd   : > { %v1363_v52 = vpop.permute.xlu0 %1362 }
 0x2ce   : > { %4111 = vmatpush.xpose.msk.msrb.mxu0 %vm1426_vm1, %v1363_v52 }
 0x2d0   : > { %4107 = vmatpush.xpose.msk.msra.mxu3 %vm1426_vm1, %v1359_v43 }
 0x2d1   : > { %v6068_v54 = vpop.f32.mrf.mxu3  ;;  %4112 = vmatmul.msk.f32.vlgmr.msrb.gmra.mxu0 %vm1426_vm1, %v1333_v49 }
 0x2d2   : > { %4119 = vmatpush.xpose.msk.msra.mxu0 %vm1426_vm1, %v1371_v53  ;;  %v1812_v55 = vsel %vm1811_vm2, %v6068_v54, -inf }
 0x2d3   : > { %1813 = vmax.xlane.f32.xlu1 %v1812_v55  ;;  %v1327_v56 = vpop.permute.xlu1 %1326 }
 0x2d4   : > { %4106 = vmatmul.msk.f32.vlgmr.msrb.gmra.mxu3 %vm1426_vm1, %v1327_v56  ;;  %v1377_v1 = vpop.permute.xlu2 %1376 }
 0x2d5   : > { %v1345_v57 = vpop.permute.xlu0 %1344 }
 0x2d6   : > { %4124 = vmatmul.msk.f32.vlgmr.msra.gmra.mxu2 %vm1426_vm1, %v1345_v57 }
 0x2d9   : > { %v6075_v58 = vpop.f32.mrf.mxu3 }
 0x2da   : > { %v1815_v59 = vsel %vm1811_vm2, %v6075_v58, -inf }
 0x2db   : > { %1816 = vmax.xlane.f32.xlu2 %v1815_v59  ;;  %v1341_v60 = vpop.permute.xlu1 %1340 }
 0x2dc   : > { %4108 = vmatmul.msk.f32.vlgmr.msra.gmra.mxu3 %vm1426_vm1, %v1329_v44  ;;  %4120 = vmatmul.msk.f32.vlgmr.msra.gmra.mxu0 %vm1426_vm1, %v1341_v60  ;;  %v1343_v7 = vpop.permute.xlu2 %1342 }
 0x2dd   : > { %v1361_v62 = vpop.permute.xlu0 %1360 }
 0x2de   : > { %4109 = vmatpush.xpose.msk.msrb.mxu3 %vm1426_vm1, %v1361_v62 }
 0x2e3   : > { %v1331_v63 = vpop.permute.xlu1 %1330 }
 0x2e4   : > { %4110 = vmatmul.msk.f32.vlgmr.msrb.gmra.mxu3 %vm1426_vm1, %v1331_v63  ;;  %v1349_v11 = vpop.permute.xlu2 %1348 }
 0x2e5   : > { %v1369_v0 = vpop.permute.xlu0 %1368 }
 0x2e6   : > { %4117 = vmatpush.xpose.msk.msra.mxu3 %vm1426_vm1, %v1369_v0 }
 0x2ea   : > { %4125 = vmatpush.xpose.msk.msrb.mxu3 %vm1426_vm1, %v1377_v1 }
 0x2eb   : > { %v1365_v2 = vpop.permute.xlu1 %1364 }
 0x2ec   : > { %4113 = vmatpush.xpose.msk.msrb.mxu1 %vm1426_vm1, %v1365_v2  ;;  %4118 = vmatmul.msk.f32.vlgmr.msra.gmra.mxu3 %vm1426_vm1, %v1339_v61 }
 0x2ed   : > { %v1335_v4 = vpop.permute.xlu0 %1334 }
 0x2ee   : > { %2029 = vmatpush.msra.mxu3 %v1320_v17 }
 0x2ef   : > { %4114 = vmatmul.msk.f32.vlgmr.msrb.gmra.mxu1 %vm1426_vm1, %v1335_v4 }
 0x2f3   : > { %v1347_v5 = vpop.permute.xlu1 %1346 }
 0x2f4   : > { %4126 = vmatmul.msk.f32.vlgmr.msrb.gmra.mxu3 %vm1426_vm1, %v1347_v5 }
 0x2f5   : > { %v1373_v6 = vpop.permute.xlu0 %1372 }
 0x2f6   : > { %4121 = vmatpush.xpose.msk.msra.mxu1 %vm1426_vm1, %v1373_v6 }
 0x2f9   : > { %4122 = vmatmul.msk.f32.vlgmr.msra.gmra.mxu1 %vm1426_vm1, %v1343_v7 }
 0x2fb   : > { %v1381_v9 = vpop.permute.xlu1 %1380 }
 0x2fc   : > { %4129 = vmatpush.xpose.msk.msrb.mxu1 %vm1426_vm1, %v1381_v9 }
 0x2fd   : > { %v1379_v10 = vpop.permute.xlu0 %1378 }
 0x2fe   : > { %4127 = vmatpush.xpose.msk.msrb.mxu0 %vm1426_vm1, %v1379_v10 }
 0x301   : > { %4128 = vmatmul.msk.f32.vlgmr.msrb.gmra.mxu0 %vm1426_vm1, %v1349_v11 }
 0x305   : > { %v1351_v12 = vpop.permute.xlu0 %1350 }
 0x306   : > { %4130 = vmatmul.msk.f32.vlgmr.msrb.gmra.mxu1 %vm1426_vm1, %v1351_v12 }
 0x33f   : > { %v6096_v18 = vpop.f32.mrf.mxu2 }
 0x340   : > { %v1836_v19 = vsel %vm1811_vm2, %v6096_v18, -inf }
 0x341   : > { %1837 = vmax.xlane.f32.xlu2 %v1836_v19 }
 0x346   : > { %v1814_v28 = vpop.xlane.xlu1 %1813 }
 0x347   : > { %v1860_v29 = vsub.f32 %v6068_v54, %v1814_v28 }
 0x349   : > { %v6102_v22 = vpop.f32.mrf.mxu3  ;;  %v1876_v32 = vmul.f32 1.442695, %v1860_v29 }
 0x34a   : > { %v1818_v8 = vsel %vm1811_vm2, %v6102_v22, -inf }
 0x34b   : > { %4905 = vpow2.f32 %v1876_v32 }
 0x34e   : > { %v1592_v21 = vpop.f32.mrf.mxu0  ;;  %v1817_v34 = vpop.xlane.xlu2 %1816 }
 0x34f   : > { %v1830_v23 = vsel %vm1811_vm2, %v1592_v21, -inf  ;;  %v1861_v36 = vsub.f32 %v6075_v58, %v1817_v34 }
 0x350   : > { %1831 = vmax.xlane.f32.xlu0 %v1830_v23 }
 0x351   : > { %v6129_v39 = vpop.eup %4905  ;;  %v1878_v40 = vmul.f32 1.442695, %v1861_v36 }
 0x352   : > { %v1908_v41 = vsel %vm1811_vm2, %v6129_v39, 0.0 }
 0x353   : > { %4907 = vpow2.f32 %v1878_v40 }
 0x357   : > { %v6107_v24 = vpop.f32.mrf.mxu3 }
 0x358   : > { %1819 = vmax.xlane.f32.xlu0 %v1818_v8  ;;  %v1821_v25 = vsel %vm1811_vm2, %v6107_v24, -inf }
 0x359   : > { %1822 = vmax.xlane.f32.xlu2 %v1821_v25  ;;  %v6111_v26 = vpop.f32.mrf.mxu2  ;;  %v6120_v33 = vpop.f32.mrf.mxu0 }
 0x35a   : > { %v1848_v27 = vsel %vm1811_vm2, %v6111_v26, -inf  ;;  %v1842_v35 = vsel %vm1811_vm2, %v6120_v33, -inf  ;;  %v6141_v46 = vpop.eup %4907 }
 0x35b   : > { %v1911_v49 = vsel %vm1811_vm2, %v6141_v46, 0.0 }
 0x35f   : > { %v6137_v44 = vpop.f32.mrf.mxu3 }
 0x360   : > { %1849 = vmax.xlane.f32.xlu0 %v1848_v27  ;;  %v1824_v48 = vsel %vm1811_vm2, %v6137_v44, -inf }
 0x367   : > { %v6149_v50 = vpop.f32.mrf.mxu3 }
 0x368   : > { %v1827_v51 = vsel %vm1811_vm2, %v6149_v50, -inf }
 0x36c   : > { %v6116_v30 = vpop.f32.mrf.mxu1 }
 0x36d   : > { %v1833_v31 = vsel %vm1811_vm2, %v6116_v30, -inf }
 0x36e   : > { %1834 = vmax.xlane.f32.xlu1 %v1833_v31 }
 0x36f   : > { %v6161_v52 = vpop.f32.mrf.mxu3 }
 0x370   : > { %v1839_v58 = vsel %vm1811_vm2, %v6161_v52, -inf }
 0x376   : > { %v6125_v37 = vpop.f32.mrf.mxu1  ;;  %1843 = vmax.xlane.f32.xlu1 %v1842_v35 }
 0x377   : > { %v1845_v38 = vsel %vm1811_vm2, %v6125_v37, -inf  ;;  %v6163_v55 = vpop.f32.mrf.mxu3 }
 0x378   : > { %1846 = vmax.xlane.f32.xlu2 %v1845_v38  ;;  %v1851_v57 = vsel %vm1811_vm2, %v6163_v55, -inf }
 0x37e   : > { %v6133_v42 = vpop.f32.mrf.mxu0  ;;  %1909 = vadd.xlane.f32.xlu1 %v1908_v41 }
 0x37f   : > { %v1854_v43 = vsel %vm1811_vm2, %v6133_v42, -inf }
 0x380   : > { %1855 = vmax.xlane.f32.xlu2 %v1854_v43 }
 0x383   : > { %v6139_v45 = vpop.f32.mrf.mxu1 }
 0x384   : > { %v1857_v47 = vsel %vm1811_vm2, %v6139_v45, -inf }
 0x385   : > { %1858 = vmax.xlane.f32.xlu0 %v1857_v47 }
 0x386   : > { %1825 = vmax.xlane.f32.xlu1 %v1824_v48 }
 0x388   : > { %1912 = vadd.xlane.f32.xlu2 %v1911_v49 }
 0x390   : > { %1828 = vmax.xlane.f32.xlu2 %v1827_v51 }
 0x399   : > { %4870 = vrot.lane.b32.xlu0 %v6100_v20, %s5482_s17 }
 0x39f   : > { %4875 = vrot.lane.b32.xlu1 %v6100_v20, %s5485_s7 }
 0x3a1   : > { %4880 = vrot.lane.b32.xlu0 %v6100_v20, %s5481_s1 }
 0x3a8   : > { %4865 = vrot.lane.b32.xlu2 %v6100_v20, %s5483_s27 }
 0x3b4   : > { %v1838_v59 = vpop.xlane.xlu2 %1837 }
 0x3b5   : > { %v1868_v63 = vsub.f32 %v6096_v18, %v1838_v59 }
 0x3b7   : > { %v1892_v2 = vmul.f32 1.442695, %v1868_v63 }
 0x3c3   : > { %v1832_v53 = vpop.xlane.xlu0 %1831 }
 0x3c4   : > { %v1866_v54 = vsub.f32 %v1592_v21, %v1832_v53 }
 0x3c6   : > { %v1888_v56 = vmul.f32 1.442695, %v1866_v54 }
 0x3c8   : > { %4909 = vpow2.f32 %v1888_v56 }
 0x3c9   : > { %1852 = vmax.xlane.f32.xlu1 %v1851_v57 }
 0x3cb   : > { %v1820_v60 = vpop.xlane.xlu0 %1819  ;;  %1840 = vmax.xlane.f32.xlu0 %v1839_v58 }
 0x3cc   : > { %v1862_v61 = vsub.f32 %v6102_v22, %v1820_v60  ;;  %v1823_v12 = vpop.xlane.xlu2 %1822 }
 0x3cd   : > { %v1863_v21 = vsub.f32 %v6107_v24, %v1823_v12 }
 0x3ce   : > { %v6170_v62 = vpop.eup %4909  ;;  %v1880_v0 = vmul.f32 1.442695, %v1862_v61 }
 0x3cf   : > { %v1926_v1 = vsel %vm1811_vm2, %v6170_v62, 0.0  ;;  %v1882_v8 = vmul.f32 1.442695, %v1863_v21 }
 0x3d0   : > { %4911 = vpow2.f32 %v1880_v0 }
 0x3d1   : > { %1927 = vadd.xlane.f32.xlu1 %v1926_v1  ;;  %4913 = vpow2.f32 %v1892_v2 }
 0x3d3   : > { %v1850_v9 = vpop.xlane.xlu0 %1849 }
 0x3d4   : > { %v1872_v13 = vsub.f32 %v6111_v26, %v1850_v9 }
 0x3d6   : > { %v6175_v4 = vpop.eup %4911  ;;  %v1900_v15 = vmul.f32 1.442695, %v1872_v13 }
 0x3d7   : > { %v1914_v5 = vsel %vm1811_vm2, %v6175_v4, 0.0  ;;  %v6179_v6 = vpop.eup %4913 }
 0x3d8   : > { %1915 = vadd.xlane.f32.xlu0 %v1914_v5  ;;  %v1932_v7 = vsel %vm1811_vm2, %v6179_v6, 0.0 }
 0x3e0   : > { %1933 = vadd.xlane.f32.xlu0 %v1932_v7 }
 0x3e1   : > { %v1835_v10 = vpop.xlane.xlu1 %1834 }
 0x3e2   : > { %v1867_v11 = vsub.f32 %v6116_v30, %v1835_v10 }
 0x3e4   : > { %v1890_v14 = vmul.f32 1.442695, %v1867_v11 }
 0x3e6   : > { %4915 = vpow2.f32 %v1890_v14 }
 0x3e7   : > { %4917 = vpow2.f32 %v1900_v15 }
 0x3e9   : > { %v1844_v16 = vpop.xlane.xlu1 %1843 }
 0x3ea   : > { %v1870_v17 = vsub.f32 %v6120_v33, %v1844_v16 }
 0x3eb   : > { %v1847_v18 = vpop.xlane.xlu2 %1846 }
 0x3ec   : > { %v6186_v19 = vpop.eup %4915  ;;  %v1896_v22 = vmul.f32 1.442695, %v1870_v17  ;;  %v1871_v27 = vsub.f32 %v6125_v37, %v1847_v18 }
 0x3ed   : > { %v1929_v23 = vsel %vm1811_vm2, %v6186_v19, 0.0  ;;  %v6191_v26 = vpop.eup %4917 }
 0x3ee   : > { %4919 = vpow2.f32 %v1896_v22  ;;  %1930 = vadd.xlane.f32.xlu2 %v1929_v23  ;;  %v1944_v24 = vsel %vm1811_vm2, %v6191_v26, 0.0  ;;  %v1898_v31 = vmul.f32 1.442695, %v1871_v27 }
 0x3f1   : > { %v1910_v25 = vpop.xlane.xlu1 %1909 }
 0x3f2   : > { %4921 = vrcp.f32 %v1910_v25 }
 0x3f3   : > { %v6194_v28 = vpop.xlane.xlu2 %1855  ;;  %4923 = vpow2.f32 %v1882_v8 }
 0x3f4   : > { %v6196_v29 = vpop.eup %4919  ;;  %4925 = vpow2.f32 %v1898_v31 }
 0x3f5   : > { %v1938_v30 = vsel %vm1811_vm2, %v6196_v29, 0.0 }
 0x3f6   : > { %1945 = vadd.xlane.f32.xlu2 %v1944_v24  ;;  %1939 = vadd.xlane.f32.xlu1 %v1938_v30 }
 0x3f8   : > { %v4922_v32 = vpop.eup %4921  ;;  %v1859_v37 = vpop.xlane.xlu0 %1858 }
 0x3f9   : > { %v1972_v33 = vmul.f32 %v4922_v32, %v6129_v39  ;;  %v1826_v34 = vpop.xlane.xlu1 %1825  ;;  %v6203_v35 = vpop.eup %4923  ;;  %v1875_v43 = vsub.f32 %v6139_v45, %v1859_v37  ;;  %v1874_v37 = vsub.f32 %v6133_v42, %v6194_v28 }
 0x3fa   : > { %v1864_v36 = vsub.f32 %v6137_v44, %v1826_v34  ;;  %v1917_v41 = vsel %vm1811_vm2, %v6203_v35, 0.0  ;;  %v6210_v39 = vpop.eup %4925 }
 0x3fb   : > { %v1913_v38 = vpop.xlane.xlu2 %1912  ;;  %4131 = vmatmul.msk.f32.vlgmr.msrb.gmra.mxu2 %vm1811_vm2, %v1972_v33  ;;  %v1906_v48 = vmul.f32 1.442695, %v1875_v43  ;;  %v1941_v45 = vsel %vm1811_vm2, %v6210_v39, 0.0 }
 0x3fc   : > { %4927 = vrcp.f32 %v1913_v38  ;;  %v1884_v40 = vmul.f32 1.442695, %v1864_v36 }
 0x3fe   : > { %4929 = vpow2.f32 %v1884_v40  ;;  %1918 = vadd.xlane.f32.xlu1 %v1917_v41 }
 0x3ff   : > { %4931 = vpow2.f32 %v1906_v48 }
 0x402   : > { %v4928_v47 = vpop.eup %4927 }
 0x403   : > { %v1973_v44 = vmul.f32 %v4928_v47, %v6141_v46  ;;  %v1829_v49 = vpop.xlane.xlu2 %1828 }
 0x404   : > { %v6213_v51 = vpop.eup %4929  ;;  %v1865_v53 = vsub.f32 %v6149_v50, %v1829_v49 }
 0x405   : > { %4132 = vmatmul.msk.f32.vlgmr.msra.gmra.mxu3 %vm1811_vm2, %v1973_v44  ;;  %v1920_v54 = vsel %vm1811_vm2, %v6213_v51, 0.0  ;;  %v6221_v58 = vpop.eup %4931 }
 0x406   : > { %v1886_v56 = vmul.f32 1.442695, %v1865_v53  ;;  %1921 = vadd.xlane.f32.xlu2 %v1920_v54  ;;  %1942 = vadd.xlane.f32.xlu1 %v1941_v45  ;;  %v1953_v0 = vsel %vm1811_vm2, %v6221_v58, 0.0 }
 0x408   : > { %4933 = vpow2.f32 %v1886_v56 }
 0x40b   : > { %v4871_v57 = vpop.permute.xlu0 %4870  ;;  %v4866_v46 = vpop.permute.xlu2 %4865 }
 0x40c   : > { %v4873_v59 = vunpack.i.h.bf16 %v4871_v57  ;;  %v4872_v60 = vunpack.i.l.bf16 %v4871_v57  ;;  %v4868_v50 = vunpack.i.h.bf16 %v4866_v46  ;;  %v4867_v61 = vunpack.i.l.bf16 %v4866_v46 }
 0x40e   : > { %v6223_v63 = vpop.eup %4933  ;;  %2052 = vmatpush.msra.mxu0 %v4867_v61  ;;  %2075 = vmatpush.msra.mxu1 %v4868_v50  ;;  %v4611_v61 = vld [vmem:[%s5880_s4] sm:$0xff] }
 0x40f   : > { %2098 = vmatpush.msra.mxu2 %v4872_v60  ;;  %2121 = vmatpush.msrb.mxu3 %v4873_v59  ;;  %v1923_v1 = vsel %vm1811_vm2, %v6223_v63, 0.0 }
 0x410   : > { %1954 = vadd.xlane.f32.xlu2 %v1953_v0  ;;  %1924 = vadd.xlane.f32.xlu0 %v1923_v1 }
 0x411   : > { %v4876_v2 = vpop.permute.xlu1 %4875 }
 0x412   : > { %v4878_v5 = vunpack.i.h.bf16 %v4876_v2  ;;  %v4877_v7 = vunpack.i.l.bf16 %v4876_v2 }
 0x413   : > { %v4881_v9 = vpop.permute.xlu0 %4880 }
 0x414   : > { %v4883_v10 = vunpack.i.h.bf16 %v4881_v9  ;;  %v4882_v11 = vunpack.i.l.bf16 %v4881_v9  ;;  %2144 = vmatpush.msrb.mxu0 %v4877_v7  ;;  %2167 = vmatpush.msrb.mxu1 %v4878_v5 }
 0x416   : > { %2190 = vmatpush.msrb.mxu2 %v4882_v11  ;;  %2213 = vmatpush.msra.mxu3 %v4883_v10 }
 0x428   : > { %4895 = vrot.lane.b32.xlu2 %v6100_v20, %s5487_s10 }
 0x43c   : > { %v1853_v12 = vpop.xlane.xlu1 %1852 }
 0x43d   : > { %v1873_v13 = vsub.f32 %v6163_v55, %v1853_v12 }
 0x43e   : > { %v1841_v14 = vpop.xlane.xlu0 %1840 }
 0x43f   : > { %v1869_v15 = vsub.f32 %v6161_v52, %v1841_v14  ;;  %v1902_v16 = vmul.f32 1.442695, %v1873_v13 }
 0x441   : > { %v1894_v17 = vmul.f32 1.442695, %v1869_v15  ;;  %4935 = vpow2.f32 %v1902_v16 }
 0x443   : > { %4937 = vpow2.f32 %v1894_v17 }
 0x444   : > { %v1928_v55 = vpop.xlane.xlu1 %1927 }
 0x447   : > { %v6233_v18 = vpop.eup %4935 }
 0x448   : > { %v1947_v21 = vsel %vm1811_vm2, %v6233_v18, 0.0 }
 0x449   : > { %v4938_v22 = vpop.eup %4937  ;;  %1948 = vadd.xlane.f32.xlu0 %v1947_v21 }
 0x44a   : > { %v1935_v23 = vsel %vm1811_vm2, %v4938_v22, 0.0 }
 0x44b   : > { %v1916_v8 = vpop.xlane.xlu0 %1915  ;;  %1936 = vadd.xlane.f32.xlu1 %v1935_v23  ;;  %v4614_v23 = vld [vmem:[%s5880_s4 + $0x18] sm:$0xff] }
 0x44c   : > { %4939 = vrcp.f32 %v1916_v8 }
 0x44d   : > { %4941 = vrcp.f32 %v1928_v55  ;;  %v4613_v55 = vld [vmem:[%s5880_s4 + $0x10] sm:$0xff] }
 0x452   : > { %v4940_v25 = vpop.eup %4939 }
 0x453   : > { %v1974_v52 = vmul.f32 %v4940_v25, %v6175_v4  ;;  %v4942_v27 = vpop.eup %4941 }
 0x454   : > { %v1978_v24 = vmul.f32 %v4942_v27, %v6170_v62  ;;  %v1934_v62 = vpop.xlane.xlu0 %1933 }
 0x455   : > { %4133 = vmatmul.msk.f32.vlgmr.msra.gmra.mxu0 %vm1811_vm2, %v1974_v52 }
 0x45d   : > { %4137 = vmatmul.msk.f32.vlgmr.msrb.gmra.mxu0 %vm1811_vm2, %v1978_v24  ;;  %4890 = vrot.lane.b32.xlu0 %v6100_v20, %s5484_s23 }
 0x461   : > { %v1931_v30 = vpop.xlane.xlu2 %1930 }
 0x464   : > { %4885 = vrot.lane.b32.xlu1 %v6100_v20, %s5486_s20  ;;  %v1904_v20 = vmul.f32 1.442695, %v1874_v37 }
 0x469   : > { %v1940_v31 = vpop.xlane.xlu1 %1939  ;;  %v1946_v32 = vpop.xlane.xlu2 %1945 }
 0x471   : > { %v1919_v33 = vpop.xlane.xlu1 %1918 }
 0x472   : > { %4943 = vrcp.f32 %v1919_v33 }
 0x473   : > { %4945 = vrcp.f32 %v1931_v30 }
 0x478   : > { %v4944_v34 = vpop.eup %4943 }
 0x479   : > { %v1975_v4 = vmul.f32 %v4944_v34, %v6203_v35  ;;  %v1922_v36 = vpop.xlane.xlu2 %1921  ;;  %v4946_v38 = vpop.eup %4945 }
 0x47a   : > { %4947 = vrcp.f32 %v1922_v36  ;;  %v1979_v41 = vmul.f32 %v4946_v38, %v6186_v19  ;;  %v1943_v49 = vpop.xlane.xlu1 %1942 }
 0x47b   : > { %4134 = vmatmul.msk.f32.vlgmr.msra.gmra.mxu1 %vm1811_vm2, %v1975_v4  ;;  %4949 = vrcp.f32 %v1934_v62 }
 0x47c   : > { %4951 = vpow2.f32 %v1904_v20 }
 0x47e   : > { %v2008_v0 = vpop.f32.mrf.mxu2 }
 0x47f   : > { %v2372_v7 = vpack.c.bf16 %v2008_v0, %v2008_v0 }
 0x480   : > { %v4948_v40 = vpop.eup %4947 }
 0x481   : > { %v1976_v43 = vmul.f32 %v4948_v40, %v6213_v51  ;;  %v4950_v35 = vpop.eup %4949  ;;  %v2390_v16 = vunpack.c.l.b16 %v2372_v7 }
 0x482   : > { %v1980_v48 = vmul.f32 %v4950_v35, %v6179_v6  ;;  %v6255_v44 = vpop.eup %4951 }
 0x483   : > { %v1925_v47 = vpop.xlane.xlu0 %1924  ;;  %4135 = vmatmul.msk.f32.vlgmr.msra.gmra.mxu2 %vm1811_vm2, %v1976_v43  ;;  %4138 = vmatmul.msk.f32.vlgmr.msrb.gmra.mxu1 %vm1811_vm2, %v1979_v41  ;;  %v1950_v19 = vsel %vm1811_vm2, %v6255_v44, 0.0  ;;  %v1955_v45 = vpop.xlane.xlu2 %1954 }
 0x484   : > { %4953 = vrcp.f32 %v1925_v47 }
 0x488   : > { %v2031_v46 = vpop.f32.mrf.mxu3 }
 0x489   : > { %v2373_v2 = vpack.c.bf16 %v2031_v46, %v2031_v46 }
 0x48a   : > { %v4954_v42 = vpop.eup %4953 }
 0x48b   : > { %4139 = vmatmul.msk.f32.vlgmr.msrb.gmra.mxu2 %vm1811_vm2, %v1980_v48  ;;  %v1977_v28 = vmul.f32 %v4954_v42, %v6223_v63  ;;  %v2391_v10 = vunpack.c.l.b16 %v2373_v2  ;;  %v4896_v11 = vpop.permute.xlu2 %4895 }
 0x48c   : > { %v4898_v17 = vunpack.i.h.bf16 %v4896_v11 }
 0x48d   : > { %4136 = vmatmul.msk.f32.vlgmr.msrb.gmra.mxu3 %vm1811_vm2, %v1977_v28  ;;  %v2392_v21 = vpack.c.b16 %v2391_v10, %v2390_v16  ;;  %v4615_v28 = vld [vmem:[%s5880_s4 + $0x20] sm:$0xff] }
 0x48e   : > { %1951 = vadd.xlane.f32.xlu1 %v1950_v19  ;;  %v4616_v19 = vld [vmem:[%s5880_s4 + $0x28] sm:$0xff] }
 0x4bc   : > { %v1949_v54 = vpop.xlane.xlu0 %1948 }
 0x4be   : > { %v1937_v51 = vpop.xlane.xlu1 %1936 }
 0x4bf   : > { %4955 = vrcp.f32 %v1937_v51 }
 0x4c0   : > { %4957 = vrcp.f32 %v1946_v32 }
 0x4c1   : > { %4959 = vrcp.f32 %v1949_v54 }
 0x4c2   : > { %4961 = vrcp.f32 %v1940_v31 }
 0x4c3   : > { %4963 = vrcp.f32 %v1943_v49  ;;  %v4617_v49 = vld [vmem:[%s5880_s4 + $0x30] sm:$0xff] }
 0x4c4   : > { %4965 = vrcp.f32 %v1955_v45 }
 0x4c5   : > { %v4956_v53 = vpop.eup %4955 }
 0x4c6   : > { %v1981_v6 = vmul.f32 %v4956_v53, %v4938_v22  ;;  %v4958_v56 = vpop.eup %4957 }
 0x4c7   : > { %v4960_v57 = vpop.eup %4959  ;;  %v1984_v63 = vmul.f32 %v4958_v56, %v6191_v26 }
 0x4c8   : > { %4140 = vmatmul.msk.f32.vlgmr.msra.gmra.mxu3 %vm1811_vm2, %v1981_v6  ;;  %v1985_v1 = vmul.f32 %v4960_v57, %v6233_v18  ;;  %v4962_v5 = vpop.eup %4961  ;;  %v4897_v18 = vunpack.i.l.bf16 %v4896_v11  ;;  %v4618_v11 = vld [vmem:[%s5880_s4 + $0x38] sm:$0xff] }
 0x4c9   : > { %v4964_v9 = vpop.eup %4963  ;;  %v1982_v14 = vmul.f32 %v4962_v5, %v6196_v29  ;;  %v4612_v29 = vld [vmem:[%s5880_s4 + $0x8] sm:$0xff] }
 0x4ca   : > { %v1983_v15 = vmul.f32 %v4964_v9, %v6210_v39  ;;  %v4966_v22 = vpop.eup %4965 }
 0x4cb   : > { %v1987_v39 = vmul.f32 %v4966_v22, %v6221_v58 }
 0x4cf   : > { %v4891_v59 = vpop.permute.xlu0 %4890 }
 0x4d0   : > { %v4893_v60 = vunpack.i.h.bf16 %v4891_v59  ;;  %v4892_v50 = vunpack.i.l.bf16 %v4891_v59 }
 0x4d2   : > { %2282 = vmatpush.msra.mxu2 %v4892_v50  ;;  %2305 = vmatpush.msrb.mxu3 %v4893_v60  ;;  %v2054_v8 = vpop.f32.mrf.mxu0 }
 0x4d3   : > { %4143 = vmatmul.msk.f32.vlgmr.msra.gmra.mxu2 %vm1811_vm2, %v1984_v63  ;;  %4144 = vmatmul.msk.f32.vlgmr.msrb.gmra.mxu3 %vm1811_vm2, %v1985_v1  ;;  %v2374_v25 = vpack.c.bf16 %v2054_v8, %v2054_v8 }
 0x4d4   : > { %2409 = vmatpush.bf16.msrb.mxu2 %v4611_v61  ;;  %2437 = vmatpush.bf16.msra.mxu3 %v4612_v29 }
 0x4d5   : > { %v2418_v24 = vunpack.c.l.b16 %v2374_v25 }
 0x4d6   : > { %v4886_v12 = vpop.permute.xlu1 %4885 }
 0x4d7   : > { %v4888_v13 = vunpack.i.h.bf16 %v4886_v12  ;;  %v4887_v26 = vunpack.i.l.bf16 %v4886_v12 }
 0x4d8   : > { %2521 = vmatpush.bf16.msra.mxu2 %v4615_v28  ;;  %2549 = vmatpush.bf16.msrb.mxu3 %v4616_v19 }
 0x4d9   : > { %2236 = vmatpush.msra.mxu0 %v4887_v26  ;;  %2259 = vmatpush.msra.mxu1 %v4888_v13 }
 0x4da   : > { %4141 = vmatmul.msk.f32.vlgmr.msra.gmra.mxu0 %vm1811_vm2, %v1982_v14  ;;  %4142 = vmatmul.msk.f32.vlgmr.msra.gmra.mxu1 %vm1811_vm2, %v1983_v15  ;;  %v2146_v31 = vpop.f32.mrf.mxu0 }
 0x4db   : > { %2328 = vmatpush.msrb.mxu0 %v4897_v18  ;;  %2351 = vmatpush.msrb.mxu1 %v4898_v17  ;;  %v2378_v33 = vpack.c.bf16 %v2146_v31, %v2146_v31 }
 0x4dc   : > { %4151 = vmatmul.msk.bf16.vlgmr.msrb.gmra.mxu2 %vm1426_vm1, %v2392_v21 }
 0x4dd   : > { %2493 = vmatpush.bf16.msra.mxu1 %v4614_v23  ;;  %2465 = vmatpush.bf16.msra.mxu0 %v4613_v55  ;;  %v2474_v36 = vunpack.c.l.b16 %v2378_v33 }
 0x4e2   : > { %4146 = vmatmul.msk.f32.vlgmr.msrb.gmra.mxu1 %vm1811_vm2, %v1987_v39 }
 0x4e3   : > { %2605 = vmatpush.bf16.msrb.mxu1 %v4618_v11 }
 0x4f8   : > { %v2077_v52 = vpop.f32.mrf.mxu1 }
 0x4f9   : > { %v2375_v27 = vpack.c.bf16 %v2077_v52, %v2077_v52 }
 0x4fb   : > { %v2419_v30 = vunpack.c.l.b16 %v2375_v27 }
 0x4fd   : > { %v2420_v32 = vpack.c.b16 %v2419_v30, %v2418_v24 }
 0x4ff   : > { %4156 = vmatmul.msk.bf16.vlgmr.msra.gmra.mxu3 %vm1426_vm1, %v2420_v32 }
 0x500   : > { %v2169_v34 = vpop.f32.mrf.mxu1 }
 0x501   : > { %v1952_v4 = vpop.xlane.xlu1 %1951  ;;  %v2379_v58 = vpack.c.bf16 %v2169_v34, %v2169_v34 }
 0x502   : > { %4967 = vrcp.f32 %v1952_v4 }
 0x503   : > { %v2475_v62 = vunpack.c.l.b16 %v2379_v58 }
 0x505   : > { %v2476_v37 = vpack.c.b16 %v2475_v62, %v2474_v36 }
 0x506   : > { %v2100_v20 = vpop.f32.mrf.mxu2 }
 0x507   : > { %4166 = vmatmul.msk.bf16.vlgmr.msra.gmra.mxu1 %vm1426_vm1, %v2476_v37  ;;  %v2376_v41 = vpack.c.bf16 %v2100_v20, %v2100_v20  ;;  %v4899_v37 = vld [vmem:[%s1007_s0] ss:$0 sm:$0xff] }
 0x508   : > { %v4968_v38 = vpop.eup %4967 }
 0x509   : > { %v1986_v40 = vmul.f32 %v4968_v38, %v6255_v44  ;;  %v2446_v35 = vunpack.c.l.b16 %v2376_v41 }
 0x50b   : > { %4145 = vmatmul.msk.f32.vlgmr.msrb.gmra.mxu0 %vm1811_vm2, %v1986_v40 }
 0x50c   : > { %2577 = vmatpush.bf16.msrb.mxu0 %v4617_v49 }
 0x50e   : > { %v2192_v51 = vpop.f32.mrf.mxu2 }
 0x50f   : > { %v2380_v53 = vpack.c.bf16 %v2192_v51, %v2192_v51 }
 0x510   : > { %v2123_v43 = vpop.f32.mrf.mxu3 }
 0x511   : > { %v2377_v47 = vpack.c.bf16 %v2123_v43, %v2123_v43  ;;  %v2502_v6 = vunpack.c.l.b16 %v2380_v53  ;;  %v4978_v53 = vld [vmem:[#allocation2 + $0x8] sm:$0xff] }
 0x513   : > { %v2447_v48 = vunpack.c.l.b16 %v2377_v47 }
 0x515   : > { %v2448_v42 = vpack.c.b16 %v2447_v48, %v2446_v35  ;;  %v4977_v35 = vld [vmem:[#allocation2] sm:$0xff] }
 0x517   : > { %4161 = vmatmul.msk.bf16.vlgmr.msra.gmra.mxu0 %vm1426_vm1, %v2448_v42 }
 0x54b   : > { %v2215_v44 = vpop.f32.mrf.mxu3 }
 0x54c   : > { %v2381_v54 = vpack.c.bf16 %v2215_v44, %v2215_v44 }
 0x54e   : > { %v2503_v45 = vunpack.c.l.b16 %v2381_v54 }
 0x550   : > { %v2504_v56 = vpack.c.b16 %v2503_v45, %v2502_v6 }
 0x552   : > { %4171 = vmatmul.msk.bf16.vlgmr.msra.gmra.mxu2 %vm1426_vm1, %v2504_v56 }
 0x556   : > { %v2284_v57 = vpop.f32.mrf.mxu2  ;;  %v2307_v46 = vpop.f32.mrf.mxu3 }
 0x557   : > { %v2238_v59 = vpop.f32.mrf.mxu0  ;;  %v2261_v60 = vpop.f32.mrf.mxu1  ;;  %v2384_v50 = vpack.c.bf16 %v2284_v57, %v2284_v57  ;;  %v2385_v61 = vpack.c.bf16 %v2307_v46, %v2307_v46 }
 0x558   : > { %v2382_v63 = vpack.c.bf16 %v2238_v59, %v2238_v59  ;;  %v2383_v0 = vpack.c.bf16 %v2261_v60, %v2261_v60 }
 0x559   : > { %v2558_v1 = vunpack.c.l.b16 %v2384_v50  ;;  %v2559_v2 = vunpack.c.l.b16 %v2385_v61 }
 0x55a   : > { %v2530_v5 = vunpack.c.l.b16 %v2382_v63  ;;  %v2531_v7 = vunpack.c.l.b16 %v2383_v0  ;;  %v4301_v63 = vld [vmem:[%s5889_s26 + $0xe0] sm:$0xf]  ;;  %v4649_v0 = vld [vmem:[%s5889_s26 + $0xec] sm:$0xf0] }
 0x55b   : > { %v2560_v9 = vpack.c.b16 %v2559_v2, %v2558_v1  ;;  %v4647_v1 = vld [vmem:[%s5889_s26 + $0xe4] sm:$0xf]  ;;  %v4302_v2 = vor.u32 %v4649_v0, %v4301_v63  ;;  %v4629_v63 = vld [vmem:[%s5889_s26 + $0x4c] sm:$0xf0] }
 0x55c   : > { %v2532_v10 = vpack.c.b16 %v2531_v7, %v2530_v5  ;;  %v4303_v5 = vld [vmem:[%s5889_s26 + $0xf0] sm:$0xf0]  ;;  %v4309_v7 = vld [vmem:[%s5889_s26 + $0xe8] sm:$0xf]  ;;  %v4627_v0 = vld [vmem:[%s5889_s26 + $0x44] sm:$0xf] }
 0x55d   : > { %4181 = vmatmul.msk.bf16.vlgmr.msrb.gmra.mxu0 %vm1426_vm1, %v2560_v9  ;;  %v4650_v9 = vld [vmem:[%s5889_s26 + $0xf4] sm:$0xf0]  ;;  %2891 = vmatpush.bf16.msrb.mxu2 %v4302_v2  ;;  %v4223_v2 = vld [vmem:[%s5889_s26 + $0x50] sm:$0xf0] }
 0x55e   : > { %4176 = vmatmul.msk.bf16.vlgmr.msrb.gmra.mxu3 %vm1426_vm1, %v2532_v10  ;;  %v4306_v10 = vor.u32 %v4647_v1, %v4303_v5  ;;  %v4310_v11 = vor.u32 %v4650_v9, %v4309_v7  ;;  %v4229_v5 = vld [vmem:[%s5889_s26 + $0x48] sm:$0xf]  ;;  %v4630_v7 = vld [vmem:[%s5889_s26 + $0x54] sm:$0xf0]  ;;  %v4226_v9 = vor.u32 %v4627_v0, %v4223_v2 }
 0x55f   : > { %v2353_v12 = vpop.f32.mrf.mxu1  ;;  %v2411_v18 = vpop.f32.mrf.mxu2 }
 0x560   : > { %v2387_v13 = vpack.c.bf16 %v2353_v12, %v2353_v12  ;;  %v4648_v12 = vld [vmem:[%s5889_s26 + $0xec] sm:$0xf]  ;;  %2905 = vmatpush.bf16.msra.mxu3 %v4306_v10  ;;  %2919 = vmatpush.bf16.msra.mxu0 %v4310_v11  ;;  %v4230_v10 = vor.u32 %v4630_v7, %v4229_v5 }
 0x561   : > { %v4628_v11 = vld [vmem:[%s5889_s26 + $0x4c] sm:$0xf] }
 0x562   : > { %v2587_v15 = vunpack.c.l.b16 %v2387_v13  ;;  %v4311_v13 = vld [vmem:[%s5889_s26 + $0xf8] sm:$0xf0] }
 0x567   : > { %v2413_v29 = vpop.f32.mrf.mxu2 }
 0x582   : > { %v2439_v21 = vpop.f32.mrf.mxu3 }
 0x583   : > { %v2612_v8 = vadd.f32 %v2439_v21, %v2411_v18  ;;  %v4287_v18 = vld [vmem:[%s5889_s26 + $0xd0] sm:$0xf0]  ;;  %v4293_v21 = vld [vmem:[%s5889_s26 + $0xc8] sm:$0xf] }
 0x584   : > { %v2495_v39 = vpop.f32.mrf.mxu1 }
 0x588   : > { %v2330_v26 = vpop.f32.mrf.mxu0 }
 0x589   : > { %v2386_v14 = vpack.c.bf16 %v2330_v26, %v2330_v26  ;;  %v4314_v26 = vor.u32 %v4648_v12, %v4311_v13  ;;  %v4231_v12 = vld [vmem:[%s5889_s26 + $0x58] sm:$0xf0] }
 0x58a   : > { %v2441_v23 = vpop.f32.mrf.mxu3  ;;  %v4234_v13 = vor.u32 %v4628_v11, %v4231_v12 }
 0x58b   : > { %v2586_v16 = vunpack.c.l.b16 %v2386_v14  ;;  %v2619_v31 = vadd.f32 %v2441_v23, %v2413_v29  ;;  %v4285_v14 = vld [vmem:[%s5889_s26 + $0xc0] sm:$0xf]  ;;  %2933 = vmatpush.bf16.msra.mxu1 %v4314_v26  ;;  %v4644_v23 = vld [vmem:[%s5889_s26 + $0xcc] sm:$0xf] }
 0x58c   : > { %v2497_v30 = vpop.f32.mrf.mxu1  ;;  %v4205_v26 = vld [vmem:[%s5889_s26 + $0x20] sm:$0xf] }
 0x58d   : > { %v2588_v17 = vpack.c.b16 %v2587_v15, %v2586_v16  ;;  %v4645_v15 = vld [vmem:[%s5889_s26 + $0xcc] sm:$0xf0]  ;;  %v4643_v16 = vld [vmem:[%s5889_s26 + $0xc4] sm:$0xf] }
 0x58e   : > { %v4290_v29 = vor.u32 %v4643_v16, %v4287_v18  ;;  %v4213_v18 = vld [vmem:[%s5889_s26 + $0x28] sm:$0xf] }
 0x58f   : > { %4186 = vmatmul.msk.bf16.vlgmr.msrb.gmra.mxu1 %vm1426_vm1, %v2588_v17  ;;  %v4286_v17 = vor.u32 %v4645_v15, %v4285_v14  ;;  %v4625_v14 = vld [vmem:[%s5889_s26 + $0x2c] sm:$0xf0]  ;;  %v4623_v15 = vld [vmem:[%s5889_s26 + $0x24] sm:$0xf] }
 0x590   : > { %2906 = vmatpush.bf16.msra.mxu3 %v4290_v29  ;;  %v4206_v16 = vor.u32 %v4625_v14, %v4205_v26  ;;  %v4901_v14 = vld [vmem:[%s842_s9] ss:$0 sm:$0xff]  ;;  %s6538_s9 = scalar_lea.vmem [#allocation18], %s5870_s3 }
 0x591   : > { %2892 = vmatpush.bf16.msrb.mxu2 %v4286_v17  ;;  %v4207_v17 = vld [vmem:[%s5889_s26 + $0x30] sm:$0xf0] }
 0x592   : > { %v4210_v29 = vor.u32 %v4623_v15, %v4207_v17 }
 0x594   : > { %v2467_v22 = vpop.f32.mrf.mxu0 }
 0x595   : > { %v2613_v55 = vadd.f32 %v2612_v8, %v2467_v22  ;;  %v4646_v22 = vld [vmem:[%s5889_s26 + $0xd4] sm:$0xf0]  ;;  %v4295_v8 = vld [vmem:[%s5889_s26 + $0xd8] sm:$0xf0] }
 0x597   : > { %v2614_v24 = vadd.f32 %v2613_v55, %v2495_v39  ;;  %v4294_v39 = vor.u32 %v4646_v22, %v4293_v21  ;;  %v4298_v55 = vor.u32 %v4644_v23, %v4295_v8  ;;  %v4626_v21 = vld [vmem:[%s5889_s26 + $0x34] sm:$0xf0]  ;;  %v4624_v23 = vld [vmem:[%s5889_s26 + $0x2c] sm:$0xf]  ;;  %v4215_v8 = vld [vmem:[%s5889_s26 + $0x38] sm:$0xf0] }
 0x599   : > { %2920 = vmatpush.bf16.msra.mxu0 %v4294_v39  ;;  %2934 = vmatpush.bf16.msra.mxu1 %v4298_v55  ;;  %v4214_v39 = vor.u32 %v4626_v21, %v4213_v18  ;;  %v4189_v55 = vld [vmem:[%s5889_s26] sm:$0xf]  ;;  %v4670_v18 = vld [vmem:[%s5895_s2 + $0x98] sm:$0xff] }
 0x59a   : > { %v4655_v21 = vld [vmem:[%s5895_s2 + $0x20] sm:$0xff] }
 0x59c   : > { %v2469_v25 = vpop.f32.mrf.mxu0 }
 0x59d   : > { %v2620_v33 = vadd.f32 %v2619_v31, %v2469_v25  ;;  %v4269_v25 = vld [vmem:[%s5889_s26 + $0xa0] sm:$0xf]  ;;  %v4277_v31 = vld [vmem:[%s5889_s26 + $0xa8] sm:$0xf] }
 0x59f   : > { %v2621_v36 = vadd.f32 %v2620_v33, %v2497_v30  ;;  %v4271_v30 = vld [vmem:[%s5889_s26 + $0xb0] sm:$0xf0] }
 0x5d5   : > { %v2523_v52 = vpop.f32.mrf.mxu2 }
 0x5d6   : > { %v2615_v32 = vadd.f32 %v2614_v24, %v2523_v52  ;;  %v4641_v52 = vld [vmem:[%s5889_s26 + $0xac] sm:$0xf0] }
 0x5d7   : > { %v4270_v24 = vor.u32 %v4641_v52, %v4269_v25  ;;  %v4218_v52 = vor.u32 %v4624_v23, %v4215_v8  ;;  %v4654_v23 = vld [vmem:[%s5895_s2 + $0x18] sm:$0xff] }
 0x5d8   : > { %v4662_v8 = vld [vmem:[%s5895_s2 + $0x58] sm:$0xff] }
 0x5d9   : > { %2893 = vmatpush.bf16.msrb.mxu2 %v4270_v24  ;;  %v4619_v24 = vld [vmem:[%s5889_s26 + $0x4] sm:$0xf] }
 0x5da   : > { %v2579_v4 = vpop.f32.mrf.mxu0 }
 0x5dd   : > { %v2525_v58 = vpop.f32.mrf.mxu2 }
 0x5de   : > { %v2622_v20 = vadd.f32 %v2621_v36, %v2525_v58  ;;  %v4279_v58 = vld [vmem:[%s5889_s26 + $0xb8] sm:$0xf0] }
 0x5e1   : > { %v2551_v27 = vpop.f32.mrf.mxu3 }
 0x5e2   : > { %v2616_v34 = vadd.f32 %v2615_v32, %v2551_v27  ;;  %v2581_v42 = vpop.f32.mrf.mxu0  ;;  %v4639_v27 = vld [vmem:[%s5889_s26 + $0xa4] sm:$0xf]  ;;  %v4642_v32 = vld [vmem:[%s5889_s26 + $0xb4] sm:$0xf0] }
 0x5e3   : > { %v4274_v33 = vor.u32 %v4639_v27, %v4271_v30  ;;  %v4621_v27 = vld [vmem:[%s5889_s26 + $0xc] sm:$0xf0] }
 0x5e4   : > { %v2617_v62 = vadd.f32 %v2616_v34, %v2579_v4  ;;  %v4278_v34 = vor.u32 %v4642_v32, %v4277_v31  ;;  %v4640_v4 = vld [vmem:[%s5889_s26 + $0xac] sm:$0xf]  ;;  %v4190_v30 = vor.u32 %v4621_v27, %v4189_v55  ;;  %v4191_v31 = vld [vmem:[%s5889_s26 + $0x10] sm:$0xf0]  ;;  %v4197_v32 = vld [vmem:[%s5889_s26 + $0x8] sm:$0xf] }
 0x5e5   : > { %v4282_v36 = vor.u32 %v4640_v4, %v4279_v58  ;;  %2907 = vmatpush.bf16.msra.mxu3 %v4274_v33  ;;  %v4622_v33 = vld [vmem:[%s5889_s26 + $0x14] sm:$0xf0]  ;;  %v4194_v4 = vor.u32 %v4619_v24, %v4191_v31  ;;  %v4668_v55 = vld [vmem:[%s5895_s2 + $0x88] sm:$0xff]  ;;  %v4661_v27 = vld [vmem:[%s5895_s2 + $0x50] sm:$0xff] }
 0x5e6   : > { %2921 = vmatpush.bf16.msra.mxu0 %v4278_v34  ;;  %v4198_v58 = vor.u32 %v4622_v33, %v4197_v32  ;;  %v4667_v24 = vld [vmem:[%s5895_s2 + $0x80] sm:$0xff]  ;;  %v4652_v31 = vld [vmem:[%s5895_s2 + $0x8] sm:$0xff] }
 0x5e7   : > { %2935 = vmatpush.bf16.msra.mxu1 %v4282_v36  ;;  %v4620_v36 = vld [vmem:[%s5889_s26 + $0xc] sm:$0xf]  ;;  %v4651_v33 = vld [vmem:[%s5895_s2] sm:$0xff] }
 0x5e8   : > { %v4660_v32 = vld [vmem:[%s5895_s2 + $0x48] sm:$0xff] }
 0x5e9   : > { %v2553_v38 = vpop.f32.mrf.mxu3 }
 0x5ea   : > { %v2623_v43 = vadd.f32 %v2622_v20, %v2553_v38  ;;  %v4635_v38 = vld [vmem:[%s5889_s26 + $0x84] sm:$0xf]  ;;  %v4255_v20 = vld [vmem:[%s5889_s26 + $0x90] sm:$0xf0] }
 0x5ec   : > { %v2624_v28 = vadd.f32 %v2623_v43, %v2581_v42  ;;  %v4638_v43 = vld [vmem:[%s5889_s26 + $0x94] sm:$0xf0]  ;;  %v4263_v42 = vld [vmem:[%s5889_s26 + $0x98] sm:$0xf0] }
 0x60c   : > { %v2607_v40 = vpop.f32.mrf.mxu1 }
 0x60d   : > { %v2618_v41 = vadd.f32 %v2617_v62, %v2607_v40  ;;  %v4253_v62 = vld [vmem:[%s5889_s26 + $0x80] sm:$0xf] }
 0x60f   : > { %v2630_v47 = vadd.f32 %v4899_v37, %v2618_v41  ;;  %v4261_v41 = vld [vmem:[%s5889_s26 + $0x88] sm:$0xf] }
 0x611   : > { %v2632_v48 = vadd.f32 %v4977_v35, %v2630_v47  ;;  %v4258_v47 = vor.u32 %v4635_v38, %v4255_v20  ;;  %v4262_v35 = vor.u32 %v4638_v43, %v4261_v41  ;;  %v4682_v20 = vld [vmem:[%s5895_s2 + $0xf8] sm:$0xff] }
 0x612   : > { %v4658_v43 = vld [vmem:[%s5895_s2 + $0x38] sm:$0xff] }
 0x613   : > { %2636 = vadd.xlane.f32.xlu0 %v2632_v48  ;;  %2908 = vmatpush.bf16.msra.mxu3 %v4258_v47  ;;  %v4666_v47 = vld [vmem:[%s5895_s2 + $0x78] sm:$0xff] }
 0x614   : > { %v2609_v19 = vpop.f32.mrf.mxu1  ;;  %2922 = vmatpush.bf16.msra.mxu0 %v4262_v35  ;;  %v4673_v35 = vld [vmem:[%s5895_s2 + $0xb0] sm:$0xff] }
 0x615   : > { %v2625_v49 = vadd.f32 %v2624_v28, %v2609_v19  ;;  %v4237_v19 = vld [vmem:[%s5889_s26 + $0x60] sm:$0xf] }
 0x617   : > { %v2631_v51 = vadd.f32 %v4899_v37, %v2625_v49  ;;  %v4637_v37 = vld [vmem:[%s5889_s26 + $0x8c] sm:$0xf0] }
 0x618   : > { %v4254_v40 = vor.u32 %v4637_v37, %v4253_v62  ;;  %v4633_v49 = vld [vmem:[%s5889_s26 + $0x6c] sm:$0xf0]  ;;  %v4199_v62 = vld [vmem:[%s5889_s26 + $0x18] sm:$0xf0] }
 0x619   : > { %v2633_v44 = vadd.f32 %v4978_v53, %v2631_v51  ;;  %v4631_v51 = vld [vmem:[%s5889_s26 + $0x64] sm:$0xf]  ;;  %v4238_v53 = vor.u32 %v4633_v49, %v4237_v19  ;;  %v4202_v37 = vor.u32 %v4620_v36, %v4199_v62  ;;  %v4657_v19 = vld [vmem:[%s5895_s2 + $0x30] sm:$0xff] }
 0x61a   : > { %2894 = vmatpush.bf16.msrb.mxu2 %v4254_v40  ;;  %v4674_v40 = vld [vmem:[%s5895_s2 + $0xb8] sm:$0xff]  ;;  %v4665_v49 = vld [vmem:[%s5895_s2 + $0x70] sm:$0xff] }
 0x61b   : > { %2638 = vadd.xlane.f32.xlu1 %v2633_v44 }
 0x61e   : > { %2895 = vmatpush.bf16.msrb.mxu2 %v4238_v53 }
 0x686   : > { %v2637_v54 = vpop.xlane.xlu0 %2636 }
 0x687   : > { %v2640_v6 = vmul.f32 0.010416667, %v2637_v54  ;;  %v4245_v54 = vld [vmem:[%s5889_s26 + $0x68] sm:$0xf] }
 0x689   : > { %v2642_v45 = vsub.f32 %v2632_v48, %v2640_v6  ;;  %v4636_v48 = vld [vmem:[%s5889_s26 + $0x8c] sm:$0xf]  ;;  %v4634_v6 = vld [vmem:[%s5889_s26 + $0x74] sm:$0xf0] }
 0x68a   : > { %v4266_v28 = vor.u32 %v4636_v48, %v4263_v42  ;;  %v4681_v48 = vld [vmem:[%s5895_s2 + $0xf0] sm:$0xff] }
 0x68b   : > { %v6297_v56 = vmul.f32 %v5926_v3, %v2642_v45 }
 0x68c   : > { %2936 = vmatpush.bf16.msra.mxu1 %v4266_v28 }
 0x68d   : > { %v2646_v57 = vmul.f32 %v6297_v56, %v6297_v56 }
 0x68e   : > { %v2639_v46 = vpop.xlane.xlu1 %2638 }
 0x68f   : > { %v2641_v59 = vmul.f32 0.010416667, %v2639_v46  ;;  %2648 = vadd.xlane.f32.xlu2 %v2646_v57  ;;  %v4246_v57 = vor.u32 %v4634_v6, %v4245_v54  ;;  %v4632_v46 = vld [vmem:[%s5889_s26 + $0x6c] sm:$0xf] }
 0x690   : > { %v4680_v54 = vld [vmem:[%s5895_s2 + $0xe8] sm:$0xff] }
 0x691   : > { %v2643_v60 = vsub.f32 %v2633_v44, %v2641_v59  ;;  %v4239_v44 = vld [vmem:[%s5889_s26 + $0x70] sm:$0xf0]  ;;  %v4247_v59 = vld [vmem:[%s5889_s26 + $0x78] sm:$0xf0]  ;;  %2923 = vmatpush.bf16.msra.mxu0 %v4246_v57  ;;  %v4656_v6 = vld [vmem:[%s5895_s2 + $0x28] sm:$0xff] }
 0x692   : > { %v4242_v45 = vor.u32 %v4631_v51, %v4239_v44  ;;  %v4672_v44 = vld [vmem:[%s5895_s2 + $0xa8] sm:$0xff] }
 0x693   : > { %v6302_v50 = vmul.f32 %v5926_v3, %v2643_v60  ;;  %v4250_v60 = vor.u32 %v4632_v46, %v4247_v59  ;;  %v4671_v59 = vld [vmem:[%s5895_s2 + $0xa0] sm:$0xff] }
 0x694   : > { %2909 = vmatpush.bf16.msra.mxu3 %v4242_v45  ;;  %v4664_v45 = vld [vmem:[%s5895_s2 + $0x68] sm:$0xff] }
 0x695   : > { %v2647_v61 = vmul.f32 %v6302_v50, %v6302_v50  ;;  %2937 = vmatpush.bf16.msra.mxu1 %v4250_v60  ;;  %2924 = vmatpush.bf16.msra.mxu0 %v4230_v10  ;;  %v4679_v60 = vld [vmem:[%s5895_s2 + $0xe0] sm:$0xff] }
 0x697   : > { %2650 = vadd.xlane.f32.xlu1 %v2647_v61  ;;  %v4221_v61 = vld [vmem:[%s5889_s26 + $0x40] sm:$0xf]  ;;  %s6539_s26 = sld [smem:[#allocation36_spill]] }
 0x698   : > { %v4222_v1 = vor.u32 %v4629_v63, %v4221_v61  ;;  %2910 = vmatpush.bf16.msra.mxu3 %v4226_v9  ;;  %v4900_v9 = vld [vmem:[%s833_s29] ss:$0 sm:$0xff]  ;;  %s6537_s29 = scalar_lea.vmem [#allocation17], %s5870_s3 }
 0x699   : > { %2938 = vmatpush.bf16.msra.mxu1 %v4234_v13  ;;  %2925 = vmatpush.bf16.msra.mxu0 %v4214_v39  ;;  %v4677_v39 = vld [vmem:[%s5895_s2 + $0xd0] sm:$0xff] }
 0x69a   : > { %2896 = vmatpush.bf16.msrb.mxu2 %v4222_v1 }
 0x69c   : > { %2911 = vmatpush.bf16.msra.mxu3 %v4210_v29  ;;  %v4669_v29 = vld [vmem:[%s5895_s2 + $0x90] sm:$0xff] }
 0x69d   : > { %2939 = vmatpush.bf16.msra.mxu1 %v4218_v52  ;;  %2926 = vmatpush.bf16.msra.mxu0 %v4198_v58  ;;  %v4653_v52 = vld [vmem:[%s5895_s2 + $0x10] sm:$0xff]  ;;  %p4443_p5 = scmp.ne.s32.totalorder %s6539_s26, 3 }
 0x69e   : > { %2897 = vmatpush.bf16.msrb.mxu2 %v4206_v16 }
 0x6a0   : > { %2912 = vmatpush.bf16.msra.mxu3 %v4194_v4  ;;  %v2721_v4 = vld [vmem:[%s5936_s30] sm:$0xf] }
 0x6a1   : > { %2940 = vmatpush.bf16.msra.mxu1 %v4202_v37  ;;  %3247 = vmatpush.bf16.msrb.mxu0 %v4674_v40  ;;  %v2725_v62 = vperm.slane %v2721_v4, 2  ;;  %v2726_v37 = vperm.slane %v2721_v4, 3 }
 0x6a2   : > { %2898 = vmatpush.bf16.msrb.mxu2 %v4190_v30  ;;  %v4675_v30 = vld [vmem:[%s5895_s2 + $0xc0] sm:$0xff] }
 0x6a4   : > { %3233 = vmatpush.bf16.msrb.mxu3 %v4666_v47  ;;  %v2724_v47 = vperm.slane %v2721_v4, 1 }
 0x6a5   : > { %3261 = vmatpush.bf16.msrb.mxu1 %v4682_v20  ;;  %3248 = vmatpush.bf16.msrb.mxu0 %v4673_v35 }
 0x6a6   : > { %3219 = vmatpush.bf16.msra.mxu2 %v4658_v43  ;;  %v2723_v43 = vperm.slane %v2721_v4, 0 }
 0x6a8   : > { %3234 = vmatpush.bf16.msrb.mxu3 %v4665_v49 }
 0x6a9   : > { %3262 = vmatpush.bf16.msrb.mxu1 %v4681_v48  ;;  %3249 = vmatpush.bf16.msrb.mxu0 %v4672_v44 }
 0x6aa   : > { %3220 = vmatpush.bf16.msra.mxu2 %v4657_v19 }
 0x6ac   : > { %3235 = vmatpush.bf16.msrb.mxu3 %v4664_v45 }
 0x6ad   : > { %3263 = vmatpush.bf16.msrb.mxu1 %v4680_v54  ;;  %3250 = vmatpush.bf16.msrb.mxu0 %v4671_v59 }
 0x6ae   : > { %3221 = vmatpush.bf16.msra.mxu2 %v4656_v6 }
 0x6b1   : > { %3264 = vmatpush.bf16.msrb.mxu1 %v4679_v60  ;;  %3251 = vmatpush.bf16.msrb.mxu0 %v4670_v18 }
 0x6b2   : > { %3222 = vmatpush.bf16.msra.mxu2 %v4655_v21 }
 0x6b5   : > { %3252 = vmatpush.bf16.msrb.mxu0 %v4669_v29 }
 0x6b6   : > { %3223 = vmatpush.bf16.msra.mxu2 %v4654_v23 }
 0x6b9   : > { %3253 = vmatpush.bf16.msrb.mxu0 %v4668_v55 }
 0x6ba   : > { %3224 = vmatpush.bf16.msra.mxu2 %v4653_v52 }
 0x6bd   : > { %3254 = vmatpush.bf16.msrb.mxu0 %v4667_v24 }
 0x6be   : > { %3225 = vmatpush.bf16.msra.mxu2 %v4652_v31 }
 0x6c2   : > { %3226 = vmatpush.bf16.msra.mxu2 %v4651_v33 }
 0x702   : > { %v2649_v22 = vpop.xlane.xlu2 %2648 }
 0x703   : > { %v2652_v25 = vmul.f32 0.010416667, %v2649_v22  ;;  %v4663_v22 = vld [vmem:[%s5895_s2 + $0x60] sm:$0xff] }
 0x704   : > { %3236 = vmatpush.bf16.msrb.mxu3 %v4663_v22 }
 0x705   : > { %v2654_v34 = vadd.f32 1e-05, %v2652_v25  ;;  %v4676_v25 = vld [vmem:[%s5895_s2 + $0xc8] sm:$0xff] }
 0x707   : > { %4969 = vrsqrt.f32 %v2654_v34  ;;  %vm2662_vm4 = vweird.f32 %v2654_v34 }
 0x708   : > { %3237 = vmatpush.bf16.msrb.mxu3 %v4662_v8 }
 0x70a   : > { %v2651_v38 = vpop.xlane.xlu1 %2650 }
 0x70b   : > { %v2653_v41 = vmul.f32 0.010416667, %v2651_v38 }
 0x70c   : > { %3238 = vmatpush.bf16.msrb.mxu3 %v4661_v27 }
 0x70d   : > { %v4970_v42 = vpop.eup %4969  ;;  %v2655_v28 = vadd.f32 1e-05, %v2653_v41 }
 0x70e   : > { %v2657_v51 = vmul.f32 %v4970_v42, %v2654_v34  ;;  %vm2663_vm3 = vweird.f32 %v4970_v42  ;;  %v4659_v34 = vld [vmem:[%s5895_s2 + $0x40] sm:$0xff] }
 0x70f   : > { %4971 = vrsqrt.f32 %v2655_v28  ;;  %vm2664_vm5 = vmor %vm2662_vm4, %vm2663_vm3  ;;  %vm2672_vm7 = vweird.f32 %v2655_v28 }
 0x710   : > { %v2658_v53 = vmul.f32 %v4970_v42, %v2657_v51  ;;  %3239 = vmatpush.bf16.msrb.mxu3 %v4660_v32 }
 0x712   : > { %v2659_v57 = vmul.f32 0.5, %v2658_v53 }
 0x714   : > { %v2660_v46 = vsub.f32 1.5, %v2659_v57  ;;  %3240 = vmatpush.bf16.msrb.mxu3 %v4659_v34 }
 0x715   : > { %v4972_v61 = vpop.eup %4971 }
 0x716   : > { %v2661_v63 = vmul.f32 %v4970_v42, %v2660_v46  ;;  %v2667_v0 = vmul.f32 %v4972_v61, %v2655_v28  ;;  %vm2673_vm6 = vweird.f32 %v4972_v61 }
 0x717   : > { %vm2674_vm8 = vmor %vm2672_vm7, %vm2673_vm6 }
 0x718   : > { %v2668_v1 = vmul.f32 %v4972_v61, %v2667_v0  ;;  %v2665_v2 = vsel %vm2664_vm5, %v4970_v42, %v2661_v63 }
 0x719   : > { %v2676_v10 = vmul.f32 %v2665_v2, %v6297_v56 }
 0x71a   : > { %v2669_v5 = vmul.f32 0.5, %v2668_v1 }
 0x71b   : > { %v2681_v13 = vmul.f32 %v4900_v9, %v2676_v10 }
 0x71c   : > { %v2670_v7 = vsub.f32 1.5, %v2669_v5 }
 0x71d   : > { %v6390_v16 = vadd.f32 %v4901_v14, %v2681_v13 }
 0x71e   : > { %v2671_v11 = vmul.f32 %v4972_v61, %v2670_v7  ;;  %v4902_v7 = vld [vmem:[%s871_s14] ss:$0 sm:$0xff]  ;;  %s6540_s14 = sld [smem:[#allocation52_spill]] (!%p4443_p5) }
 0x720   : > { %v2675_v12 = vsel %vm2674_vm8, %v4972_v61, %v2671_v11 }
 0x721   : > { %v2677_v26 = vmul.f32 %v2675_v12, %v6302_v50  ;;  %v4678_v50 = vld [vmem:[%s5895_s2 + $0xd8] sm:$0xff] }
 0x722   : > { %3265 = vmatpush.bf16.msrb.mxu1 %v4678_v50 }
 0x723   : > { %v2682_v15 = vmul.f32 %v4900_v9, %v2677_v26 }
 0x725   : > { %v6392_v17 = vadd.f32 %v4901_v14, %v2682_v15 }
 0x726   : > { %3266 = vmatpush.bf16.msrb.mxu1 %v4677_v39 }
 0x727   : > { %v2720_v56 = vpack.c.bf16 %v6392_v17, %v6390_v16 }
 0x729   : > { %2899 = vmatmul.bf16.vlgmr.msrb.gmra.mxu2 %v2720_v56  ;;  %2913 = vmatmul.bf16.vlgmr.msra.gmra.mxu3 %v2720_v56 }
 0x72a   : > { %2927 = vmatmul.bf16.vlgmr.msra.gmra.mxu0 %v2720_v56  ;;  %2941 = vmatmul.bf16.vlgmr.msra.gmra.mxu1 %v2720_v56 }
 0x72b   : > { %3267 = vmatpush.bf16.msrb.mxu1 %v4676_v25 }
 0x72f   : > { %3268 = vmatpush.bf16.msrb.mxu1 %v4675_v30 }
 0x7a7   : > { %v2928_v58 = vpop.f32.mrf.mxu0  ;;  %v2942_v36 = vpop.f32.mrf.mxu1 }
 0x7a8   : > { %v2929_v20 = vadd.f32 %v2928_v58, %v2725_v62  ;;  %v2943_v41 = vadd.f32 %v2942_v36, %v2726_v37 }
 0x7aa   : > { %v2949_v19 = vmax.f32 %v2929_v20, 0.0  ;;  %v2950_v49 = vmax.f32 %v2943_v41, 0.0 }
 0x7ac   : > { %v2900_v38 = vpop.f32.mrf.mxu2  ;;  %v2914_v40 = vpop.f32.mrf.mxu3 }
 0x7ad   : > { %v2901_v44 = vadd.f32 %v2900_v38, %v2723_v43  ;;  %v2915_v54 = vadd.f32 %v2914_v40, %v2724_v47 }
 0x7af   : > { %v2930_v35 = vpop.f32.mrf.mxu0  ;;  %v2944_v48 = vpop.f32.mrf.mxu1  ;;  %v2947_v61 = vmax.f32 %v2901_v44, 0.0  ;;  %v2948_v63 = vmax.f32 %v2915_v54, 0.0 }
 0x7b0   : > { %v2931_v42 = vadd.f32 %v2930_v35, %v2725_v62  ;;  %v2945_v28 = vadd.f32 %v2944_v48, %v2726_v37  ;;  %v4903_v48 = vld [vmem:[%s6537_s29] ss:$0 sm:$0xff] }
 0x7b2   : > { %v2953_v51 = vmax.f32 %v2931_v42, 0.0  ;;  %v2954_v53 = vmax.f32 %v2945_v28, 0.0 }
 0x7b4   : > { %v3021_v6 = vpack.c.bf16 %v2953_v51, %v2949_v19  ;;  %v3022_v45 = vpack.c.bf16 %v2954_v53, %v2950_v49  ;;  %v2902_v57 = vpop.f32.mrf.mxu2  ;;  %v2916_v46 = vpop.f32.mrf.mxu3  ;;  %v4904_v19 = vld [vmem:[%s6538_s9] ss:$0 sm:$0xff] }
 0x7b5   : > { %v2903_v59 = vadd.f32 %v2902_v57, %v2723_v43  ;;  %v2917_v60 = vadd.f32 %v2916_v46, %v2724_v47 }
 0x7b6   : > { %3255 = vmatmul.bf16.vlgmr.msrb.gmra.mxu0 %v3021_v6  ;;  %3269 = vmatmul.bf16.vlgmr.msrb.gmra.mxu1 %v3022_v45 }
 0x7b7   : > { %v2951_v0 = vmax.f32 %v2903_v59, 0.0  ;;  %v2952_v1 = vmax.f32 %v2917_v60, 0.0 }
 0x7b9   : > { %v3019_v2 = vpack.c.bf16 %v2951_v0, %v2947_v61  ;;  %v3020_v5 = vpack.c.bf16 %v2952_v1, %v2948_v63 }
 0x7bb   : > { %3227 = vmatmul.bf16.vlgmr.msra.gmra.mxu2 %v3019_v2  ;;  %3241 = vmatmul.bf16.vlgmr.msrb.gmra.mxu3 %v3020_v5 }
 0x833   : > { %v3256_v12 = vpop.f32.mrf.mxu0  ;;  %v3270_v26 = vpop.f32.mrf.mxu1 }
 0x83b   : > { %v3258_v29 = vpop.f32.mrf.mxu0  ;;  %v3272_v23 = vpop.f32.mrf.mxu1 }
 0x83e   : > { %v3228_v9 = vpop.f32.mrf.mxu2  ;;  %v3242_v10 = vpop.f32.mrf.mxu3 }
 0x83f   : > { %v3229_v11 = vadd.f32 %v4902_v7, %v3228_v9 }
 0x841   : > { %v3243_v13 = vadd.f32 %v3242_v10, %v3229_v11 }
 0x843   : > { %v3257_v14 = vadd.f32 %v3256_v12, %v3243_v13 }
 0x845   : > { %v3271_v15 = vadd.f32 %v3270_v26, %v3257_v14 }
 0x846   : > { %v3230_v56 = vpop.f32.mrf.mxu2  ;;  %v3244_v21 = vpop.f32.mrf.mxu3 }
 0x847   : > { %v3231_v18 = vadd.f32 %v4902_v7, %v3230_v56  ;;  %v3275_v50 = vadd.f32 %v3271_v15, %v6390_v16 }
 0x849   : > { %v3245_v22 = vadd.f32 %v3244_v21, %v3231_v18  ;;  %3279 = vadd.xlane.f32.xlu1 %v3275_v50 }
 0x84b   : > { %v3259_v39 = vadd.f32 %v3258_v29, %v3245_v22 }
 0x84d   : > { %v3273_v8 = vadd.f32 %v3272_v23, %v3259_v39 }
 0x84f   : > { %v3276_v55 = vadd.f32 %v3273_v8, %v6392_v17 }
 0x851   : > { %3281 = vadd.xlane.f32.xlu1 %v3276_v55 }
 0x8bc   : > { %v3280_v25 = vpop.xlane.xlu1 %3279 }
 0x8bd   : > { %v3283_v52 = vmul.f32 0.010416667, %v3280_v25 }
 0x8bf   : > { %v3285_v27 = vsub.f32 %v3275_v50, %v3283_v52 }
 0x8c1   : > { %v3287_v24 = vmul.f32 %v5926_v3, %v3285_v27 }
 0x8c3   : > { %v3289_v30 = vmul.f32 %v3287_v24, %v3287_v24 }
 0x8c4   : > { %v3282_v31 = vpop.xlane.xlu1 %3281 }
 0x8c5   : > { %v3284_v32 = vmul.f32 0.010416667, %v3282_v31  ;;  %3291 = vadd.xlane.f32.xlu1 %v3289_v30 }
 0x8c7   : > { %v3286_v16 = vsub.f32 %v3276_v55, %v3284_v32 }
 0x8c9   : > { %v3288_v33 = vmul.f32 %v5926_v3, %v3286_v16 }
 0x8cb   : > { %v3290_v34 = vmul.f32 %v3288_v33, %v3288_v33 }
 0x8cd   : > { %3293 = vadd.xlane.f32.xlu1 %v3290_v34 }
 0x938   : > { %v3292_v4 = vpop.xlane.xlu1 %3291 }
 0x939   : > { %v3295_v58 = vmul.f32 0.010416667, %v3292_v4 }
 0x93b   : > { %v3297_v36 = vadd.f32 1e-05, %v3295_v58 }
 0x93d   : > { %4973 = vrsqrt.f32 %v3297_v36  ;;  %vm3305_vm10 = vweird.f32 %v3297_v36 }
 0x940   : > { %v3294_v17 = vpop.xlane.xlu1 %3293 }
 0x941   : > { %v3296_v62 = vmul.f32 0.010416667, %v3294_v17 }
 0x943   : > { %v4974_v37 = vpop.eup %4973  ;;  %v3298_v38 = vadd.f32 1e-05, %v3296_v62 }
 0x944   : > { %v3300_v40 = vmul.f32 %v4974_v37, %v3297_v36  ;;  %vm3306_vm9 = vweird.f32 %v4974_v37 }
 0x945   : > { %4975 = vrsqrt.f32 %v3298_v38  ;;  %vm3307_vm11 = vmor %vm3305_vm10, %vm3306_vm9  ;;  %vm3315_vm13 = vweird.f32 %v3298_v38 }
 0x946   : > { %v3301_v20 = vmul.f32 %v4974_v37, %v3300_v40 }
 0x948   : > { %v3302_v41 = vmul.f32 0.5, %v3301_v20 }
 0x94a   : > { %v3303_v43 = vsub.f32 1.5, %v3302_v41 }
 0x94b   : > { %v4976_v47 = vpop.eup %4975 }
 0x94c   : > { %v3304_v3 = vmul.f32 %v4974_v37, %v3303_v43  ;;  %v3310_v35 = vmul.f32 %v4976_v47, %v3298_v38  ;;  %vm3316_vm12 = vweird.f32 %v4976_v47 }
 0x94d   : > { %vm3317_vm14 = vmor %vm3315_vm13, %vm3316_vm12 }
 0x94e   : > { %v3308_v42 = vsel %vm3307_vm11, %v4974_v37, %v3304_v3  ;;  %v3311_v28 = vmul.f32 %v4976_v47, %v3310_v35 }
 0x94f   : > { %v3319_v49 = vmul.f32 %v3308_v42, %v3287_v24 }
 0x950   : > { %v3312_v51 = vmul.f32 0.5, %v3311_v28 }
 0x951   : > { %v3324_v53 = vmul.f32 %v4903_v48, %v3319_v49 }
 0x952   : > { %v3313_v44 = vsub.f32 1.5, %v3312_v51 }
 0x953   : > { %v3329_v54 = vadd.f32 %v4904_v19, %v3324_v53 }
 0x954   : > { %v3314_v6 = vmul.f32 %v4976_v47, %v3313_v44 }
 0x955   : > { %3331 = vst [vmem:[#allocation2] sm:$0xff] %v3329_v54 }
 0x956   : > { %v3318_v45 = vsel %vm3317_vm14, %v4976_v47, %v3314_v6 }
 0x957   : > { %v3320_v57 = vmul.f32 %v3318_v45, %v3288_v33 }
 0x959   : > { %v3325_v46 = vmul.f32 %v4903_v48, %v3320_v57  ;;  %3336 = sbr.rel (%p4443_p5) target bundleno = 2705 (0xa91), region = 156 }
 0x95b   : > { %v3330_v59 = vadd.f32 %v4904_v19, %v3325_v46 }
 0x95d   : > { %3332 = vst [vmem:[#allocation2 + $0x8] sm:$0xff] %v3330_v59 }
 0x95e   : > { %v4502_v60 = vld [vmem:[#allocation20 + $0x70] sm:$0xf]  ;;  %v4698_v61 = vld [vmem:[#allocation20 + $0x74] sm:$0xf0]  ;;  %v4697_v63 = vld [vmem:[#allocation20 + $0x74] sm:$0xf] }
 0x95f   : > { %v4503_v0 = vor.u32 %v4698_v61, %v4502_v60  ;;  %v4504_v1 = vld [vmem:[#allocation20 + $0x78] sm:$0xf0]  ;;  %v4494_v2 = vld [vmem:[#allocation20 + $0x60] sm:$0xf]  ;;  %v4696_v5 = vld [vmem:[#allocation20 + $0x64] sm:$0xf0] }
 0x960   : > { %v4507_v7 = vor.u32 %v4697_v63, %v4504_v1  ;;  %v4695_v9 = vld [vmem:[#allocation20 + $0x64] sm:$0xf]  ;;  %v4496_v10 = vld [vmem:[#allocation20 + $0x68] sm:$0xf0]  ;;  %v4495_v11 = vor.u32 %v4696_v5, %v4494_v2  ;;  %v4486_v13 = vld [vmem:[#allocation20 + $0x50] sm:$0xf] }
 0x961   : > { %3470 = vmatpush.bf16.msra.mxu0 %v4503_v0  ;;  %v4499_v12 = vor.u32 %v4695_v9, %v4496_v10  ;;  %v4694_v26 = vld [vmem:[#allocation20 + $0x54] sm:$0xf0]  ;;  %v4693_v14 = vld [vmem:[#allocation20 + $0x54] sm:$0xf]  ;;  %v4488_v15 = vld [vmem:[#allocation20 + $0x58] sm:$0xf0] }
 0x962   : > { %3483 = vmatpush.bf16.msra.mxu1 %v4507_v7  ;;  %v4487_v56 = vor.u32 %v4694_v26, %v4486_v13  ;;  %v4491_v18 = vor.u32 %v4693_v14, %v4488_v15  ;;  %v4478_v50 = vld [vmem:[#allocation20 + $0x40] sm:$0xf]  ;;  %v4692_v21 = vld [vmem:[#allocation20 + $0x44] sm:$0xf0]  ;;  %v4691_v22 = vld [vmem:[#allocation20 + $0x44] sm:$0xf] }
 0x963   : > { %v4480_v29 = vld [vmem:[#allocation20 + $0x48] sm:$0xf0]  ;;  %v3337_v39 = vrot.slane %v3329_v54, 4  ;;  %v3343_v23 = vrot.slane %v3330_v59, 4  ;;  %v4479_v8 = vor.u32 %v4692_v21, %v4478_v50  ;;  %v4706_v55 = vld [vmem:[#allocation21 + $0x38] sm:$0xff]  ;;  %v5488_v16 = vmov 8.0  }
 0x964   : > { %v4714_v25 = vld [vmem:[#allocation21 + $0x78] sm:$0xff]  ;;  %v4483_v52 = vor.u32 %v4691_v22, %v4480_v29  ;;  %v4470_v27 = vld [vmem:[#allocation20 + $0x30] sm:$0xf]  ;;  %v4689_v30 = vld [vmem:[#allocation20 + $0x34] sm:$0xf]  ;;  %4980 = vrcp.f32 %v5488_v16  ;;  %3632 = vmatpush.bf16.msra.mxu2 %v4706_v55  ;;  %vm3386_vm0 = vcmask 1041409  }
 0x965   : > { %3471 = vmatpush.bf16.msra.mxu0 %v4495_v11  ;;  %v4690_v24 = vld [vmem:[#allocation20 + $0x34] sm:$0xf0]  ;;  %v3338_v31 = vadd.f32 %v3337_v39, %v3329_v54  ;;  %v3344_v32 = vadd.f32 %v3343_v23, %v3330_v59  ;;  %v4472_v33 = vld [vmem:[#allocation20 + $0x38] sm:$0xf0]  ;;  %3645 = vmatpush.bf16.msra.mxu3 %v4714_v25  ;;  %v4705_v34 = vld [vmem:[#allocation21 + $0x30] sm:$0xff] }
 0x966   : > { %3484 = vmatpush.bf16.msra.mxu1 %v4499_v12  ;;  %v4713_v4 = vld [vmem:[#allocation21 + $0x70] sm:$0xff]  ;;  %v4471_v17 = vor.u32 %v4690_v24, %v4470_v27  ;;  %v4475_v62 = vor.u32 %v4689_v30, %v4472_v33  ;;  %v4462_v37 = vld [vmem:[#allocation20 + $0x20] sm:$0xf]  ;;  %v4688_v38 = vld [vmem:[#allocation20 + $0x24] sm:$0xf0] }
 0x967   : > { %v3339_v58 = vrot.slane %v3338_v31, 2  ;;  %v3345_v36 = vrot.slane %v3344_v32, 2  ;;  %v4687_v40 = vld [vmem:[#allocation20 + $0x24] sm:$0xf]  ;;  %v4464_v43 = vld [vmem:[#allocation20 + $0x28] sm:$0xf0]  ;;  %v4463_v48 = vor.u32 %v4688_v38, %v4462_v37 }
 0x968   : > { %3633 = vmatpush.bf16.msra.mxu2 %v4705_v34  ;;  %v4704_v47 = vld [vmem:[#allocation21 + $0x28] sm:$0xff]  ;;  %v4454_v42 = vld [vmem:[#allocation20 + $0x10] sm:$0xf]  ;;  %v4467_v19 = vor.u32 %v4687_v40, %v4464_v43  ;;  %v4686_v49 = vld [vmem:[#allocation20 + $0x14] sm:$0xf0] }
 0x969   : > { %3472 = vmatpush.bf16.msra.mxu0 %v4487_v56  ;;  %v3340_v20 = vadd.f32 %v3339_v58, %v3338_v31  ;;  %v3346_v41 = vadd.f32 %v3345_v36, %v3344_v32  ;;  %3646 = vmatpush.bf16.msra.mxu3 %v4713_v4  ;;  %v4712_v3 = vld [vmem:[#allocation21 + $0x68] sm:$0xff]  ;;  %v4685_v51 = vld [vmem:[#allocation20 + $0x14] sm:$0xf]  ;;  %v4456_v54 = vld [vmem:[#allocation20 + $0x18] sm:$0xf0]  ;;  %v4455_v46 = vor.u32 %v4686_v49, %v4454_v42 }
 0x96a   : > { %3485 = vmatpush.bf16.msra.mxu1 %v4491_v18  ;;  %v4981_v35 = vpop.eup %4980  ;;  %v4703_v45 = vld [vmem:[#allocation21 + $0x20] sm:$0xff]  ;;  %v4459_v60 = vor.u32 %v4685_v51, %v4456_v54  ;;  %v4684_v63 = vld [vmem:[#allocation20 + $0x4] sm:$0xf0]  ;;  %v4448_v5 = vld [vmem:[#allocation20 + $0x8] sm:$0xf0] }
 0x96b   : > { %v3350_v28 = vmul.f32 8.0, %v4981_v35  ;;  %v3341_v53 = vrot.slane %v3340_v20, 1  ;;  %v3347_v44 = vrot.slane %v3346_v41, 1  ;;  %v4711_v57 = vld [vmem:[#allocation21 + $0x60] sm:$0xff]  ;;  %vm3354_vm15 = vweird.f32 %v4981_v35  ;;  %v4702_v9 = vld [vmem:[#allocation21 + $0x18] sm:$0xff]  ;;  %v4701_v15 = vld [vmem:[#allocation21 + $0x10] sm:$0xff] }
 0x96c   : > { %3634 = vmatpush.bf16.msra.mxu2 %v4704_v47  ;;  %v4446_v61 = vld [vmem:[#allocation20] sm:$0xf]  ;;  %v4683_v0 = vld [vmem:[#allocation20 + $0x4] sm:$0xf]  ;;  %v4710_v10 = vld [vmem:[#allocation21 + $0x58] sm:$0xff] }
 0x96d   : > { %3473 = vmatpush.bf16.msra.mxu0 %v4479_v8  ;;  %v3351_v6 = vsub.f32 1.0, %v3350_v28  ;;  %3647 = vmatpush.bf16.msra.mxu3 %v4712_v3  ;;  %v3342_v1 = vadd.f32 %v3341_v53, %v3340_v20  ;;  %v3348_v2 = vadd.f32 %v3347_v44, %v3346_v41  ;;  %v4447_v11 = vor.u32 %v4684_v63, %v4446_v61  ;;  %v4709_v56 = vld [vmem:[#allocation21 + $0x50] sm:$0xff]  ;;  %v4700_v23 = vld [vmem:[#allocation21 + $0x8] sm:$0xff]  ;;  %v4699_v55 = vld [vmem:[#allocation21] sm:$0xff] }
 0x96e   : > { %3486 = vmatpush.bf16.msra.mxu1 %v4483_v52  ;;  %v4451_v13 = vor.u32 %v4683_v0, %v4448_v5  ;;  %v4708_v8 = vld [vmem:[#allocation21 + $0x48] sm:$0xff]  ;;  %v4707_v25 = vld [vmem:[#allocation21 + $0x40] sm:$0xff] }
 0x96f   : > { %v3352_v59 = vmul.f32 %v4981_v35, %v3351_v6  ;;  %v3376_v52 = vld [vmem:[%s6540_s14] sm:$0x3] }
 0x970   : > { %3635 = vmatpush.bf16.msra.mxu2 %v4703_v45  ;;  %v3378_v27 = vperm.slane %v3376_v52, 0  ;;  %v3379_v24 = vperm.slane %v3376_v52, 1 }
 0x971   : > { %3474 = vmatpush.bf16.msra.mxu0 %v4471_v17  ;;  %v3353_v7 = vadd.f32 %v4981_v35, %v3352_v59  ;;  %3648 = vmatpush.bf16.msra.mxu3 %v4711_v57 }
 0x972   : > { %3487 = vmatpush.bf16.msra.mxu1 %v4475_v62  ;;  %v4979_v62 = vld [vmem:[#allocation23] ss:$0 sm:$0xff] }
 0x973   : > { %v3355_v12 = vsel %vm3354_vm15, %v4981_v35, %v3353_v7 }
 0x974   : > { %v3356_v26 = vmul.f32 %v3355_v12, %v3342_v1  ;;  %v3357_v14 = vmul.f32 %v3355_v12, %v3348_v2  ;;  %3636 = vmatpush.bf16.msra.mxu2 %v4702_v9 }
 0x975   : > { %3475 = vmatpush.bf16.msra.mxu0 %v4463_v48  ;;  %3649 = vmatpush.bf16.msra.mxu3 %v4710_v10 }
 0x976   : > { %3488 = vmatpush.bf16.msra.mxu1 %v4467_v19  ;;  %v3374_v18 = vpack.c.bf16 %v3356_v26, %v3356_v26  ;;  %v3375_v50 = vpack.c.bf16 %v3357_v14, %v3357_v14 }
 0x978   : > { %v3384_v21 = vunpack.c.l.b16 %v3374_v18  ;;  %v3385_v22 = vunpack.c.l.b16 %v3375_v50  ;;  %3637 = vmatpush.bf16.msra.mxu2 %v4701_v15 }
 0x979   : > { %3476 = vmatpush.bf16.msra.mxu0 %v4455_v46  ;;  %3650 = vmatpush.bf16.msra.mxu3 %v4709_v56 }
 0x97a   : > { %3489 = vmatpush.bf16.msra.mxu1 %v4459_v60  ;;  %v3387_v29 = vsel %vm3386_vm0, %v3385_v22, %v3384_v21 }
 0x97b   : > { %v3388_v39 = vpack.c.b16 %v3387_v29, %v3387_v29 }
 0x97c   : > { %3638 = vmatpush.bf16.msra.mxu2 %v4700_v23 }
 0x97d   : > { %3477 = vmatpush.bf16.msra.mxu0 %v4447_v11  ;;  %3651 = vmatpush.bf16.msra.mxu3 %v4708_v8 }
 0x97e   : > { %3490 = vmatpush.bf16.msra.mxu1 %v4451_v13 }
 0x980   : > { %3478 = vmatmul.bf16.vlgmr.msra.gmra.mxu0 %v3388_v39  ;;  %3639 = vmatpush.bf16.msra.mxu2 %v4699_v55 }
 0x981   : > { %3491 = vmatmul.bf16.vlgmr.msra.gmra.mxu1 %v3388_v39  ;;  %3652 = vmatpush.bf16.msra.mxu3 %v4707_v25 }
 0x9fd   : > { %v3479_v30 = vpop.f32.mrf.mxu0 }
 0x9fe   : > { %v3492_v31 = vpop.f32.mrf.mxu1  ;;  %v3480_v32 = vadd.f32 %v3479_v30, %v3378_v27 }
 0x9ff   : > { %v3493_v16 = vadd.f32 %v3492_v31, %v3379_v24 }
 0xa00   : > { %v3496_v33 = vmax.f32 %v3480_v32, 0.0 }
 0xa01   : > { %v3497_v34 = vmax.f32 %v3493_v16, 0.0 }
 0xa02   : > { %v3530_v4 = vpack.c.bf16 %v3496_v33, %v3496_v33 }
 0xa03   : > { %v3531_v58 = vpack.c.bf16 %v3497_v34, %v3497_v34 }
 0xa04   : > { %3640 = vmatmul.bf16.vlgmr.msra.gmra.mxu2 %v3530_v4 }
 0xa05   : > { %3653 = vmatmul.bf16.vlgmr.msra.gmra.mxu3 %v3531_v58  ;;  %v3481_v36 = vpop.f32.mrf.mxu0 }
 0xa06   : > { %v3494_v17 = vpop.f32.mrf.mxu1 }
 0xa87   : > { %v3641_v37 = vpop.f32.mrf.mxu2 }
 0xa88   : > { %v3654_v38 = vpop.f32.mrf.mxu3  ;;  %v3642_v40 = vadd.f32 %v4979_v62, %v3641_v37 }
 0xa8a   : > { %v3655_v20 = vadd.f32 %v3654_v38, %v3642_v40 }
 0xa8c   : > { %3658 = vst [vmem:[#allocation24] sm:$0x3] %v3655_v20 }
 0xa8f   : > { %v3643_v41 = vpop.f32.mrf.mxu2 }
 0xa90   : > { %v3656_v43 = vpop.f32.mrf.mxu3 }
 0xa91 PF: > { %s6541_s30 = sld [smem:[#allocation36_spill]]  ;;  %s5489_s28 = smov [#allocation24]  }
 0xa92   : > { %s3665_s0 = sshll.u32 %s5489_s28, 4  ;;  %s6542_s22 = sld [smem:[#allocation54_spill]]  ;;  %s3666_s0 = int_to_ptr.vmem [resolvable:$true] %s3665_s0 }
 0xa97   : > { %p4807_p8 = scmp.eq.s32.totalorder %s6541_s30, 3 }
 0xa98   : > { %s3667_s24 = sshll.u32 %s6542_s22, 4  ;;  %s3668_s24 = int_to_ptr.hbm [resolvable:$true] %s3667_s24 }
 0xa99   : > { %4754 = dma.vmem_to_hbm [thread:$0]  (%p4807_p8), %s3666_s0, 32, %s3668_s24, [#allocation5]  }
 0xa9a   : > { %5449 = dma.done.wait (%p4807_p8), [#allocation5], 32  }
 0xa9b   : > { %5451 = vsyncadd (%p4807_p8), [#allocation5], 4294967264 }
 0xa9c PF: > { %s6543_s21 = sld [smem:[#allocation37_spill]] }
 0xa9d   : > { %s6544_s0 = sld [smem:[#allocation34_spill]] }
 0xa9e   : > { %s6545_s30 = sld [smem:[#allocation35_spill]] }
 0xa9f   : > { %s6546_s20 = sld [smem:[#allocation38_spill]] }
 0xaa2   : > { %p44_p9 = scmp.ge.s32.totalorder %s6543_s21, 6  }
 0xaa4   :  { %46 = sbr.rel (!%p44_p9) target bundleno = 29 (0x1d), region = 263 }
 0xaa9   :  { %3681 = vsyncpa [#allocation4], 1 }
 0xaaa   :  { %3683 = vsyncpa [#allocation4 + $0x1], 1 }
 0xaab   :  { %3684 = vsyncpa [#allocation7], 1 }
 0xaac   :  { %3686 = vsyncpa [#allocation7 + $0x1], 1 }
 0xaad   :  { %3687 = vsyncpa [#allocation10], 1 }
 0xaae   :  { %3689 = vsyncpa [#allocation10 + $0x1], 1 }
 0xaaf   :  { %3690 = vsyncpa [#allocation13], 1 }
 0xab0   :  { %3692 = vsyncpa [#allocation13 + $0x1], 1 }
 0xab1   :  { %3693 = vsyncpa [#allocation16], 1 }
 0xab2   :  { %3695 = vsyncpa [#allocation16 + $0x1], 1 }
 0xab3   :  { %3696 = vsyncpa [#allocation19], 1 }
 0xab4   :  { %3698 = vsyncpa [#allocation19 + $0x1], 1 }
 0xab5   :  { %3699 = vsyncpa [#allocation22], 1 }
 0xab6   :  { %3700 = vsyncpa [#allocation5], 1 }
 0xab7   :  { %3702 = vsyncpa [#allocation5 + $0x1], 1 }

</bundles_post_ra>
